<compile_context>
chip_gen: v7x
topology: tpu7x:2x2x1
jax: 0.10.0
libtpu: 0.0.40
codegen_flags: <defaults>
</compile_context>

<pallas_src>
import jax
import jax.numpy as jnp
from jax.experimental import pallas as pl
from jax.experimental.pallas import tpu as pltpu

EXPANSION = 4
BN_EPS = 1e-5
_VMEM_LIMIT = 32 * 1024 * 1024  # safe on v5e/v6e/v7x; v5e/v6e could go higher.


# ----------------------------------------------------------------------------
# Kernel family 1: fused 1x1 conv (= matmul, BN scale folded into the weight)
#   + bias [+ residual | + second fused matmul (projection shortcut)] [+ ReLU]
# Grid = (Cout blocks, M blocks); M is the minor axis so weight tiles stay
# resident in VMEM across the M sweep.
# ----------------------------------------------------------------------------
def _mm_kernel(relu):
    def kernel(x_ref, w_ref, b_ref, o_ref):
        acc = jnp.dot(x_ref[...], w_ref[...], preferred_element_type=jnp.float32)
        acc = acc + b_ref[...]
        if relu:
            acc = jnp.maximum(acc, 0.0)
        o_ref[...] = acc.astype(o_ref.dtype)
    return kernel


def _mm_res_kernel(relu):
    def kernel(x_ref, w_ref, b_ref, r_ref, o_ref):
        acc = jnp.dot(x_ref[...], w_ref[...], preferred_element_type=jnp.float32)
        acc = acc + b_ref[...] + r_ref[...].astype(jnp.float32)
        if relu:
            acc = jnp.maximum(acc, 0.0)
        o_ref[...] = acc.astype(o_ref.dtype)
    return kernel


def _mm2_kernel(relu):
    # Fused projection shortcut: out = relu(x@w + b + x2@w2 + b2).
    # Keeps the (M, 4*planes) fp32 shortcut tensor out of HBM entirely.
    def kernel(x_ref, w_ref, b_ref, x2_ref, w2_ref, b2_ref, o_ref):
        acc = jnp.dot(x_ref[...], w_ref[...], preferred_element_type=jnp.float32)
        acc = acc + jnp.dot(x2_ref[...], w2_ref[...],
                            preferred_element_type=jnp.float32)
        acc = acc + b_ref[...] + b2_ref[...]
        if relu:
            acc = jnp.maximum(acc, 0.0)
        o_ref[...] = acc.astype(o_ref.dtype)
    return kernel


def conv1x1_bn(x2d, w, bias, *, relu, residual=None, shortcut=None,
               out_dtype=jnp.bfloat16):
    """Fused 1x1 conv over flattened pixel rows.

    x2d: (M, Cin) bf16; w: (Cin, Cout) bf16 with BN scale folded;
    bias: (Cout,) fp32.
    residual: optional fp32 (M, Cout) added in the epilogue (identity shortcut).
    shortcut: optional (x2, w2, b2) second matmul fused in the epilogue
              (projection shortcut); x2: (M, Cin2) bf16, w2: (Cin2, Cout) bf16,
              b2: (Cout,) fp32.
    """
    M, cin = x2d.shape
    cout = w.shape[1]
    tm = 512 if M >= 512 else M           # HBM-bound: big M tile, cdiv grid.
    tn = cout if cout <= 1024 else 1024   # tile Cout so big stages fit v7x VMEM
    grid = (pl.cdiv(cout, tn), pl.cdiv(M, tm))   # M minor -> weight resident

    x_spec = pl.BlockSpec((tm, cin), lambda j, i: (i, 0))
    w_spec = pl.BlockSpec((cin, tn), lambda j, i: (0, j))
    b_spec = pl.BlockSpec((1, tn), lambda j, i: (0, j))
    o_spec = pl.BlockSpec((tm, tn), lambda j, i: (i, j))

    if shortcut is not None:
        x2, w2, b2 = shortcut
        cin2 = x2.shape[1]
        kernel = _mm2_kernel(relu)
        in_specs = [x_spec, w_spec, b_spec,
                    pl.BlockSpec((tm, cin2), lambda j, i: (i, 0)),
                    pl.BlockSpec((cin2, tn), lambda j, i: (0, j)),
                    pl.BlockSpec((1, tn), lambda j, i: (0, j))]
        args = [x2d, w, bias.reshape(1, cout), x2, w2, b2.reshape(1, cout)]
    elif residual is not None:
        kernel = _mm_res_kernel(relu)
        in_specs = [x_spec, w_spec, b_spec,
                    pl.BlockSpec((tm, tn), lambda j, i: (i, j))]
        args = [x2d, w, bias.reshape(1, cout), residual]
    else:
        kernel = _mm_kernel(relu)
        in_specs = [x_spec, w_spec, b_spec]
        args = [x2d, w, bias.reshape(1, cout)]

    return pl.pallas_call(
        kernel,
        out_shape=jax.ShapeDtypeStruct((M, cout), out_dtype),
        grid=grid,
        in_specs=in_specs,
        out_specs=o_spec,
        compiler_params=pltpu.CompilerParams(
            dimension_semantics=("parallel", "parallel"),
            vmem_limit_bytes=_VMEM_LIMIT),
    )(*args)


# ----------------------------------------------------------------------------
# Kernel 2: fused "3x3 conv (pad=1, stride s) + bias + ReLU"
# Grid = (image, output-row-block).  The unpadded image is resident per image;
# a zero-padded copy is built once per image into a VMEM scratch.  The 3 kx
# taps are folded into K (weight is (3, 3*Cin, Cout)).  Output is written flat
# as (N, Ho*Wo, Cout).
# ----------------------------------------------------------------------------
def _pick_row_block(Ho, Wo, cout, budget_elems=16 * 1024):
    """Largest divisor of Ho whose fp32 accumulator (rb*Wo*Cout) is <=64 KiB
    (~16 vregs), so acc + bf16 patches stay in registers without spilling."""
    best = 1
    for d in range(1, Ho + 1):
        if Ho % d == 0 and d * Wo * cout <= budget_elems:
            best = d
    return best


def _make_conv3x3_kernel(H, W, cin, cout, rb, Wo, stride, relu):
    def kernel(x_ref, w_ref, b_ref, o_ref, pad_ref):
        # x_ref:   (1, H, W, Cin)  unpadded image, resident across row blocks
        # w_ref:   (3, 3*Cin, Cout) bf16, BN scale folded, kx taps folded in K
        # b_ref:   (1, Cout) fp32
        # o_ref:   (1, rb*Wo, Cout) flat output rows (no in-kernel 3-D reshape)
        # pad_ref: (H+2, W+2, Cin) bf16 zero-padded copy (built once per image)
        r = pl.program_id(1)

        @pl.when(r == 0)
        def _build_padded():
            # Once per image: zero the halo, copy the interior row by row
            # (VMEM -> VMEM; no extra HBM pass for the padding).
            pad_ref[...] = jnp.zeros_like(pad_ref)

            @pl.loop(0, H)
            def _(h):
                pad_ref[pl.ds(h + 1, 1), pl.ds(1, W), :] = \
                    x_ref[0, pl.ds(h, 1), :, :]

        ro0 = r * rb
        acc = jnp.zeros((rb * Wo, cout), jnp.float32)
        for ky in range(3):
            taps = []
            for kx in range(3):
                if stride == 1:
                    t = pad_ref[pl.ds(ro0 + ky, rb), pl.ds(kx, Wo), :]
                else:
                    # Ref-level strided loads: no value-level [::stride]
                    # relayout copies.
                    t = pad_ref[pl.ds(ro0 * stride + ky, rb, stride=stride),
                                pl.ds(kx, Wo, stride=stride), :]
                taps.append(t)
            # Fold the 3 kx taps into K: one matmul per ky with K = 3*Cin
            # instead of three K-starved matmuls.
            patch = jnp.concatenate(taps, axis=-1).reshape(rb * Wo, 3 * cin)
            acc = acc + jnp.dot(patch, w_ref[ky],
                                preferred_element_type=jnp.float32)
        acc = acc + b_ref[...]
        if relu:
            acc = jnp.maximum(acc, 0.0)
        o_ref[0] = acc.astype(o_ref.dtype)

    return kernel


def conv3x3_bn_relu(x_nhwc, w_folded, bias, stride):
    """3x3, pad=1, stride-s conv + folded BN + ReLU.

    Returns a FLAT (N, Ho*Wo, Cout) bf16 tensor (lane-dense stores; the caller
    consumes flattened pixel rows anyway)."""
    N, H, W, cin = x_nhwc.shape
    cout = w_folded.shape[-1]
    Ho = (H - 1) // stride + 1
    Wo = (W - 1) // stride + 1
    rb = _pick_row_block(Ho, Wo, cout)
    grid = (N, Ho // rb)
    kernel = _make_conv3x3_kernel(H, W, cin, cout, rb, Wo, stride, relu=True)
    return pl.pallas_call(
        kernel,
        out_shape=jax.ShapeDtypeStruct((N, Ho * Wo, cout), jnp.bfloat16),
        grid=grid,
        in_specs=[
            # index_map ignores r -> the image is DMA'd once per n and stays
            # resident in VMEM while the row-block axis iterates.
            pl.BlockSpec((1, H, W, cin), lambda n, r: (n, 0, 0, 0)),
            pl.BlockSpec((3, 3 * cin, cout), lambda n, r: (0, 0, 0)),
            pl.BlockSpec((1, cout), lambda n, r: (0, 0)),
        ],
        out_specs=pl.BlockSpec((1, rb * Wo, cout), lambda n, r: (n, r, 0)),
        scratch_shapes=[pltpu.VMEM((H + 2, W + 2, cin), jnp.bfloat16)],
        compiler_params=pltpu.CompilerParams(
            # r must be sequential: the padded scratch built at r==0 is reused
            # by later row blocks of the same image.
            dimension_semantics=("parallel", "arbitrary"),
            vmem_limit_bytes=_VMEM_LIMIT),
    )(x_nhwc, w_folded, bias.reshape(1, cout))


# ----------------------------------------------------------------------------
# Parameters (deterministic init) + forward
# ----------------------------------------------------------------------------
def _fold_bn(gamma, beta, mean, var):
    scale = gamma / jnp.sqrt(var + BN_EPS)
    bias = beta - mean * scale
    return scale, bias


def init_bottleneck_params(key, in_planes, planes, stride):
    out_planes = EXPANSION * planes
    ks = jax.random.split(key, 8)

    def conv_w(k, cout, cin, kh, kw):
        fan_in = cin * kh * kw
        return (jax.random.normal(k, (cout, cin, kh, kw), jnp.float32)
                / jnp.sqrt(jnp.float32(fan_in)))

    def bn(k, c):
        k1, k2, k3, k4 = jax.random.split(k, 4)
        gamma = 1.0 + 0.1 * jax.random.normal(k1, (c,), jnp.float32)
        beta = 0.1 * jax.random.normal(k2, (c,), jnp.float32)
        mean = 0.1 * jax.random.normal(k3, (c,), jnp.float32)
        var = 0.5 + 0.5 * jnp.abs(jax.random.normal(k4, (c,), jnp.float32))
        return gamma, beta, mean, var

    p = {}
    p["w1_oihw"] = conv_w(ks[0], planes, in_planes, 1, 1)
    p["bn1"] = bn(ks[1], planes)
    p["w2_oihw"] = conv_w(ks[2], planes, planes, 3, 3)
    p["bn2"] = bn(ks[3], planes)
    p["w3_oihw"] = conv_w(ks[4], out_planes, planes, 1, 1)
    p["bn3"] = bn(ks[5], out_planes)
    p["has_shortcut"] = (stride != 1) or (in_planes != out_planes)
    if p["has_shortcut"]:
        p["wsc_oihw"] = conv_w(ks[6], out_planes, in_planes, 1, 1)
        p["bnsc"] = bn(ks[7], out_planes)

    # Kernel-layout weights: BN scale folded into the conv weights (bf16 for
    # the MXU); per-channel bias stays fp32 for the epilogue.
    s1, b1 = _fold_bn(*p["bn1"])
    s2, b2 = _fold_bn(*p["bn2"])
    s3, b3 = _fold_bn(*p["bn3"])
    p["w1k"] = (p["w1_oihw"].reshape(planes, in_planes).T
                * s1[None, :]).astype(jnp.bfloat16)                 # (Cin, Cout)
    # 3x3 weight: HWIO, scaled, then the 3 kx taps folded into K:
    # (3, 3, Cin, Cout) -> (3, 3*Cin, Cout) with K index = kx*Cin + ci, which
    # matches the in-kernel concat([tap_kx0, tap_kx1, tap_kx2], axis=-1).
    w2_hwio = jnp.transpose(p["w2_oihw"], (2, 3, 1, 0)) * s2[None, None, None, :]
    p["w2k"] = w2_hwio.reshape(3, 3 * planes, planes).astype(jnp.bfloat16)
    p["w3k"] = (p["w3_oihw"].reshape(out_planes, planes).T
                * s3[None, :]).astype(jnp.bfloat16)
    p["b1"], p["b2"], p["b3"] = b1, b2, b3
    if p["has_shortcut"]:
        ssc, bsc = _fold_bn(*p["bnsc"])
        p["wsck"] = (p["wsc_oihw"].reshape(out_planes, in_planes).T
                     * ssc[None, :]).astype(jnp.bfloat16)
        p["bsc"] = bsc
    return p


def bottleneck_forward(x_nchw, params, stride):
    x_f32 = jnp.transpose(x_nchw, (0, 2, 3, 1)).astype(jnp.float32)  # NCHW->NHWC
    x = x_f32.astype(jnp.bfloat16)
    N, H, W, cin = x.shape
    planes = params["w1k"].shape[1]
    out_planes = params["w3k"].shape[1]
    Ho = (H - 1) // stride + 1
    Wo = (W - 1) // stride + 1

    # conv1 (1x1) + bn1 + relu   (bf16 activations between kernels)
    out = conv1x1_bn(x.reshape(-1, cin), params["w1k"], params["b1"], relu=True)
    # conv2 (3x3, stride, pad=1) + bn2 + relu  -> flat (N, Ho*Wo, planes)
    out = conv3x3_bn_relu(out.reshape(N, H, W, planes),
                          params["w2k"], params["b2"], stride)
    out2d = out.reshape(-1, planes)

    # conv3 (1x1) + bn3 + shortcut + relu, all fused into one kernel.
    if params["has_shortcut"]:
        # TODO(synk): for stride>1, fold the spatial stride into the shortcut
        # operand's index_map instead of this wrapper-level strided slice.
        xs = x if stride == 1 else x[:, ::stride, ::stride, :]
        out = conv1x1_bn(out2d, params["w3k"], params["b3"], relu=True,
                         shortcut=(xs.reshape(-1, cin), params["wsck"],
                                   params["bsc"]),
                         out_dtype=jnp.float32)
    else:
        out = conv1x1_bn(out2d, params["w3k"], params["b3"], relu=True,
                         residual=x_f32.reshape(-1, out_planes),
                         out_dtype=jnp.float32)
    out = out.reshape(N, Ho, Wo, out_planes)
    return jnp.transpose(out, (0, 3, 1, 2))  # NHWC -> NCHW


# ----------------------------------------------------------------------------
# Pure-JAX fp32 reference (NCHW, matches PyTorch eval-mode semantics)
# ----------------------------------------------------------------------------
def _conv_ref(x, w_oihw, stride=1, padding=0):
    return jax.lax.conv_general_dilated(
        x, w_oihw, (stride, stride), [(padding, padding), (padding, padding)],
        dimension_numbers=("NCHW", "OIHW", "NCHW"))


def _bn_ref(x, bn):
    gamma, beta, mean, var = bn
    s = gamma / jnp.sqrt(var + BN_EPS)
    b = beta - mean * s
    return x * s[None, :, None, None] + b[None, :, None, None]


def bottleneck_reference(x, p, stride):
    out = jax.nn.relu(_bn_ref(_conv_ref(x, p["w1_oihw"]), p["bn1"]))
    out = jax.nn.relu(_bn_ref(_conv_ref(out, p["w2_oihw"], stride, 1), p["bn2"]))
    out = _bn_ref(_conv_ref(out, p["w3_oihw"]), p["bn3"])
    if p["has_shortcut"]:
        sc = _bn_ref(_conv_ref(x, p["wsc_oihw"], stride, 0), p["bnsc"])
    else:
        sc = x
    return jax.nn.relu(out + sc)


# ----------------------------------------------------------------------------
if __name__ == "__main__":
    key = jax.random.PRNGKey(0)
    kx, kp = jax.random.split(key)

    in_planes, planes, stride = 4, 4, 1
    N, H, W = 2, 16, 16
    x = jax.random.normal(kx, (N, in_planes, H, W), jnp.float32)  # NCHW

    params = init_bottleneck_params(kp, in_planes, planes, stride)

    fwd = jax.jit(lambda inp: bottleneck_forward(inp, params, stride))
    out = jax.block_until_ready(fwd(x))

    ref = jax.block_until_ready(bottleneck_reference(x, params, stride))
    assert out.shape == (N, EXPANSION * planes, H // stride, W // stride), out.shape
    # bf16 MXU matmuls (fp32 accumulation) vs. pure-fp32 reference -> ~1e-2
    # relative error expected; tolerance set accordingly.
    max_err = float(jnp.max(jnp.abs(out - ref)))
    assert jnp.allclose(out, ref, atol=5e-2, rtol=5e-2), max_err

    print("KERNEL_OK")
</pallas_src>

<mosaic_0001>
module attributes {stable_mosaic.version = 11 : i64} {
  func.func @kernel(%arg0: i32, %arg1: i32, %arg2: memref<512x4xbf16, #tpu.memory_space<vmem>>, %arg3: memref<4x4xbf16, #tpu.memory_space<vmem>>, %arg4: memref<1x4xf32, #tpu.memory_space<vmem>>, %arg5: memref<512x4xbf16, #tpu.memory_space<vmem>>) attributes {dimension_semantics = [#tpu.dimension_semantics<parallel>, #tpu.dimension_semantics<parallel>], iteration_bounds = array<i64: 1, 1>, scalar_prefetch = 0 : i64, scratch_operands = 0 : i64, tpu.core_type = #tpu.core_type<tc>, window_params = [{transform_indices = @transform_0, window_bounds = array<i64: 512, 4>}, {transform_indices = @transform_1, window_bounds = array<i64: 4, 4>}, {transform_indices = @transform_2, window_bounds = array<i64: 1, 4>}, {transform_indices = @transform_3, window_bounds = array<i64: 512, 4>}]} {
    %c0 = arith.constant 0 : index
    %c0_0 = arith.constant 0 : index
    %0 = vector.load %arg2[%c0, %c0_0] : memref<512x4xbf16, #tpu.memory_space<vmem>>, vector<512x4xbf16>
    %c0_1 = arith.constant 0 : index
    %c0_2 = arith.constant 0 : index
    %1 = vector.load %arg3[%c0_1, %c0_2] : memref<4x4xbf16, #tpu.memory_space<vmem>>, vector<4x4xbf16>
    %cst = arith.constant dense<0.000000e+00> : vector<512x4xf32>
    %2 = tpu.matmul %0, %1, %cst {dimension_numbers = #tpu.dot_dimension_numbers<[1], [0], [0], [1], [0, 0, 1, 1], [], []>} : vector<512x4xbf16>, vector<4x4xbf16>, vector<512x4xf32> -> vector<512x4xf32>
    %c0_3 = arith.constant 0 : index
    %c0_4 = arith.constant 0 : index
    %3 = vector.load %arg4[%c0_3, %c0_4] : memref<1x4xf32, #tpu.memory_space<vmem>>, vector<1x4xf32>
    %4 = vector.broadcast %3 : vector<1x4xf32> to vector<512x4xf32>
    %5 = arith.addf %2, %4 : vector<512x4xf32>
    %cst_5 = arith.constant 0.000000e+00 : f32
    %6 = vector.broadcast %cst_5 : f32 to vector<512x4xf32>
    %7 = arith.maximumf %5, %6 : vector<512x4xf32>
    %8 = arith.truncf %7 : vector<512x4xf32> to vector<512x4xbf16>
    %c0_6 = arith.constant 0 : index
    %c0_7 = arith.constant 0 : index
    %9 = vector.load %arg5[%c0_6, %c0_7] : memref<512x4xbf16, #tpu.memory_space<vmem>>, vector<512x4xbf16>
    tpu.vector_store %arg5[%c0_6, %c0_7], %8 {strides = array<i32>} : memref<512x4xbf16, #tpu.memory_space<vmem>>, vector<512x4xbf16>,
    return
  }
  func.func @transform_0(%arg0: i32, %arg1: i32) -> (i32, i32) {
    %c0_i32 = arith.constant 0 : i32
    %c0_i32_0 = arith.constant 0 : i32
    return %arg1, %c0_i32 : i32, i32
  }
  func.func @transform_1(%arg0: i32, %arg1: i32) -> (i32, i32) {
    %c0_i32 = arith.constant 0 : i32
    %c0_i32_0 = arith.constant 0 : i32
    return %c0_i32, %arg0 : i32, i32
  }
  func.func @transform_2(%arg0: i32, %arg1: i32) -> (i32, i32) {
    %c0_i32 = arith.constant 0 : i32
    %c0_i32_0 = arith.constant 0 : i32
    return %c0_i32, %arg0 : i32, i32
  }
  func.func @transform_3(%arg0: i32, %arg1: i32) -> (i32, i32) {
    %c0_i32 = arith.constant 0 : i32
    return %arg1, %arg0 : i32, i32
  }
}

module attributes {stable_mosaic.version = 11 : i64} {
  func.func @kernel(%arg0: i32, %arg1: i32, %arg2: memref<1x16x16x4xbf16, #tpu.memory_space<vmem>>, %arg3: memref<3x12x4xbf16, #tpu.memory_space<vmem>>, %arg4: memref<1x4xf32, #tpu.memory_space<vmem>>, %arg5: memref<1x256x4xbf16, #tpu.memory_space<vmem>>, %arg6: memref<18x18x4xbf16, #tpu.memory_space<vmem>>) attributes {dimension_semantics = [#tpu.dimension_semantics<parallel>, #tpu.dimension_semantics<arbitrary>], iteration_bounds = array<i64: 2, 1>, scalar_prefetch = 0 : i64, scratch_operands = 1 : i64, tpu.core_type = #tpu.core_type<tc>, window_params = [{transform_indices = @transform_0, window_bounds = array<i64: 1, 16, 16, 4>}, {pipeline_mode = #tpu.pipeline_mode<synchronous>, transform_indices = @transform_1, window_bounds = array<i64: 3, 12, 4>}, {pipeline_mode = #tpu.pipeline_mode<synchronous>, transform_indices = @transform_2, window_bounds = array<i64: 1, 4>}, {transform_indices = @transform_3, window_bounds = array<i64: 1, 256, 4>}]} {
    %c0_i32 = arith.constant 0 : i32
    %0 = arith.cmpi eq, %arg1, %c0_i32 : i32
    %1 = arith.extui %0 : i1 to i32
    %c0_i32_0 = arith.constant 0 : i32
    %2 = arith.cmpi ne, %1, %c0_i32_0 : i32
    scf.if %2 {
      %cst_41 = arith.constant 0.000000e+00 : bf16
      %59 = vector.broadcast %cst_41 : bf16 to vector<18x18x4xbf16>
      %c0_42 = arith.constant 0 : index
      %c0_43 = arith.constant 0 : index
      %c0_44 = arith.constant 0 : index
      %60 = vector.load %arg6[%c0_42, %c0_43, %c0_44] : memref<18x18x4xbf16, #tpu.memory_space<vmem>>, vector<18x18x4xbf16>
      tpu.vector_store %arg6[%c0_42, %c0_43, %c0_44], %59 {strides = array<i32>} : memref<18x18x4xbf16, #tpu.memory_space<vmem>>, vector<18x18x4xbf16>,
      %c0_i32_45 = arith.constant 0 : i32
      %c16_i32_46 = arith.constant 16 : i32
      %61 = arith.addi %c0_i32_45, %c16_i32_46 : i32
      %c1_i32_47 = arith.constant 1 : i32
      scf.for %arg7 = %c0_i32_45 to %61 step %c1_i32_47  : i32 {
        %c1_i32_49 = arith.constant 1 : i32
        %62 = arith.muli %arg7, %c1_i32_49 : i32
        %c0_i32_50 = arith.constant 0 : i32
        %63 = arith.addi %c0_i32_50, %62 : i32
        %c0_51 = arith.constant 0 : index
        %64 = arith.index_cast %63 : i32 to index
        %c0_52 = arith.constant 0 : index
        %c0_53 = arith.constant 0 : index
        %65 = vector.load %arg2[%c0_51, %64, %c0_52, %c0_53] : memref<1x16x16x4xbf16, #tpu.memory_space<vmem>>, vector<1x1x16x4xbf16>
        %66 = vector.shape_cast %65 : vector<1x1x16x4xbf16> to vector<1x16x4xbf16>
        %c1_i32_54 = arith.constant 1 : i32
        %67 = arith.addi %63, %c1_i32_54 : i32
        %68 = arith.index_cast %67 : i32 to index
        %c1_55 = arith.constant 1 : index
        %c0_56 = arith.constant 0 : index
        %69 = vector.load %arg6[%68, %c1_55, %c0_56] : memref<18x18x4xbf16, #tpu.memory_space<vmem>>, vector<1x16x4xbf16>
        tpu.vector_store %arg6[%68, %c1_55, %c0_56], %66 {strides = array<i32>} : memref<18x18x4xbf16, #tpu.memory_space<vmem>>, vector<1x16x4xbf16>,
      }
      %c16_i32_48 = arith.constant 16 : i32
    } else {
    }
    %c16_i32 = arith.constant 16 : i32
    %3 = arith.muli %arg1, %c16_i32 : i32
    %cst = arith.constant 0.000000e+00 : f32
    %4 = vector.broadcast %cst : f32 to vector<256x4xf32>
    %c0_i32_1 = arith.constant 0 : i32
    %5 = arith.addi %3, %c0_i32_1 : i32
    %6 = arith.index_cast %5 : i32 to index
    %c0 = arith.constant 0 : index
    %c0_2 = arith.constant 0 : index
    %7 = vector.load %arg6[%6, %c0, %c0_2] : memref<18x18x4xbf16, #tpu.memory_space<vmem>>, vector<16x16x4xbf16>
    %c0_i32_3 = arith.constant 0 : i32
    %8 = arith.addi %3, %c0_i32_3 : i32
    %9 = arith.index_cast %8 : i32 to index
    %c1 = arith.constant 1 : index
    %c0_4 = arith.constant 0 : index
    %10 = vector.load %arg6[%9, %c1, %c0_4] : memref<18x18x4xbf16, #tpu.memory_space<vmem>>, vector<16x16x4xbf16>
    %c0_i32_5 = arith.constant 0 : i32
    %11 = arith.addi %3, %c0_i32_5 : i32
    %12 = arith.index_cast %11 : i32 to index
    %c2 = arith.constant 2 : index
    %c0_6 = arith.constant 0 : index
    %13 = vector.load %arg6[%12, %c2, %c0_6] : memref<18x18x4xbf16, #tpu.memory_space<vmem>>, vector<16x16x4xbf16>
    %14 = tpu.concatenate %7, %10, %13 in 2 : vector<16x16x4xbf16>, vector<16x16x4xbf16>, vector<16x16x4xbf16> -> vector<16x16x12xbf16>
    %15 = vector.shape_cast %14 : vector<16x16x12xbf16> to vector<256x12xbf16>
    %c0_7 = arith.constant 0 : index
    %c0_8 = arith.constant 0 : index
    %c0_9 = arith.constant 0 : index
    %16 = vector.load %arg3[%c0_7, %c0_8, %c0_9] : memref<3x12x4xbf16, #tpu.memory_space<vmem>>, vector<1x12x4xbf16>
    %17 = vector.shape_cast %16 : vector<1x12x4xbf16> to vector<12x4xbf16>
    %cst_10 = arith.constant dense<0.000000e+00> : vector<256x4xf32>
    %18 = tpu.matmul %15, %17, %cst_10 {dimension_numbers = #tpu.dot_dimension_numbers<[1], [0], [0], [1], [0, 0, 1, 1], [], []>} : vector<256x12xbf16>, vector<12x4xbf16>, vector<256x4xf32> -> vector<256x4xf32>
    %19 = arith.addf %4, %18 : vector<256x4xf32>
    %c1_i32 = arith.constant 1 : i32
    %20 = arith.addi %3, %c1_i32 : i32
    %21 = arith.index_cast %20 : i32 to index
    %c0_11 = arith.constant 0 : index
    %c0_12 = arith.constant 0 : index
    %22 = vector.load %arg6[%21, %c0_11, %c0_12] : memref<18x18x4xbf16, #tpu.memory_space<vmem>>, vector<16x16x4xbf16>
    %c1_i32_13 = arith.constant 1 : i32
    %23 = arith.addi %3, %c1_i32_13 : i32
    %24 = arith.index_cast %23 : i32 to index
    %c1_14 = arith.constant 1 : index
    %c0_15 = arith.constant 0 : index
    %25 = vector.load %arg6[%24, %c1_14, %c0_15] : memref<18x18x4xbf16, #tpu.memory_space<vmem>>, vector<16x16x4xbf16>
    %c1_i32_16 = arith.constant 1 : i32
    %26 = arith.addi %3, %c1_i32_16 : i32
    %27 = arith.index_cast %26 : i32 to index
    %c2_17 = arith.constant 2 : index
    %c0_18 = arith.constant 0 : index
    %28 = vector.load %arg6[%27, %c2_17, %c0_18] : memref<18x18x4xbf16, #tpu.memory_space<vmem>>, vector<16x16x4xbf16>
    %29 = tpu.concatenate %22, %25, %28 in 2 : vector<16x16x4xbf16>, vector<16x16x4xbf16>, vector<16x16x4xbf16> -> vector<16x16x12xbf16>
    %30 = vector.shape_cast %29 : vector<16x16x12xbf16> to vector<256x12xbf16>
    %c1_19 = arith.constant 1 : index
    %c0_20 = arith.constant 0 : index
    %c0_21 = arith.constant 0 : index
    %31 = vector.load %arg3[%c1_19, %c0_20, %c0_21] : memref<3x12x4xbf16, #tpu.memory_space<vmem>>, vector<1x12x4xbf16>
    %32 = vector.shape_cast %31 : vector<1x12x4xbf16> to vector<12x4xbf16>
    %cst_22 = arith.constant dense<0.000000e+00> : vector<256x4xf32>
    %33 = tpu.matmul %30, %32, %cst_22 {dimension_numbers = #tpu.dot_dimension_numbers<[1], [0], [0], [1], [0, 0, 1, 1], [], []>} : vector<256x12xbf16>, vector<12x4xbf16>, vector<256x4xf32> -> vector<256x4xf32>
    %34 = arith.addf %19, %33 : vector<256x4xf32>
    %c2_i32 = arith.constant 2 : i32
    %35 = arith.addi %3, %c2_i32 : i32
    %36 = arith.index_cast %35 : i32 to index
    %c0_23 = arith.constant 0 : index
    %c0_24 = arith.constant 0 : index
    %37 = vector.load %arg6[%36, %c0_23, %c0_24] : memref<18x18x4xbf16, #tpu.memory_space<vmem>>, vector<16x16x4xbf16>
    %c2_i32_25 = arith.constant 2 : i32
    %38 = arith.addi %3, %c2_i32_25 : i32
    %39 = arith.index_cast %38 : i32 to index
    %c1_26 = arith.constant 1 : index
    %c0_27 = arith.constant 0 : index
    %40 = vector.load %arg6[%39, %c1_26, %c0_27] : memref<18x18x4xbf16, #tpu.memory_space<vmem>>, vector<16x16x4xbf16>
    %c2_i32_28 = arith.constant 2 : i32
    %41 = arith.addi %3, %c2_i32_28 : i32
    %42 = arith.index_cast %41 : i32 to index
    %c2_29 = arith.constant 2 : index
    %c0_30 = arith.constant 0 : index
    %43 = vector.load %arg6[%42, %c2_29, %c0_30] : memref<18x18x4xbf16, #tpu.memory_space<vmem>>, vector<16x16x4xbf16>
    %44 = tpu.concatenate %37, %40, %43 in 2 : vector<16x16x4xbf16>, vector<16x16x4xbf16>, vector<16x16x4xbf16> -> vector<16x16x12xbf16>
    %45 = vector.shape_cast %44 : vector<16x16x12xbf16> to vector<256x12xbf16>
    %c2_31 = arith.constant 2 : index
    %c0_32 = arith.constant 0 : index
    %c0_33 = arith.constant 0 : index
    %46 = vector.load %arg3[%c2_31, %c0_32, %c0_33] : memref<3x12x4xbf16, #tpu.memory_space<vmem>>, vector<1x12x4xbf16>
    %47 = vector.shape_cast %46 : vector<1x12x4xbf16> to vector<12x4xbf16>
    %cst_34 = arith.constant dense<0.000000e+00> : vector<256x4xf32>
    %48 = tpu.matmul %45, %47, %cst_34 {dimension_numbers = #tpu.dot_dimension_numbers<[1], [0], [0], [1], [0, 0, 1, 1], [], []>} : vector<256x12xbf16>, vector<12x4xbf16>, vector<256x4xf32> -> vector<256x4xf32>
    %49 = arith.addf %34, %48 : vector<256x4xf32>
    %c0_35 = arith.constant 0 : index
    %c0_36 = arith.constant 0 : index
    %50 = vector.load %arg4[%c0_35, %c0_36] : memref<1x4xf32, #tpu.memory_space<vmem>>, vector<1x4xf32>
    %51 = vector.broadcast %50 : vector<1x4xf32> to vector<256x4xf32>
    %52 = arith.addf %49, %51 : vector<256x4xf32>
    %cst_37 = arith.constant 0.000000e+00 : f32
    %53 = vector.broadcast %cst_37 : f32 to vector<256x4xf32>
    %54 = arith.maximumf %52, %53 : vector<256x4xf32>
    %55 = arith.truncf %54 : vector<256x4xf32> to vector<256x4xbf16>
    %c0_38 = arith.constant 0 : index
    %c0_39 = arith.constant 0 : index
    %c0_40 = arith.constant 0 : index
    %56 = vector.load %arg5[%c0_38, %c0_39, %c0_40] : memref<1x256x4xbf16, #tpu.memory_space<vmem>>, vector<1x256x4xbf16>
    %57 = vector.shape_cast %56 : vector<1x256x4xbf16> to vector<256x4xbf16>
    %58 = vector.shape_cast %55 : vector<256x4xbf16> to vector<1x256x4xbf16>
    tpu.vector_store %arg5[%c0_38, %c0_39, %c0_40], %58 {strides = array<i32>} : memref<1x256x4xbf16, #tpu.memory_space<vmem>>, vector<1x256x4xbf16>,
    return
  }
  func.func @transform_0(%arg0: i32, %arg1: i32) -> (i32, i32, i32, i32) {
    %c0_i32 = arith.constant 0 : i32
    %c0_i32_0 = arith.constant 0 : i32
    %c0_i32_1 = arith.constant 0 : i32
    %c0_i32_2 = arith.constant 0 : i32
    return %arg0, %c0_i32, %c0_i32_0, %c0_i32_1 : i32, i32, i32, i32
  }
  func.func @transform_1(%arg0: i32, %arg1: i32) -> (i32, i32, i32) {
    %c0_i32 = arith.constant 0 : i32
    %c0_i32_0 = arith.constant 0 : i32
    %c0_i32_1 = arith.constant 0 : i32
    %c0_i32_2 = arith.constant 0 : i32
    return %c0_i32, %c0_i32_0, %c0_i32_1 : i32, i32, i32
  }
  func.func @transform_2(%arg0: i32, %arg1: i32) -> (i32, i32) {
    %c0_i32 = arith.constant 0 : i32
    %c0_i32_0 = arith.constant 0 : i32
    %c0_i32_1 = arith.constant 0 : i32
    return %c0_i32, %c0_i32_0 : i32, i32
  }
  func.func @transform_3(%arg0: i32, %arg1: i32) -> (i32, i32, i32) {
    %c0_i32 = arith.constant 0 : i32
    %c0_i32_0 = arith.constant 0 : i32
    return %arg0, %arg1, %c0_i32 : i32, i32, i32
  }
}

module attributes {stable_mosaic.version = 11 : i64} {
  func.func @kernel(%arg0: i32, %arg1: i32, %arg2: memref<512x4xbf16, #tpu.memory_space<vmem>>, %arg3: memref<4x16xbf16, #tpu.memory_space<vmem>>, %arg4: memref<1x16xf32, #tpu.memory_space<vmem>>, %arg5: memref<512x4xbf16, #tpu.memory_space<vmem>>, %arg6: memref<4x16xbf16, #tpu.memory_space<vmem>>, %arg7: memref<1x16xf32, #tpu.memory_space<vmem>>, %arg8: memref<512x16xf32, #tpu.memory_space<vmem>>) attributes {dimension_semantics = [#tpu.dimension_semantics<parallel>, #tpu.dimension_semantics<parallel>], iteration_bounds = array<i64: 1, 1>, scalar_prefetch = 0 : i64, scratch_operands = 0 : i64, tpu.core_type = #tpu.core_type<tc>, window_params = [{transform_indices = @transform_0, window_bounds = array<i64: 512, 4>}, {transform_indices = @transform_1, window_bounds = array<i64: 4, 16>}, {transform_indices = @transform_2, window_bounds = array<i64: 1, 16>}, {transform_indices = @transform_3, window_bounds = array<i64: 512, 4>}, {transform_indices = @transform_4, window_bounds = array<i64: 4, 16>}, {transform_indices = @transform_5, window_bounds = array<i64: 1, 16>}, {transform_indices = @transform_6, window_bounds = array<i64: 512, 16>}]} {
    %c0 = arith.constant 0 : index
    %c0_0 = arith.constant 0 : index
    %0 = vector.load %arg2[%c0, %c0_0] : memref<512x4xbf16, #tpu.memory_space<vmem>>, vector<512x4xbf16>
    %c0_1 = arith.constant 0 : index
    %c0_2 = arith.constant 0 : index
    %1 = vector.load %arg3[%c0_1, %c0_2] : memref<4x16xbf16, #tpu.memory_space<vmem>>, vector<4x16xbf16>
    %cst = arith.constant dense<0.000000e+00> : vector<512x16xf32>
    %2 = tpu.matmul %0, %1, %cst {dimension_numbers = #tpu.dot_dimension_numbers<[1], [0], [0], [1], [0, 0, 1, 1], [], []>} : vector<512x4xbf16>, vector<4x16xbf16>, vector<512x16xf32> -> vector<512x16xf32>
    %c0_3 = arith.constant 0 : index
    %c0_4 = arith.constant 0 : index
    %3 = vector.load %arg5[%c0_3, %c0_4] : memref<512x4xbf16, #tpu.memory_space<vmem>>, vector<512x4xbf16>
    %c0_5 = arith.constant 0 : index
    %c0_6 = arith.constant 0 : index
    %4 = vector.load %arg6[%c0_5, %c0_6] : memref<4x16xbf16, #tpu.memory_space<vmem>>, vector<4x16xbf16>
    %cst_7 = arith.constant dense<0.000000e+00> : vector<512x16xf32>
    %5 = tpu.matmul %3, %4, %cst_7 {dimension_numbers = #tpu.dot_dimension_numbers<[1], [0], [0], [1], [0, 0, 1, 1], [], []>} : vector<512x4xbf16>, vector<4x16xbf16>, vector<512x16xf32> -> vector<512x16xf32>
    %6 = arith.addf %2, %5 : vector<512x16xf32>
    %c0_8 = arith.constant 0 : index
    %c0_9 = arith.constant 0 : index
    %7 = vector.load %arg4[%c0_8, %c0_9] : memref<1x16xf32, #tpu.memory_space<vmem>>, vector<1x16xf32>
    %8 = vector.broadcast %7 : vector<1x16xf32> to vector<512x16xf32>
    %9 = arith.addf %6, %8 : vector<512x16xf32>
    %c0_10 = arith.constant 0 : index
    %c0_11 = arith.constant 0 : index
    %10 = vector.load %arg7[%c0_10, %c0_11] : memref<1x16xf32, #tpu.memory_space<vmem>>, vector<1x16xf32>
    %11 = vector.broadcast %10 : vector<1x16xf32> to vector<512x16xf32>
    %12 = arith.addf %9, %11 : vector<512x16xf32>
    %cst_12 = arith.constant 0.000000e+00 : f32
    %13 = vector.broadcast %cst_12 : f32 to vector<512x16xf32>
    %14 = arith.maximumf %12, %13 : vector<512x16xf32>
    %c0_13 = arith.constant 0 : index
    %c0_14 = arith.constant 0 : index
    %15 = vector.load %arg8[%c0_13, %c0_14] : memref<512x16xf32, #tpu.memory_space<vmem>>, vector<512x16xf32>
    tpu.vector_store %arg8[%c0_13, %c0_14], %14 {strides = array<i32>} : memref<512x16xf32, #tpu.memory_space<vmem>>, vector<512x16xf32>,
    return
  }
  func.func @transform_0(%arg0: i32, %arg1: i32) -> (i32, i32) {
    %c0_i32 = arith.constant 0 : i32
    %c0_i32_0 = arith.constant 0 : i32
    return %arg1, %c0_i32 : i32, i32
  }
  func.func @transform_1(%arg0: i32, %arg1: i32) -> (i32, i32) {
    %c0_i32 = arith.constant 0 : i32
    %c0_i32_0 = arith.constant 0 : i32
    return %c0_i32, %arg0 : i32, i32
  }
  func.func @transform_2(%arg0: i32, %arg1: i32) -> (i32, i32) {
    %c0_i32 = arith.constant 0 : i32
    %c0_i32_0 = arith.constant 0 : i32
    return %c0_i32, %arg0 : i32, i32
  }
  func.func @transform_3(%arg0: i32, %arg1: i32) -> (i32, i32) {
    %c0_i32 = arith.constant 0 : i32
    %c0_i32_0 = arith.constant 0 : i32
    return %arg1, %c0_i32 : i32, i32
  }
  func.func @transform_4(%arg0: i32, %arg1: i32) -> (i32, i32) {
    %c0_i32 = arith.constant 0 : i32
    %c0_i32_0 = arith.constant 0 : i32
    return %c0_i32, %arg0 : i32, i32
  }
  func.func @transform_5(%arg0: i32, %arg1: i32) -> (i32, i32) {
    %c0_i32 = arith.constant 0 : i32
    %c0_i32_0 = arith.constant 0 : i32
    return %c0_i32, %arg0 : i32, i32
  }
  func.func @transform_6(%arg0: i32, %arg1: i32) -> (i32, i32) {
    %c0_i32 = arith.constant 0 : i32
    return %arg1, %arg0 : i32, i32
  }
}

</mosaic_0001>

<bundles_post_ra>
// kernel: _lambda_.3
= control target key start
LH: loop header
LB: loop body
LE: loop exit
PB: predicated region body
PF: predicated region fallthrough
CT: control target
= control target key end

     0   :  { %vm344_vm0 = vcmask 1041408   ;;  %vm247_vm1 = vcmask 31744   ;;  %vm957_vm2 = vcmask 27648   ;;  %s1830_s1 = inlined_call_operand.vmem [shape: bf16[4,4], index: 1, kind: input, shape index: {}]   ;;  %s1831_s0 = inlined_call_operand.vmem [shape: bf16[512,4], index: 0, kind: input, shape index: {}]   ;;  %s1832_s2 = inlined_call_operand.vmem [shape: f32[1,4], index: 2, kind: input, shape index: {}]   ;;  %s1833_s3 = inlined_call_operand.vmem [shape: bf16[512,4], index: 3, kind: output, shape index: {}]  }
   0x1   :  { %v79_v0 = vld [vmem:[%s1830_s1] sm:$0x3]  ;;  %v1324_v4 = vld [vmem:[%s1831_s0 + $0x8] sm:$0xff]   ;;  %v1326_v6 = vld [vmem:[%s1831_s0 + $0x10] sm:$0xff]  }
   0x2   :  { %1320 = vmatprep.subr.msk.bf16.mxu0 %vm344_vm0, %v79_v0  ;;  %1321 = vmatprep.subr.msk.bf16.mxu1 %vm344_vm0, %v79_v0  ;;  %v346_v1 = vsel %vm344_vm0, %v79_v0, 0  ;;  %v1322_v2 = vld [vmem:[%s1831_s0] sm:$0xff]   ;;  %v1325_v5 = vld [vmem:[%s1831_s0 + $0x88] sm:$0xff]   ;;  %v1327_v7 = vld [vmem:[%s1831_s0 + $0x90] sm:$0xff]  }
   0x3   :  { %1253 = vmatpush3.bf16.msra.mxu0 %v346_v1  ;;  %1319 = vmatpush3.bf16.msra.mxu1 %v346_v1  ;;  %v1323_v3 = vld [vmem:[%s1831_s0 + $0x80] sm:$0xff]   ;;  %v1328_v8 = vld [vmem:[%s1831_s0 + $0x18] sm:$0xff]   ;;  %v1332_v12 = vld [vmem:[%s1831_s0 + $0x28] sm:$0xff]  }
   0x4   :  { %1254 = vmatprep.mubr.msk.bf16.mxu0 %vm247_vm1, %v1322_v2  ;;  %1286 = vmatprep.mubr.msk.bf16.mxu1 %vm247_vm1, %v1323_v3  ;;  %v1329_v9 = vld [vmem:[%s1831_s0 + $0x98] sm:$0xff]   ;;  %v1330_v10 = vld [vmem:[%s1831_s0 + $0x20] sm:$0xff]   ;;  %v1333_v13 = vld [vmem:[%s1831_s0 + $0xa8] sm:$0xff]  }
   0x5   :  { %v1331_v11 = vld [vmem:[%s1831_s0 + $0xa0] sm:$0xff]   ;;  %v1334_v14 = vld [vmem:[%s1831_s0 + $0x30] sm:$0xff]   ;;  %v1336_v16 = vld [vmem:[%s1831_s0 + $0x38] sm:$0xff]  }
   0x6   :  { %1255 = vmatmul.mubr.msk.bf16.vlgmr.msra.gmra.mrb[0].mxu0 %vm247_vm1, %v1324_v4  ;;  %1287 = vmatmul.mubr.msk.bf16.vlgmr.msra.gmra.mrb[0].mxu1 %vm247_vm1, %v1325_v5  ;;  %v1335_v15 = vld [vmem:[%s1831_s0 + $0xb0] sm:$0xff]   ;;  %v1337_v17 = vld [vmem:[%s1831_s0 + $0xb8] sm:$0xff]   ;;  %v1338_v18 = vld [vmem:[%s1831_s0 + $0x40] sm:$0xff]  }
   0x7   :  { %1258 = vmatprep.mubr.msk.bf16.mxu0 %vm247_vm1, %v1326_v6  ;;  %1290 = vmatprep.mubr.msk.bf16.mxu1 %vm247_vm1, %v1327_v7  ;;  %v1339_v19 = vld [vmem:[%s1831_s0 + $0xc0] sm:$0xff]   ;;  %v1340_v20 = vld [vmem:[%s1831_s0 + $0x48] sm:$0xff]   ;;  %v1342_v22 = vld [vmem:[%s1831_s0 + $0x50] sm:$0xff]  }
   0x8   :  { %v1341_v21 = vld [vmem:[%s1831_s0 + $0xc8] sm:$0xff]   ;;  %v1343_v23 = vld [vmem:[%s1831_s0 + $0xd0] sm:$0xff]   ;;  %v1344_v24 = vld [vmem:[%s1831_s0 + $0x58] sm:$0xff]  }
   0x9   :  { %v1345_v25 = vld [vmem:[%s1831_s0 + $0xd8] sm:$0xff]   ;;  %v1346_v26 = vld [vmem:[%s1831_s0 + $0x60] sm:$0xff]   ;;  %v1348_v28 = vld [vmem:[%s1831_s0 + $0x68] sm:$0xff]  }
   0xa   :  { %v1347_v27 = vld [vmem:[%s1831_s0 + $0xe0] sm:$0xff]   ;;  %v1349_v29 = vld [vmem:[%s1831_s0 + $0xe8] sm:$0xff]   ;;  %v1350_v30 = vld [vmem:[%s1831_s0 + $0x70] sm:$0xff]  }
   0xb   :  { %v1351_v31 = vld [vmem:[%s1831_s0 + $0xf0] sm:$0xff]   ;;  %v1352_v32 = vld [vmem:[%s1831_s0 + $0x78] sm:$0xff]   ;;  %v1508_v34 = vld [vmem:[%s1832_s2] ss:$0 sm:$0xff] }
   0xc   :  { %v1353_v33 = vld [vmem:[%s1831_s0 + $0xf8] sm:$0xff]  }
   0xe   :  { %1259 = vmatmul.mubr.msk.bf16.gmra.mrb[4].mxu0 %vm247_vm1, %v1328_v8  ;;  %1291 = vmatmul.mubr.msk.bf16.gmra.mrb[4].mxu1 %vm247_vm1, %v1329_v9 }
   0xf   :  { %1262 = vmatprep.mubr.msk.bf16.mxu0 %vm247_vm1, %v1330_v10  ;;  %1294 = vmatprep.mubr.msk.bf16.mxu1 %vm247_vm1, %v1331_v11 }
  0x16   :  { %1263 = vmatmul.mubr.msk.bf16.gmra.mrb[8].mxu0 %vm247_vm1, %v1332_v12  ;;  %1295 = vmatmul.mubr.msk.bf16.gmra.mrb[8].mxu1 %vm247_vm1, %v1333_v13 }
  0x17   :  { %1266 = vmatprep.mubr.msk.bf16.mxu0 %vm247_vm1, %v1334_v14  ;;  %1298 = vmatprep.mubr.msk.bf16.mxu1 %vm247_vm1, %v1335_v15 }
  0x1e   :  { %1267 = vmatmul.mubr.msk.bf16.gmra.mrb[12].mxu0 %vm247_vm1, %v1336_v16  ;;  %1299 = vmatmul.mubr.msk.bf16.gmra.mrb[12].mxu1 %vm247_vm1, %v1337_v17 }
  0x1f   :  { %1270 = vmatprep.mubr.msk.bf16.mxu0 %vm247_vm1, %v1338_v18  ;;  %1302 = vmatprep.mubr.msk.bf16.mxu1 %vm247_vm1, %v1339_v19 }
  0x26   :  { %1271 = vmatmul.mubr.msk.bf16.gmra.mrb[16].mxu0 %vm247_vm1, %v1340_v20  ;;  %1303 = vmatmul.mubr.msk.bf16.gmra.mrb[16].mxu1 %vm247_vm1, %v1341_v21 }
  0x27   :  { %1274 = vmatprep.mubr.msk.bf16.mxu0 %vm247_vm1, %v1342_v22  ;;  %1306 = vmatprep.mubr.msk.bf16.mxu1 %vm247_vm1, %v1343_v23 }
  0x2e   :  { %1275 = vmatmul.mubr.msk.bf16.gmra.mrb[20].mxu0 %vm247_vm1, %v1344_v24  ;;  %1307 = vmatmul.mubr.msk.bf16.gmra.mrb[20].mxu1 %vm247_vm1, %v1345_v25 }
  0x2f   :  { %1278 = vmatprep.mubr.msk.bf16.mxu0 %vm247_vm1, %v1346_v26  ;;  %1310 = vmatprep.mubr.msk.bf16.mxu1 %vm247_vm1, %v1347_v27 }
  0x36   :  { %1279 = vmatmul.mubr.msk.bf16.gmra.mrb[24].mxu0 %vm247_vm1, %v1348_v28  ;;  %1311 = vmatmul.mubr.msk.bf16.gmra.mrb[24].mxu1 %vm247_vm1, %v1349_v29 }
  0x37   :  { %1282 = vmatprep.mubr.msk.bf16.mxu0 %vm247_vm1, %v1350_v30  ;;  %1314 = vmatprep.mubr.msk.bf16.mxu1 %vm247_vm1, %v1351_v31 }
  0x3e   :  { %1283 = vmatmul.mubr.msk.bf16.gmra.mrb[28].mxu0 %vm247_vm1, %v1352_v32  ;;  %1315 = vmatmul.mubr.msk.bf16.gmra.mrb[28].mxu1 %vm247_vm1, %v1353_v33 }
  0xd9   :  { %v1256_v35 = vpop.f32.mrb[0].mxu0  ;;  %v1288_v37 = vpop.f32.mrb[0].mxu1 }
  0xda   :  { %v391_v36 = vadd.f32 %v1256_v35, %v1508_v34  ;;  %v382_v38 = vpop.f32.mrb[1].mxu0  ;;  %v519_v39 = vadd.f32 %v1288_v37, %v1508_v34  ;;  %v510_v41 = vpop.f32.mrb[1].mxu1 }
  0xdb   :  { %v383_v40 = vadd.f32 %v1508_v34, %v382_v38  ;;  %v1257_v42 = vpop.f32.mrb[2].mxu0  ;;  %v511_v44 = vadd.f32 %v1508_v34, %v510_v41  ;;  %v1289_v46 = vpop.f32.mrb[2].mxu1 }
  0xdc   :  { %v639_v43 = vmax.f32 %v391_v36, 0.0  ;;  %v394_v45 = vadd.f32 %v1257_v42, %v1508_v34  ;;  %v385_v47 = vpop.f32.mrb[3].mxu0  ;;  %v671_v48 = vmax.f32 %v519_v39, 0.0  ;;  %v522_v50 = vadd.f32 %v1289_v46, %v1508_v34  ;;  %v513_v52 = vpop.f32.mrb[3].mxu1 }
  0xdd   :  { %v637_v49 = vmax.f32 %v383_v40, 0.0  ;;  %v386_v51 = vadd.f32 %v1508_v34, %v385_v47  ;;  %v669_v54 = vmax.f32 %v511_v44, 0.0  ;;  %v514_v56 = vadd.f32 %v1508_v34, %v513_v52 }
  0xde   :  { %v1157_v53 = vpack.c.bf16 %v639_v43, %v639_v43  ;;  %v640_v55 = vmax.f32 %v394_v45, 0.0  ;;  %v1189_v57 = vpack.c.bf16 %v671_v48, %v671_v48  ;;  %v672_v59 = vmax.f32 %v522_v50, 0.0 }
  0xdf   :  { %v1155_v58 = vpack.c.bf16 %v637_v49, %v637_v49  ;;  %v638_v60 = vmax.f32 %v386_v51, 0.0  ;;  %v1187_v61 = vpack.c.bf16 %v669_v54, %v669_v54  ;;  %v670_v63 = vmax.f32 %v514_v56, 0.0 }
  0xe0   :  { %960 = vst.msk [vmem:[%s1833_s3 + $0x8] sm:$0xf] %vm957_vm2, %v1157_v53  ;;  %v1158_v62 = vpack.c.bf16 %v640_v55, %v640_v55  ;;  %992 = vst.msk [vmem:[%s1833_s3 + $0x88] sm:$0xf] %vm957_vm2, %v1189_v57  ;;  %v1190_v0 = vpack.c.bf16 %v672_v59, %v672_v59 }
  0xe1   :  { %958 = vst.msk [vmem:[%s1833_s3] sm:$0xf] %vm957_vm2, %v1155_v58  ;;  %v1156_v1 = vpack.c.bf16 %v638_v60, %v638_v60  ;;  %v1260_v2 = vpop.f32.mrb[4].mxu0  ;;  %990 = vst.msk [vmem:[%s1833_s3 + $0x80] sm:$0xf] %vm957_vm2, %v1187_v61  ;;  %v1188_v3 = vpack.c.bf16 %v670_v63, %v670_v63  ;;  %v1292_v5 = vpop.f32.mrb[4].mxu1 }
  0xe2   :  { %961 = vst.msk [vmem:[%s1833_s3 + $0xc] sm:$0xf] %vm957_vm2, %v1158_v62  ;;  %v407_v4 = vadd.f32 %v1260_v2, %v1508_v34  ;;  %v398_v6 = vpop.f32.mrb[5].mxu0  ;;  %993 = vst.msk [vmem:[%s1833_s3 + $0x8c] sm:$0xf] %vm957_vm2, %v1190_v0  ;;  %v535_v7 = vadd.f32 %v1292_v5, %v1508_v34  ;;  %v526_v9 = vpop.f32.mrb[5].mxu1 }
  0xe3   :  { %959 = vst.msk [vmem:[%s1833_s3 + $0x4] sm:$0xf] %vm957_vm2, %v1156_v1  ;;  %v399_v8 = vadd.f32 %v1508_v34, %v398_v6  ;;  %v1261_v10 = vpop.f32.mrb[6].mxu0  ;;  %991 = vst.msk [vmem:[%s1833_s3 + $0x84] sm:$0xf] %vm957_vm2, %v1188_v3  ;;  %v527_v12 = vadd.f32 %v1508_v34, %v526_v9  ;;  %v1293_v14 = vpop.f32.mrb[6].mxu1 }
  0xe4   :  { %v643_v11 = vmax.f32 %v407_v4, 0.0  ;;  %v410_v13 = vadd.f32 %v1261_v10, %v1508_v34  ;;  %v401_v15 = vpop.f32.mrb[7].mxu0  ;;  %v675_v16 = vmax.f32 %v535_v7, 0.0  ;;  %v538_v18 = vadd.f32 %v1293_v14, %v1508_v34  ;;  %v529_v20 = vpop.f32.mrb[7].mxu1 }
  0xe5   :  { %v641_v17 = vmax.f32 %v399_v8, 0.0  ;;  %v402_v19 = vadd.f32 %v1508_v34, %v401_v15  ;;  %v673_v22 = vmax.f32 %v527_v12, 0.0  ;;  %v530_v24 = vadd.f32 %v1508_v34, %v529_v20 }
  0xe6   :  { %v1161_v21 = vpack.c.bf16 %v643_v11, %v643_v11  ;;  %v644_v23 = vmax.f32 %v410_v13, 0.0  ;;  %v1193_v25 = vpack.c.bf16 %v675_v16, %v675_v16  ;;  %v676_v27 = vmax.f32 %v538_v18, 0.0 }
  0xe7   :  { %v1159_v26 = vpack.c.bf16 %v641_v17, %v641_v17  ;;  %v642_v28 = vmax.f32 %v402_v19, 0.0  ;;  %v1191_v29 = vpack.c.bf16 %v673_v22, %v673_v22  ;;  %v674_v31 = vmax.f32 %v530_v24, 0.0 }
  0xe8   :  { %964 = vst.msk [vmem:[%s1833_s3 + $0x18] sm:$0xf] %vm957_vm2, %v1161_v21  ;;  %v1162_v30 = vpack.c.bf16 %v644_v23, %v644_v23  ;;  %996 = vst.msk [vmem:[%s1833_s3 + $0x98] sm:$0xf] %vm957_vm2, %v1193_v25  ;;  %v1194_v32 = vpack.c.bf16 %v676_v27, %v676_v27 }
  0xe9   :  { %962 = vst.msk [vmem:[%s1833_s3 + $0x10] sm:$0xf] %vm957_vm2, %v1159_v26  ;;  %v1160_v33 = vpack.c.bf16 %v642_v28, %v642_v28  ;;  %v1264_v35 = vpop.f32.mrb[8].mxu0  ;;  %994 = vst.msk [vmem:[%s1833_s3 + $0x90] sm:$0xf] %vm957_vm2, %v1191_v29  ;;  %v1192_v36 = vpack.c.bf16 %v674_v31, %v674_v31  ;;  %v1296_v38 = vpop.f32.mrb[8].mxu1 }
  0xea   :  { %965 = vst.msk [vmem:[%s1833_s3 + $0x1c] sm:$0xf] %vm957_vm2, %v1162_v30  ;;  %v423_v37 = vadd.f32 %v1264_v35, %v1508_v34  ;;  %v414_v39 = vpop.f32.mrb[9].mxu0  ;;  %997 = vst.msk [vmem:[%s1833_s3 + $0x9c] sm:$0xf] %vm957_vm2, %v1194_v32  ;;  %v551_v40 = vadd.f32 %v1296_v38, %v1508_v34  ;;  %v542_v42 = vpop.f32.mrb[9].mxu1 }
  0xeb   :  { %963 = vst.msk [vmem:[%s1833_s3 + $0x14] sm:$0xf] %vm957_vm2, %v1160_v33  ;;  %v415_v41 = vadd.f32 %v1508_v34, %v414_v39  ;;  %v1265_v43 = vpop.f32.mrb[10].mxu0  ;;  %995 = vst.msk [vmem:[%s1833_s3 + $0x94] sm:$0xf] %vm957_vm2, %v1192_v36  ;;  %v543_v45 = vadd.f32 %v1508_v34, %v542_v42  ;;  %v1297_v47 = vpop.f32.mrb[10].mxu1 }
  0xec   :  { %v647_v44 = vmax.f32 %v423_v37, 0.0  ;;  %v426_v46 = vadd.f32 %v1265_v43, %v1508_v34  ;;  %v417_v48 = vpop.f32.mrb[11].mxu0  ;;  %v679_v49 = vmax.f32 %v551_v40, 0.0  ;;  %v554_v51 = vadd.f32 %v1297_v47, %v1508_v34  ;;  %v545_v53 = vpop.f32.mrb[11].mxu1 }
  0xed   :  { %v645_v50 = vmax.f32 %v415_v41, 0.0  ;;  %v418_v52 = vadd.f32 %v1508_v34, %v417_v48  ;;  %v677_v55 = vmax.f32 %v543_v45, 0.0  ;;  %v546_v57 = vadd.f32 %v1508_v34, %v545_v53 }
  0xee   :  { %v1165_v54 = vpack.c.bf16 %v647_v44, %v647_v44  ;;  %v648_v56 = vmax.f32 %v426_v46, 0.0  ;;  %v1197_v58 = vpack.c.bf16 %v679_v49, %v679_v49  ;;  %v680_v60 = vmax.f32 %v554_v51, 0.0 }
  0xef   :  { %v1163_v59 = vpack.c.bf16 %v645_v50, %v645_v50  ;;  %v646_v61 = vmax.f32 %v418_v52, 0.0  ;;  %v1195_v62 = vpack.c.bf16 %v677_v55, %v677_v55  ;;  %v678_v0 = vmax.f32 %v546_v57, 0.0 }
  0xf0   :  { %968 = vst.msk [vmem:[%s1833_s3 + $0x28] sm:$0xf] %vm957_vm2, %v1165_v54  ;;  %v1166_v63 = vpack.c.bf16 %v648_v56, %v648_v56  ;;  %1000 = vst.msk [vmem:[%s1833_s3 + $0xa8] sm:$0xf] %vm957_vm2, %v1197_v58  ;;  %v1198_v1 = vpack.c.bf16 %v680_v60, %v680_v60 }
  0xf1   :  { %966 = vst.msk [vmem:[%s1833_s3 + $0x20] sm:$0xf] %vm957_vm2, %v1163_v59  ;;  %v1164_v2 = vpack.c.bf16 %v646_v61, %v646_v61  ;;  %v1268_v3 = vpop.f32.mrb[12].mxu0  ;;  %998 = vst.msk [vmem:[%s1833_s3 + $0xa0] sm:$0xf] %vm957_vm2, %v1195_v62  ;;  %v1196_v4 = vpack.c.bf16 %v678_v0, %v678_v0  ;;  %v1300_v6 = vpop.f32.mrb[12].mxu1 }
  0xf2   :  { %969 = vst.msk [vmem:[%s1833_s3 + $0x2c] sm:$0xf] %vm957_vm2, %v1166_v63  ;;  %v439_v5 = vadd.f32 %v1268_v3, %v1508_v34  ;;  %v430_v7 = vpop.f32.mrb[13].mxu0  ;;  %1001 = vst.msk [vmem:[%s1833_s3 + $0xac] sm:$0xf] %vm957_vm2, %v1198_v1  ;;  %v567_v8 = vadd.f32 %v1300_v6, %v1508_v34  ;;  %v558_v10 = vpop.f32.mrb[13].mxu1 }
  0xf3   :  { %967 = vst.msk [vmem:[%s1833_s3 + $0x24] sm:$0xf] %vm957_vm2, %v1164_v2  ;;  %v431_v9 = vadd.f32 %v1508_v34, %v430_v7  ;;  %v1269_v11 = vpop.f32.mrb[14].mxu0  ;;  %999 = vst.msk [vmem:[%s1833_s3 + $0xa4] sm:$0xf] %vm957_vm2, %v1196_v4  ;;  %v559_v13 = vadd.f32 %v1508_v34, %v558_v10  ;;  %v1301_v15 = vpop.f32.mrb[14].mxu1 }
  0xf4   :  { %v651_v12 = vmax.f32 %v439_v5, 0.0  ;;  %v442_v14 = vadd.f32 %v1269_v11, %v1508_v34  ;;  %v433_v16 = vpop.f32.mrb[15].mxu0  ;;  %v683_v17 = vmax.f32 %v567_v8, 0.0  ;;  %v570_v19 = vadd.f32 %v1301_v15, %v1508_v34  ;;  %v561_v21 = vpop.f32.mrb[15].mxu1 }
  0xf5   :  { %v649_v18 = vmax.f32 %v431_v9, 0.0  ;;  %v434_v20 = vadd.f32 %v1508_v34, %v433_v16  ;;  %v681_v23 = vmax.f32 %v559_v13, 0.0  ;;  %v562_v25 = vadd.f32 %v1508_v34, %v561_v21 }
  0xf6   :  { %v1169_v22 = vpack.c.bf16 %v651_v12, %v651_v12  ;;  %v652_v24 = vmax.f32 %v442_v14, 0.0  ;;  %v1201_v26 = vpack.c.bf16 %v683_v17, %v683_v17  ;;  %v684_v28 = vmax.f32 %v570_v19, 0.0 }
  0xf7   :  { %v1167_v27 = vpack.c.bf16 %v649_v18, %v649_v18  ;;  %v650_v29 = vmax.f32 %v434_v20, 0.0  ;;  %v1199_v30 = vpack.c.bf16 %v681_v23, %v681_v23  ;;  %v682_v32 = vmax.f32 %v562_v25, 0.0 }
  0xf8   :  { %972 = vst.msk [vmem:[%s1833_s3 + $0x38] sm:$0xf] %vm957_vm2, %v1169_v22  ;;  %v1170_v31 = vpack.c.bf16 %v652_v24, %v652_v24  ;;  %1004 = vst.msk [vmem:[%s1833_s3 + $0xb8] sm:$0xf] %vm957_vm2, %v1201_v26  ;;  %v1202_v33 = vpack.c.bf16 %v684_v28, %v684_v28 }
  0xf9   :  { %970 = vst.msk [vmem:[%s1833_s3 + $0x30] sm:$0xf] %vm957_vm2, %v1167_v27  ;;  %v1168_v35 = vpack.c.bf16 %v650_v29, %v650_v29  ;;  %v1272_v36 = vpop.f32.mrb[16].mxu0  ;;  %1002 = vst.msk [vmem:[%s1833_s3 + $0xb0] sm:$0xf] %vm957_vm2, %v1199_v30  ;;  %v1200_v37 = vpack.c.bf16 %v682_v32, %v682_v32  ;;  %v1304_v39 = vpop.f32.mrb[16].mxu1 }
  0xfa   :  { %973 = vst.msk [vmem:[%s1833_s3 + $0x3c] sm:$0xf] %vm957_vm2, %v1170_v31  ;;  %v455_v38 = vadd.f32 %v1272_v36, %v1508_v34  ;;  %v446_v40 = vpop.f32.mrb[17].mxu0  ;;  %1005 = vst.msk [vmem:[%s1833_s3 + $0xbc] sm:$0xf] %vm957_vm2, %v1202_v33  ;;  %v583_v41 = vadd.f32 %v1304_v39, %v1508_v34  ;;  %v574_v43 = vpop.f32.mrb[17].mxu1 }
  0xfb   :  { %971 = vst.msk [vmem:[%s1833_s3 + $0x34] sm:$0xf] %vm957_vm2, %v1168_v35  ;;  %v447_v42 = vadd.f32 %v1508_v34, %v446_v40  ;;  %v1273_v44 = vpop.f32.mrb[18].mxu0  ;;  %1003 = vst.msk [vmem:[%s1833_s3 + $0xb4] sm:$0xf] %vm957_vm2, %v1200_v37  ;;  %v575_v46 = vadd.f32 %v1508_v34, %v574_v43  ;;  %v1305_v48 = vpop.f32.mrb[18].mxu1 }
  0xfc   :  { %v655_v45 = vmax.f32 %v455_v38, 0.0  ;;  %v458_v47 = vadd.f32 %v1273_v44, %v1508_v34  ;;  %v449_v49 = vpop.f32.mrb[19].mxu0  ;;  %v687_v50 = vmax.f32 %v583_v41, 0.0  ;;  %v586_v52 = vadd.f32 %v1305_v48, %v1508_v34  ;;  %v577_v54 = vpop.f32.mrb[19].mxu1 }
  0xfd   :  { %v653_v51 = vmax.f32 %v447_v42, 0.0  ;;  %v450_v53 = vadd.f32 %v1508_v34, %v449_v49  ;;  %v685_v56 = vmax.f32 %v575_v46, 0.0  ;;  %v578_v58 = vadd.f32 %v1508_v34, %v577_v54 }
  0xfe   :  { %v1173_v55 = vpack.c.bf16 %v655_v45, %v655_v45  ;;  %v656_v57 = vmax.f32 %v458_v47, 0.0  ;;  %v1205_v59 = vpack.c.bf16 %v687_v50, %v687_v50  ;;  %v688_v61 = vmax.f32 %v586_v52, 0.0 }
  0xff   :  { %v1171_v60 = vpack.c.bf16 %v653_v51, %v653_v51  ;;  %v654_v62 = vmax.f32 %v450_v53, 0.0  ;;  %v1203_v63 = vpack.c.bf16 %v685_v56, %v685_v56  ;;  %v686_v1 = vmax.f32 %v578_v58, 0.0 }
 0x100   :  { %976 = vst.msk [vmem:[%s1833_s3 + $0x48] sm:$0xf] %vm957_vm2, %v1173_v55  ;;  %v1174_v0 = vpack.c.bf16 %v656_v57, %v656_v57  ;;  %1008 = vst.msk [vmem:[%s1833_s3 + $0xc8] sm:$0xf] %vm957_vm2, %v1205_v59  ;;  %v1206_v2 = vpack.c.bf16 %v688_v61, %v688_v61 }
 0x101   :  { %974 = vst.msk [vmem:[%s1833_s3 + $0x40] sm:$0xf] %vm957_vm2, %v1171_v60  ;;  %v1172_v3 = vpack.c.bf16 %v654_v62, %v654_v62  ;;  %v1276_v4 = vpop.f32.mrb[20].mxu0  ;;  %1006 = vst.msk [vmem:[%s1833_s3 + $0xc0] sm:$0xf] %vm957_vm2, %v1203_v63  ;;  %v1204_v5 = vpack.c.bf16 %v686_v1, %v686_v1  ;;  %v1308_v7 = vpop.f32.mrb[20].mxu1 }
 0x102   :  { %977 = vst.msk [vmem:[%s1833_s3 + $0x4c] sm:$0xf] %vm957_vm2, %v1174_v0  ;;  %v471_v6 = vadd.f32 %v1276_v4, %v1508_v34  ;;  %v462_v8 = vpop.f32.mrb[21].mxu0  ;;  %1009 = vst.msk [vmem:[%s1833_s3 + $0xcc] sm:$0xf] %vm957_vm2, %v1206_v2  ;;  %v599_v9 = vadd.f32 %v1308_v7, %v1508_v34  ;;  %v590_v11 = vpop.f32.mrb[21].mxu1 }
 0x103   :  { %975 = vst.msk [vmem:[%s1833_s3 + $0x44] sm:$0xf] %vm957_vm2, %v1172_v3  ;;  %v463_v10 = vadd.f32 %v1508_v34, %v462_v8  ;;  %v1277_v12 = vpop.f32.mrb[22].mxu0  ;;  %1007 = vst.msk [vmem:[%s1833_s3 + $0xc4] sm:$0xf] %vm957_vm2, %v1204_v5  ;;  %v591_v14 = vadd.f32 %v1508_v34, %v590_v11  ;;  %v1309_v16 = vpop.f32.mrb[22].mxu1 }
 0x104   :  { %v659_v13 = vmax.f32 %v471_v6, 0.0  ;;  %v474_v15 = vadd.f32 %v1277_v12, %v1508_v34  ;;  %v465_v17 = vpop.f32.mrb[23].mxu0  ;;  %v691_v18 = vmax.f32 %v599_v9, 0.0  ;;  %v602_v20 = vadd.f32 %v1309_v16, %v1508_v34  ;;  %v593_v22 = vpop.f32.mrb[23].mxu1 }
 0x105   :  { %v657_v19 = vmax.f32 %v463_v10, 0.0  ;;  %v466_v21 = vadd.f32 %v1508_v34, %v465_v17  ;;  %v689_v24 = vmax.f32 %v591_v14, 0.0  ;;  %v594_v26 = vadd.f32 %v1508_v34, %v593_v22 }
 0x106   :  { %v1177_v23 = vpack.c.bf16 %v659_v13, %v659_v13  ;;  %v660_v25 = vmax.f32 %v474_v15, 0.0  ;;  %v1209_v27 = vpack.c.bf16 %v691_v18, %v691_v18  ;;  %v692_v29 = vmax.f32 %v602_v20, 0.0 }
 0x107   :  { %v1175_v28 = vpack.c.bf16 %v657_v19, %v657_v19  ;;  %v658_v30 = vmax.f32 %v466_v21, 0.0  ;;  %v1207_v31 = vpack.c.bf16 %v689_v24, %v689_v24  ;;  %v690_v33 = vmax.f32 %v594_v26, 0.0 }
 0x108   :  { %980 = vst.msk [vmem:[%s1833_s3 + $0x58] sm:$0xf] %vm957_vm2, %v1177_v23  ;;  %v1178_v32 = vpack.c.bf16 %v660_v25, %v660_v25  ;;  %1012 = vst.msk [vmem:[%s1833_s3 + $0xd8] sm:$0xf] %vm957_vm2, %v1209_v27  ;;  %v1210_v35 = vpack.c.bf16 %v692_v29, %v692_v29 }
 0x109   :  { %978 = vst.msk [vmem:[%s1833_s3 + $0x50] sm:$0xf] %vm957_vm2, %v1175_v28  ;;  %v1176_v36 = vpack.c.bf16 %v658_v30, %v658_v30  ;;  %v1280_v37 = vpop.f32.mrb[24].mxu0  ;;  %1010 = vst.msk [vmem:[%s1833_s3 + $0xd0] sm:$0xf] %vm957_vm2, %v1207_v31  ;;  %v1208_v38 = vpack.c.bf16 %v690_v33, %v690_v33  ;;  %v1312_v40 = vpop.f32.mrb[24].mxu1 }
 0x10a   :  { %981 = vst.msk [vmem:[%s1833_s3 + $0x5c] sm:$0xf] %vm957_vm2, %v1178_v32  ;;  %v487_v39 = vadd.f32 %v1280_v37, %v1508_v34  ;;  %v478_v41 = vpop.f32.mrb[25].mxu0  ;;  %1013 = vst.msk [vmem:[%s1833_s3 + $0xdc] sm:$0xf] %vm957_vm2, %v1210_v35  ;;  %v615_v42 = vadd.f32 %v1312_v40, %v1508_v34  ;;  %v606_v44 = vpop.f32.mrb[25].mxu1 }
 0x10b   :  { %979 = vst.msk [vmem:[%s1833_s3 + $0x54] sm:$0xf] %vm957_vm2, %v1176_v36  ;;  %v479_v43 = vadd.f32 %v1508_v34, %v478_v41  ;;  %v1281_v45 = vpop.f32.mrb[26].mxu0  ;;  %1011 = vst.msk [vmem:[%s1833_s3 + $0xd4] sm:$0xf] %vm957_vm2, %v1208_v38  ;;  %v607_v47 = vadd.f32 %v1508_v34, %v606_v44  ;;  %v1313_v49 = vpop.f32.mrb[26].mxu1 }
 0x10c   :  { %v663_v46 = vmax.f32 %v487_v39, 0.0  ;;  %v490_v48 = vadd.f32 %v1281_v45, %v1508_v34  ;;  %v481_v50 = vpop.f32.mrb[27].mxu0  ;;  %v695_v51 = vmax.f32 %v615_v42, 0.0  ;;  %v618_v53 = vadd.f32 %v1313_v49, %v1508_v34  ;;  %v609_v55 = vpop.f32.mrb[27].mxu1 }
 0x10d   :  { %v661_v52 = vmax.f32 %v479_v43, 0.0  ;;  %v482_v54 = vadd.f32 %v1508_v34, %v481_v50  ;;  %v693_v57 = vmax.f32 %v607_v47, 0.0  ;;  %v610_v59 = vadd.f32 %v1508_v34, %v609_v55 }
 0x10e   :  { %v1181_v56 = vpack.c.bf16 %v663_v46, %v663_v46  ;;  %v664_v58 = vmax.f32 %v490_v48, 0.0  ;;  %v1213_v60 = vpack.c.bf16 %v695_v51, %v695_v51  ;;  %v696_v62 = vmax.f32 %v618_v53, 0.0 }
 0x10f   :  { %v1179_v61 = vpack.c.bf16 %v661_v52, %v661_v52  ;;  %v662_v63 = vmax.f32 %v482_v54, 0.0  ;;  %v1211_v0 = vpack.c.bf16 %v693_v57, %v693_v57  ;;  %v694_v2 = vmax.f32 %v610_v59, 0.0 }
 0x110   :  { %984 = vst.msk [vmem:[%s1833_s3 + $0x68] sm:$0xf] %vm957_vm2, %v1181_v56  ;;  %v1182_v1 = vpack.c.bf16 %v664_v58, %v664_v58  ;;  %1016 = vst.msk [vmem:[%s1833_s3 + $0xe8] sm:$0xf] %vm957_vm2, %v1213_v60  ;;  %v1214_v3 = vpack.c.bf16 %v696_v62, %v696_v62 }
 0x111   :  { %982 = vst.msk [vmem:[%s1833_s3 + $0x60] sm:$0xf] %vm957_vm2, %v1179_v61  ;;  %v1180_v4 = vpack.c.bf16 %v662_v63, %v662_v63  ;;  %v1284_v5 = vpop.f32.mrb[28].mxu0  ;;  %1014 = vst.msk [vmem:[%s1833_s3 + $0xe0] sm:$0xf] %vm957_vm2, %v1211_v0  ;;  %v1212_v6 = vpack.c.bf16 %v694_v2, %v694_v2  ;;  %v1316_v8 = vpop.f32.mrb[28].mxu1 }
 0x112   :  { %985 = vst.msk [vmem:[%s1833_s3 + $0x6c] sm:$0xf] %vm957_vm2, %v1182_v1  ;;  %v503_v7 = vadd.f32 %v1284_v5, %v1508_v34  ;;  %v494_v9 = vpop.f32.mrb[29].mxu0  ;;  %1017 = vst.msk [vmem:[%s1833_s3 + $0xec] sm:$0xf] %vm957_vm2, %v1214_v3  ;;  %v631_v10 = vadd.f32 %v1316_v8, %v1508_v34  ;;  %v622_v12 = vpop.f32.mrb[29].mxu1 }
 0x113   :  { %983 = vst.msk [vmem:[%s1833_s3 + $0x64] sm:$0xf] %vm957_vm2, %v1180_v4  ;;  %v495_v11 = vadd.f32 %v1508_v34, %v494_v9  ;;  %v1285_v13 = vpop.f32.mrb[30].mxu0  ;;  %1015 = vst.msk [vmem:[%s1833_s3 + $0xe4] sm:$0xf] %vm957_vm2, %v1212_v6  ;;  %v623_v15 = vadd.f32 %v1508_v34, %v622_v12  ;;  %v1317_v17 = vpop.f32.mrb[30].mxu1 }
 0x114   :  { %v667_v14 = vmax.f32 %v503_v7, 0.0  ;;  %v506_v16 = vadd.f32 %v1285_v13, %v1508_v34  ;;  %v497_v18 = vpop.f32.mrb[31].mxu0  ;;  %v699_v19 = vmax.f32 %v631_v10, 0.0  ;;  %v634_v21 = vadd.f32 %v1317_v17, %v1508_v34  ;;  %v625_v23 = vpop.f32.mrb[31].mxu1 }
 0x115   :  { %v665_v20 = vmax.f32 %v495_v11, 0.0  ;;  %v498_v22 = vadd.f32 %v1508_v34, %v497_v18  ;;  %v697_v25 = vmax.f32 %v623_v15, 0.0  ;;  %v626_v27 = vadd.f32 %v1508_v34, %v625_v23 }
 0x116   :  { %v1185_v24 = vpack.c.bf16 %v667_v14, %v667_v14  ;;  %v668_v26 = vmax.f32 %v506_v16, 0.0  ;;  %v1217_v28 = vpack.c.bf16 %v699_v19, %v699_v19  ;;  %v700_v30 = vmax.f32 %v634_v21, 0.0 }
 0x117   :  { %v1183_v29 = vpack.c.bf16 %v665_v20, %v665_v20  ;;  %v666_v31 = vmax.f32 %v498_v22, 0.0  ;;  %v1215_v32 = vpack.c.bf16 %v697_v25, %v697_v25  ;;  %v698_v35 = vmax.f32 %v626_v27, 0.0 }
 0x118   :  { %988 = vst.msk [vmem:[%s1833_s3 + $0x78] sm:$0xf] %vm957_vm2, %v1185_v24  ;;  %v1186_v33 = vpack.c.bf16 %v668_v26, %v668_v26  ;;  %1020 = vst.msk [vmem:[%s1833_s3 + $0xf8] sm:$0xf] %vm957_vm2, %v1217_v28  ;;  %v1218_v34 = vpack.c.bf16 %v700_v30, %v700_v30 }
 0x119   :  { %986 = vst.msk [vmem:[%s1833_s3 + $0x70] sm:$0xf] %vm957_vm2, %v1183_v29  ;;  %v1184_v36 = vpack.c.bf16 %v666_v31, %v666_v31  ;;  %1018 = vst.msk [vmem:[%s1833_s3 + $0xf0] sm:$0xf] %vm957_vm2, %v1215_v32  ;;  %v1216_v37 = vpack.c.bf16 %v698_v35, %v698_v35 }
 0x11a   :  { %989 = vst.msk [vmem:[%s1833_s3 + $0x7c] sm:$0xf] %vm957_vm2, %v1186_v33  ;;  %1021 = vst.msk [vmem:[%s1833_s3 + $0xfc] sm:$0xf] %vm957_vm2, %v1218_v34 }
 0x11b   :  { %987 = vst.msk [vmem:[%s1833_s3 + $0x74] sm:$0xf] %vm957_vm2, %v1184_v36  ;;  %1019 = vst.msk [vmem:[%s1833_s3 + $0xf4] sm:$0xf] %vm957_vm2, %v1216_v37 }

// kernel: _lambda_.5
= control target key start
LH: loop header
LB: loop body
LE: loop exit
PB: predicated region body
PF: predicated region fallthrough
CT: control target
= control target key end

     0   :  { %vm411_vm0 = vcmask 1041408   ;;  %vm314_vm1 = vcmask 31744   ;;  %vm1458_vm2 = vcmask 130048   ;;  %s2676_s4 = inlined_call_operand.vmem [shape: bf16[4,16], index: 4, kind: input, shape index: {}]   ;;  %s2677_s1 = inlined_call_operand.vmem [shape: bf16[4,16], index: 1, kind: input, shape index: {}]   ;;  %s2678_s3 = inlined_call_operand.vmem [shape: bf16[512,4], index: 3, kind: input, shape index: {}]   ;;  %s2679_s0 = inlined_call_operand.vmem [shape: bf16[512,4], index: 0, kind: input, shape index: {}]   ;;  %s2680_s2 = inlined_call_operand.vmem [shape: f32[1,16], index: 2, kind: input, shape index: {}]   ;;  %s2681_s5 = inlined_call_operand.vmem [shape: f32[1,16], index: 5, kind: input, shape index: {}]   ;;  %s2682_s6 = inlined_call_operand.vmem [shape: f32[512,16], index: 6, kind: output, shape index: {}]  }
   0x1   :  { %v153_v0 = vld [vmem:[%s2676_s4] sm:$0x3]  ;;  %v1923_v6 = vld [vmem:[%s2678_s3 + $0x8] sm:$0xff]   ;;  %v1925_v8 = vld [vmem:[%s2678_s3 + $0x10] sm:$0xff]  }
   0x2   :  { %v88_v1 = vld [vmem:[%s2677_s1] sm:$0x3]  ;;  %1919 = vmatprep.subr.msk.bf16.mxu1 %vm411_vm0, %v153_v0  ;;  %v413_v2 = vsel %vm411_vm0, %v153_v0, 0  ;;  %v1924_v7 = vld [vmem:[%s2679_s0 + $0x8] sm:$0xff]   ;;  %v1926_v9 = vld [vmem:[%s2679_s0 + $0x10] sm:$0xff]  }
   0x3   :  { %1920 = vmatprep.subr.msk.bf16.mxu0 %vm411_vm0, %v88_v1  ;;  %v961_v3 = vsel %vm411_vm0, %v88_v1, 0  ;;  %v1921_v4 = vld [vmem:[%s2678_s3] sm:$0xff]   ;;  %1724 = vmatpush3.bf16.msra.mxu1 %v413_v2  ;;  %v1927_v10 = vld [vmem:[%s2678_s3 + $0x18] sm:$0xff]   ;;  %v1931_v14 = vld [vmem:[%s2678_s3 + $0x28] sm:$0xff]  }
   0x4   :  { %v1922_v5 = vld [vmem:[%s2679_s0] sm:$0xff]   ;;  %1790 = vmatpush3.bf16.msra.mxu0 %v961_v3  ;;  %1725 = vmatprep.mubr.msk.bf16.mxu1 %vm314_vm1, %v1921_v4  ;;  %v1928_v11 = vld [vmem:[%s2679_s0 + $0x18] sm:$0xff]   ;;  %v1932_v15 = vld [vmem:[%s2679_s0 + $0x28] sm:$0xff]  }
   0x5   :  { %1791 = vmatprep.mubr.msk.bf16.mxu0 %vm314_vm1, %v1922_v5  ;;  %v1929_v12 = vld [vmem:[%s2678_s3 + $0x20] sm:$0xff]   ;;  %v1933_v16 = vld [vmem:[%s2678_s3 + $0x30] sm:$0xff]   ;;  %v1935_v18 = vld [vmem:[%s2678_s3 + $0x38] sm:$0xff]  }
   0x6   :  { %1726 = vmatmul.mubr.msk.bf16.vlgmr.msra.gmra.mrb[0].mxu1 %vm314_vm1, %v1923_v6  ;;  %v1930_v13 = vld [vmem:[%s2679_s0 + $0x20] sm:$0xff]   ;;  %v1934_v17 = vld [vmem:[%s2679_s0 + $0x30] sm:$0xff]   ;;  %v1936_v19 = vld [vmem:[%s2679_s0 + $0x38] sm:$0xff]  }
   0x7   :  { %1792 = vmatmul.mubr.msk.bf16.vlgmr.msra.gmra.mrb[0].mxu0 %vm314_vm1, %v1924_v7  ;;  %1729 = vmatprep.mubr.msk.bf16.mxu1 %vm314_vm1, %v1925_v8  ;;  %v1937_v20 = vld [vmem:[%s2678_s3 + $0x40] sm:$0xff]   ;;  %v1939_v22 = vld [vmem:[%s2678_s3 + $0x48] sm:$0xff]   ;;  %v1941_v24 = vld [vmem:[%s2678_s3 + $0x50] sm:$0xff]  }
   0x8   :  { %1795 = vmatprep.mubr.msk.bf16.mxu0 %vm314_vm1, %v1926_v9  ;;  %v1938_v21 = vld [vmem:[%s2679_s0 + $0x40] sm:$0xff]   ;;  %v1940_v23 = vld [vmem:[%s2679_s0 + $0x48] sm:$0xff]   ;;  %v1942_v25 = vld [vmem:[%s2679_s0 + $0x50] sm:$0xff]  }
   0x9   :  { %v1943_v26 = vld [vmem:[%s2678_s3 + $0x58] sm:$0xff]   ;;  %v1945_v28 = vld [vmem:[%s2678_s3 + $0x60] sm:$0xff]   ;;  %v1947_v30 = vld [vmem:[%s2678_s3 + $0x68] sm:$0xff]  }
   0xa   :  { %v1944_v27 = vld [vmem:[%s2679_s0 + $0x58] sm:$0xff]   ;;  %v1946_v29 = vld [vmem:[%s2679_s0 + $0x60] sm:$0xff]   ;;  %v1948_v31 = vld [vmem:[%s2679_s0 + $0x68] sm:$0xff]  }
   0xb   :  { %v1949_v32 = vld [vmem:[%s2678_s3 + $0x70] sm:$0xff]   ;;  %v1951_v34 = vld [vmem:[%s2678_s3 + $0x78] sm:$0xff]   ;;  %v1953_v36 = vld [vmem:[%s2678_s3 + $0x80] sm:$0xff]  }
   0xc   :  { %v1950_v33 = vld [vmem:[%s2679_s0 + $0x70] sm:$0xff]   ;;  %v1952_v35 = vld [vmem:[%s2679_s0 + $0x78] sm:$0xff]   ;;  %v1954_v37 = vld [vmem:[%s2679_s0 + $0x80] sm:$0xff]  }
   0xd   :  { %v1955_v38 = vld [vmem:[%s2678_s3 + $0x88] sm:$0xff]   ;;  %v1957_v40 = vld [vmem:[%s2678_s3 + $0x90] sm:$0xff]   ;;  %v1959_v42 = vld [vmem:[%s2678_s3 + $0x98] sm:$0xff]  }
   0xe   :  { %1730 = vmatmul.mubr.msk.bf16.gmra.mrb[4].mxu1 %vm314_vm1, %v1927_v10  ;;  %v1956_v39 = vld [vmem:[%s2679_s0 + $0x88] sm:$0xff]   ;;  %v1958_v41 = vld [vmem:[%s2679_s0 + $0x90] sm:$0xff]   ;;  %v1960_v43 = vld [vmem:[%s2679_s0 + $0x98] sm:$0xff]  }
   0xf   :  { %1796 = vmatmul.mubr.msk.bf16.gmra.mrb[4].mxu0 %vm314_vm1, %v1928_v11  ;;  %1733 = vmatprep.mubr.msk.bf16.mxu1 %vm314_vm1, %v1929_v12  ;;  %v1961_v44 = vld [vmem:[%s2678_s3 + $0xa0] sm:$0xff]   ;;  %v1963_v46 = vld [vmem:[%s2678_s3 + $0xa8] sm:$0xff]   ;;  %v1965_v48 = vld [vmem:[%s2678_s3 + $0xb0] sm:$0xff]  }
  0x10   :  { %1799 = vmatprep.mubr.msk.bf16.mxu0 %vm314_vm1, %v1930_v13  ;;  %v1962_v45 = vld [vmem:[%s2679_s0 + $0xa0] sm:$0xff]   ;;  %v1964_v47 = vld [vmem:[%s2679_s0 + $0xa8] sm:$0xff]   ;;  %v1966_v49 = vld [vmem:[%s2679_s0 + $0xb0] sm:$0xff]  }
  0x11   :  { %v1967_v50 = vld [vmem:[%s2678_s3 + $0xb8] sm:$0xff]   ;;  %v1969_v52 = vld [vmem:[%s2678_s3 + $0xc0] sm:$0xff]   ;;  %v1971_v54 = vld [vmem:[%s2678_s3 + $0xc8] sm:$0xff]  }
  0x12   :  { %v1968_v51 = vld [vmem:[%s2679_s0 + $0xb8] sm:$0xff]   ;;  %v1970_v53 = vld [vmem:[%s2679_s0 + $0xc0] sm:$0xff]   ;;  %v1972_v55 = vld [vmem:[%s2679_s0 + $0xc8] sm:$0xff]  }
  0x13   :  { %v1973_v56 = vld [vmem:[%s2678_s3 + $0xd0] sm:$0xff]   ;;  %v1975_v58 = vld [vmem:[%s2678_s3 + $0xd8] sm:$0xff]   ;;  %v1977_v60 = vld [vmem:[%s2678_s3 + $0xe0] sm:$0xff]  }
  0x14   :  { %v1974_v57 = vld [vmem:[%s2679_s0 + $0xd0] sm:$0xff]   ;;  %v1976_v59 = vld [vmem:[%s2679_s0 + $0xd8] sm:$0xff]   ;;  %v1978_v61 = vld [vmem:[%s2679_s0 + $0xe0] sm:$0xff]  }
  0x15   :  { %v1979_v62 = vld [vmem:[%s2678_s3 + $0xe8] sm:$0xff]   ;;  %v1981_v0 = vld [vmem:[%s2678_s3 + $0xf0] sm:$0xff]   ;;  %v1983_v2 = vld [vmem:[%s2678_s3 + $0xf8] sm:$0xff]  }
  0x16   :  { %1734 = vmatmul.mubr.msk.bf16.gmra.mrb[8].mxu1 %vm314_vm1, %v1931_v14  ;;  %v1980_v63 = vld [vmem:[%s2679_s0 + $0xe8] sm:$0xff]   ;;  %v1982_v1 = vld [vmem:[%s2679_s0 + $0xf0] sm:$0xff]   ;;  %v1984_v3 = vld [vmem:[%s2679_s0 + $0xf8] sm:$0xff]  }
  0x17   :  { %1800 = vmatmul.mubr.msk.bf16.gmra.mrb[8].mxu0 %vm314_vm1, %v1932_v15  ;;  %1737 = vmatprep.mubr.msk.bf16.mxu1 %vm314_vm1, %v1933_v16  ;;  %v2285_v6 = vld [vmem:[%s2680_s2] ss:$0 sm:$0xff] }
  0x18   :  { %1803 = vmatprep.mubr.msk.bf16.mxu0 %vm314_vm1, %v1934_v17  ;;  %v2290_v11 = vld [vmem:[%s2681_s5] ss:$0 sm:$0xff] }
  0x1e   :  { %1738 = vmatmul.mubr.msk.bf16.gmra.mrb[12].mxu1 %vm314_vm1, %v1935_v18 }
  0x1f   :  { %1804 = vmatmul.mubr.msk.bf16.gmra.mrb[12].mxu0 %vm314_vm1, %v1936_v19  ;;  %1741 = vmatprep.mubr.msk.bf16.mxu1 %vm314_vm1, %v1937_v20 }
  0x20   :  { %1807 = vmatprep.mubr.msk.bf16.mxu0 %vm314_vm1, %v1938_v21 }
  0x26   :  { %1742 = vmatmul.mubr.msk.bf16.gmra.mrb[16].mxu1 %vm314_vm1, %v1939_v22 }
  0x27   :  { %1808 = vmatmul.mubr.msk.bf16.gmra.mrb[16].mxu0 %vm314_vm1, %v1940_v23  ;;  %1745 = vmatprep.mubr.msk.bf16.mxu1 %vm314_vm1, %v1941_v24 }
  0x28   :  { %1811 = vmatprep.mubr.msk.bf16.mxu0 %vm314_vm1, %v1942_v25 }
  0x2e   :  { %1746 = vmatmul.mubr.msk.bf16.gmra.mrb[20].mxu1 %vm314_vm1, %v1943_v26 }
  0x2f   :  { %1812 = vmatmul.mubr.msk.bf16.gmra.mrb[20].mxu0 %vm314_vm1, %v1944_v27  ;;  %1749 = vmatprep.mubr.msk.bf16.mxu1 %vm314_vm1, %v1945_v28 }
  0x30   :  { %1815 = vmatprep.mubr.msk.bf16.mxu0 %vm314_vm1, %v1946_v29 }
  0x36   :  { %1750 = vmatmul.mubr.msk.bf16.gmra.mrb[24].mxu1 %vm314_vm1, %v1947_v30 }
  0x37   :  { %1816 = vmatmul.mubr.msk.bf16.gmra.mrb[24].mxu0 %vm314_vm1, %v1948_v31  ;;  %1753 = vmatprep.mubr.msk.bf16.mxu1 %vm314_vm1, %v1949_v32 }
  0x38   :  { %1819 = vmatprep.mubr.msk.bf16.mxu0 %vm314_vm1, %v1950_v33 }
  0x3e   :  { %1754 = vmatmul.mubr.msk.bf16.gmra.mrb[28].mxu1 %vm314_vm1, %v1951_v34 }
  0x3f   :  { %1820 = vmatmul.mubr.msk.bf16.gmra.mrb[28].mxu0 %vm314_vm1, %v1952_v35  ;;  %1757 = vmatprep.mubr.msk.bf16.mxu1 %vm314_vm1, %v1953_v36 }
  0x40   :  { %1823 = vmatprep.mubr.msk.bf16.mxu0 %vm314_vm1, %v1954_v37 }
  0x46   :  { %1758 = vmatmul.mubr.msk.bf16.gmra.mrb[32].mxu1 %vm314_vm1, %v1955_v38 }
  0x47   :  { %1824 = vmatmul.mubr.msk.bf16.gmra.mrb[32].mxu0 %vm314_vm1, %v1956_v39  ;;  %1761 = vmatprep.mubr.msk.bf16.mxu1 %vm314_vm1, %v1957_v40 }
  0x48   :  { %1827 = vmatprep.mubr.msk.bf16.mxu0 %vm314_vm1, %v1958_v41 }
  0x4e   :  { %1762 = vmatmul.mubr.msk.bf16.gmra.mrb[36].mxu1 %vm314_vm1, %v1959_v42 }
  0x4f   :  { %1828 = vmatmul.mubr.msk.bf16.gmra.mrb[36].mxu0 %vm314_vm1, %v1960_v43  ;;  %1765 = vmatprep.mubr.msk.bf16.mxu1 %vm314_vm1, %v1961_v44 }
  0x50   :  { %1831 = vmatprep.mubr.msk.bf16.mxu0 %vm314_vm1, %v1962_v45 }
  0x56   :  { %1766 = vmatmul.mubr.msk.bf16.gmra.mrb[40].mxu1 %vm314_vm1, %v1963_v46 }
  0x57   :  { %1832 = vmatmul.mubr.msk.bf16.gmra.mrb[40].mxu0 %vm314_vm1, %v1964_v47  ;;  %1769 = vmatprep.mubr.msk.bf16.mxu1 %vm314_vm1, %v1965_v48 }
  0x58   :  { %1835 = vmatprep.mubr.msk.bf16.mxu0 %vm314_vm1, %v1966_v49 }
  0x5e   :  { %1770 = vmatmul.mubr.msk.bf16.gmra.mrb[44].mxu1 %vm314_vm1, %v1967_v50 }
  0x5f   :  { %1836 = vmatmul.mubr.msk.bf16.gmra.mrb[44].mxu0 %vm314_vm1, %v1968_v51  ;;  %1773 = vmatprep.mubr.msk.bf16.mxu1 %vm314_vm1, %v1969_v52 }
  0x60   :  { %1839 = vmatprep.mubr.msk.bf16.mxu0 %vm314_vm1, %v1970_v53 }
  0x66   :  { %1774 = vmatmul.mubr.msk.bf16.gmra.mrb[48].mxu1 %vm314_vm1, %v1971_v54 }
  0x67   :  { %1840 = vmatmul.mubr.msk.bf16.gmra.mrb[48].mxu0 %vm314_vm1, %v1972_v55  ;;  %1777 = vmatprep.mubr.msk.bf16.mxu1 %vm314_vm1, %v1973_v56 }
  0x68   :  { %1843 = vmatprep.mubr.msk.bf16.mxu0 %vm314_vm1, %v1974_v57 }
  0x6e   :  { %1778 = vmatmul.mubr.msk.bf16.gmra.mrb[52].mxu1 %vm314_vm1, %v1975_v58 }
  0x6f   :  { %1844 = vmatmul.mubr.msk.bf16.gmra.mrb[52].mxu0 %vm314_vm1, %v1976_v59  ;;  %1781 = vmatprep.mubr.msk.bf16.mxu1 %vm314_vm1, %v1977_v60 }
  0x70   :  { %1847 = vmatprep.mubr.msk.bf16.mxu0 %vm314_vm1, %v1978_v61 }
  0x76   :  { %1782 = vmatmul.mubr.msk.bf16.gmra.mrb[56].mxu1 %vm314_vm1, %v1979_v62 }
  0x77   :  { %1848 = vmatmul.mubr.msk.bf16.gmra.mrb[56].mxu0 %vm314_vm1, %v1980_v63  ;;  %1785 = vmatprep.mubr.msk.bf16.mxu1 %vm314_vm1, %v1981_v0 }
  0x78   :  { %1851 = vmatprep.mubr.msk.bf16.mxu0 %vm314_vm1, %v1982_v1 }
  0x7e   :  { %1786 = vmatmul.mubr.msk.bf16.gmra.mrb[60].mxu1 %vm314_vm1, %v1983_v2 }
  0x7f   :  { %1852 = vmatmul.mubr.msk.bf16.gmra.mrb[60].mxu0 %vm314_vm1, %v1984_v3 }
  0xd9   :  { %v1727_v4 = vpop.f32.mrb[0].mxu1 }
  0xda   :  { %v1793_v5 = vpop.f32.mrb[0].mxu0  ;;  %v449_v7 = vpop.f32.mrb[1].mxu1 }
  0xdb   :  { %v1006_v8 = vadd.f32 %v1793_v5, %v1727_v4  ;;  %v997_v9 = vpop.f32.mrb[1].mxu0  ;;  %v1728_v10 = vpop.f32.mrb[2].mxu1 }
  0xdc   :  { %v998_v12 = vadd.f32 %v997_v9, %v449_v7  ;;  %v1794_v13 = vpop.f32.mrb[2].mxu0  ;;  %v452_v14 = vpop.f32.mrb[3].mxu1 }
  0xdd   :  { %v1261_v15 = vadd.f32 %v2285_v6, %v1006_v8  ;;  %v1009_v16 = vadd.f32 %v1794_v13, %v1728_v10  ;;  %v1000_v17 = vpop.f32.mrb[3].mxu0 }
  0xde   :  { %v1259_v18 = vadd.f32 %v2285_v6, %v998_v12  ;;  %v1001_v19 = vadd.f32 %v1000_v17, %v452_v14 }
  0xdf   :  { %v1332_v20 = vadd.f32 %v2290_v11, %v1261_v15  ;;  %v1262_v21 = vadd.f32 %v2285_v6, %v1009_v16 }
  0xe0   :  { %v1330_v22 = vadd.f32 %v2290_v11, %v1259_v18  ;;  %v1260_v23 = vadd.f32 %v2285_v6, %v1001_v19 }
  0xe1   :  { %v1396_v24 = vmax.f32 %v1332_v20, 0.0  ;;  %v1333_v25 = vadd.f32 %v2290_v11, %v1262_v21  ;;  %v1731_v26 = vpop.f32.mrb[4].mxu1 }
  0xe2   :  { %v1394_v27 = vmax.f32 %v1330_v22, 0.0  ;;  %v1331_v28 = vadd.f32 %v2290_v11, %v1260_v23  ;;  %v1797_v29 = vpop.f32.mrb[4].mxu0  ;;  %v465_v30 = vpop.f32.mrb[5].mxu1 }
  0xe3   :  { %1461 = vst.msk [vmem:[%s2682_s6 + $0x10] sm:$0xff] %vm1458_vm2, %v1396_v24  ;;  %v1397_v31 = vmax.f32 %v1333_v25, 0.0  ;;  %v1022_v32 = vadd.f32 %v1797_v29, %v1731_v26  ;;  %v1013_v33 = vpop.f32.mrb[5].mxu0  ;;  %v1732_v34 = vpop.f32.mrb[6].mxu1 }
  0xe4   :  { %1459 = vst.msk [vmem:[%s2682_s6] sm:$0xff] %vm1458_vm2, %v1394_v27  ;;  %v1395_v35 = vmax.f32 %v1331_v28, 0.0  ;;  %v1014_v36 = vadd.f32 %v1013_v33, %v465_v30  ;;  %v1798_v37 = vpop.f32.mrb[6].mxu0  ;;  %v468_v38 = vpop.f32.mrb[7].mxu1 }
  0xe5   :  { %1462 = vst.msk [vmem:[%s2682_s6 + $0x18] sm:$0xff] %vm1458_vm2, %v1397_v31  ;;  %v1265_v39 = vadd.f32 %v2285_v6, %v1022_v32  ;;  %v1025_v40 = vadd.f32 %v1798_v37, %v1732_v34  ;;  %v1016_v41 = vpop.f32.mrb[7].mxu0 }
  0xe6   :  { %1460 = vst.msk [vmem:[%s2682_s6 + $0x8] sm:$0xff] %vm1458_vm2, %v1395_v35  ;;  %v1263_v42 = vadd.f32 %v2285_v6, %v1014_v36  ;;  %v1017_v43 = vadd.f32 %v1016_v41, %v468_v38 }
  0xe7   :  { %v1336_v44 = vadd.f32 %v2290_v11, %v1265_v39  ;;  %v1266_v45 = vadd.f32 %v2285_v6, %v1025_v40 }
  0xe8   :  { %v1334_v46 = vadd.f32 %v2290_v11, %v1263_v42  ;;  %v1264_v47 = vadd.f32 %v2285_v6, %v1017_v43 }
  0xe9   :  { %v1400_v48 = vmax.f32 %v1336_v44, 0.0  ;;  %v1337_v49 = vadd.f32 %v2290_v11, %v1266_v45  ;;  %v1735_v50 = vpop.f32.mrb[8].mxu1 }
  0xea   :  { %v1398_v51 = vmax.f32 %v1334_v46, 0.0  ;;  %v1335_v52 = vadd.f32 %v2290_v11, %v1264_v47  ;;  %v1801_v53 = vpop.f32.mrb[8].mxu0  ;;  %v481_v54 = vpop.f32.mrb[9].mxu1 }
  0xeb   :  { %1465 = vst.msk [vmem:[%s2682_s6 + $0x30] sm:$0xff] %vm1458_vm2, %v1400_v48  ;;  %v1401_v55 = vmax.f32 %v1337_v49, 0.0  ;;  %v1038_v56 = vadd.f32 %v1801_v53, %v1735_v50  ;;  %v1029_v57 = vpop.f32.mrb[9].mxu0  ;;  %v1736_v58 = vpop.f32.mrb[10].mxu1 }
  0xec   :  { %1463 = vst.msk [vmem:[%s2682_s6 + $0x20] sm:$0xff] %vm1458_vm2, %v1398_v51  ;;  %v1399_v59 = vmax.f32 %v1335_v52, 0.0  ;;  %v1030_v60 = vadd.f32 %v1029_v57, %v481_v54  ;;  %v1802_v61 = vpop.f32.mrb[10].mxu0  ;;  %v484_v62 = vpop.f32.mrb[11].mxu1 }
  0xed   :  { %1466 = vst.msk [vmem:[%s2682_s6 + $0x38] sm:$0xff] %vm1458_vm2, %v1401_v55  ;;  %v1269_v63 = vadd.f32 %v2285_v6, %v1038_v56  ;;  %v1041_v0 = vadd.f32 %v1802_v61, %v1736_v58  ;;  %v1032_v1 = vpop.f32.mrb[11].mxu0 }
  0xee   :  { %1464 = vst.msk [vmem:[%s2682_s6 + $0x28] sm:$0xff] %vm1458_vm2, %v1399_v59  ;;  %v1267_v2 = vadd.f32 %v2285_v6, %v1030_v60  ;;  %v1033_v3 = vadd.f32 %v1032_v1, %v484_v62 }
  0xef   :  { %v1340_v4 = vadd.f32 %v2290_v11, %v1269_v63  ;;  %v1270_v5 = vadd.f32 %v2285_v6, %v1041_v0 }
  0xf0   :  { %v1338_v7 = vadd.f32 %v2290_v11, %v1267_v2  ;;  %v1268_v8 = vadd.f32 %v2285_v6, %v1033_v3 }
  0xf1   :  { %v1404_v9 = vmax.f32 %v1340_v4, 0.0  ;;  %v1341_v10 = vadd.f32 %v2290_v11, %v1270_v5  ;;  %v1739_v12 = vpop.f32.mrb[12].mxu1 }
  0xf2   :  { %v1402_v13 = vmax.f32 %v1338_v7, 0.0  ;;  %v1339_v14 = vadd.f32 %v2290_v11, %v1268_v8  ;;  %v1805_v15 = vpop.f32.mrb[12].mxu0  ;;  %v497_v16 = vpop.f32.mrb[13].mxu1 }
  0xf3   :  { %1469 = vst.msk [vmem:[%s2682_s6 + $0x50] sm:$0xff] %vm1458_vm2, %v1404_v9  ;;  %v1405_v17 = vmax.f32 %v1341_v10, 0.0  ;;  %v1054_v18 = vadd.f32 %v1805_v15, %v1739_v12  ;;  %v1045_v19 = vpop.f32.mrb[13].mxu0  ;;  %v1740_v20 = vpop.f32.mrb[14].mxu1 }
  0xf4   :  { %1467 = vst.msk [vmem:[%s2682_s6 + $0x40] sm:$0xff] %vm1458_vm2, %v1402_v13  ;;  %v1403_v21 = vmax.f32 %v1339_v14, 0.0  ;;  %v1046_v22 = vadd.f32 %v1045_v19, %v497_v16  ;;  %v1806_v23 = vpop.f32.mrb[14].mxu0  ;;  %v500_v24 = vpop.f32.mrb[15].mxu1 }
  0xf5   :  { %1470 = vst.msk [vmem:[%s2682_s6 + $0x58] sm:$0xff] %vm1458_vm2, %v1405_v17  ;;  %v1273_v25 = vadd.f32 %v2285_v6, %v1054_v18  ;;  %v1057_v26 = vadd.f32 %v1806_v23, %v1740_v20  ;;  %v1048_v27 = vpop.f32.mrb[15].mxu0 }
  0xf6   :  { %1468 = vst.msk [vmem:[%s2682_s6 + $0x48] sm:$0xff] %vm1458_vm2, %v1403_v21  ;;  %v1271_v28 = vadd.f32 %v2285_v6, %v1046_v22  ;;  %v1049_v29 = vadd.f32 %v1048_v27, %v500_v24 }
  0xf7   :  { %v1344_v30 = vadd.f32 %v2290_v11, %v1273_v25  ;;  %v1274_v31 = vadd.f32 %v2285_v6, %v1057_v26 }
  0xf8   :  { %v1342_v32 = vadd.f32 %v2290_v11, %v1271_v28  ;;  %v1272_v33 = vadd.f32 %v2285_v6, %v1049_v29 }
  0xf9   :  { %v1408_v34 = vmax.f32 %v1344_v30, 0.0  ;;  %v1345_v35 = vadd.f32 %v2290_v11, %v1274_v31  ;;  %v1743_v36 = vpop.f32.mrb[16].mxu1 }
  0xfa   :  { %v1406_v37 = vmax.f32 %v1342_v32, 0.0  ;;  %v1343_v38 = vadd.f32 %v2290_v11, %v1272_v33  ;;  %v1809_v39 = vpop.f32.mrb[16].mxu0  ;;  %v513_v40 = vpop.f32.mrb[17].mxu1 }
  0xfb   :  { %1473 = vst.msk [vmem:[%s2682_s6 + $0x70] sm:$0xff] %vm1458_vm2, %v1408_v34  ;;  %v1409_v41 = vmax.f32 %v1345_v35, 0.0  ;;  %v1070_v42 = vadd.f32 %v1809_v39, %v1743_v36  ;;  %v1061_v43 = vpop.f32.mrb[17].mxu0  ;;  %v1744_v44 = vpop.f32.mrb[18].mxu1 }
  0xfc   :  { %1471 = vst.msk [vmem:[%s2682_s6 + $0x60] sm:$0xff] %vm1458_vm2, %v1406_v37  ;;  %v1407_v45 = vmax.f32 %v1343_v38, 0.0  ;;  %v1062_v46 = vadd.f32 %v1061_v43, %v513_v40  ;;  %v1810_v47 = vpop.f32.mrb[18].mxu0  ;;  %v516_v48 = vpop.f32.mrb[19].mxu1 }
  0xfd   :  { %1474 = vst.msk [vmem:[%s2682_s6 + $0x78] sm:$0xff] %vm1458_vm2, %v1409_v41  ;;  %v1277_v49 = vadd.f32 %v2285_v6, %v1070_v42  ;;  %v1073_v50 = vadd.f32 %v1810_v47, %v1744_v44  ;;  %v1064_v51 = vpop.f32.mrb[19].mxu0 }
  0xfe   :  { %1472 = vst.msk [vmem:[%s2682_s6 + $0x68] sm:$0xff] %vm1458_vm2, %v1407_v45  ;;  %v1275_v52 = vadd.f32 %v2285_v6, %v1062_v46  ;;  %v1065_v53 = vadd.f32 %v1064_v51, %v516_v48 }
  0xff   :  { %v1348_v54 = vadd.f32 %v2290_v11, %v1277_v49  ;;  %v1278_v55 = vadd.f32 %v2285_v6, %v1073_v50 }
 0x100   :  { %v1346_v56 = vadd.f32 %v2290_v11, %v1275_v52  ;;  %v1276_v57 = vadd.f32 %v2285_v6, %v1065_v53 }
 0x101   :  { %v1412_v58 = vmax.f32 %v1348_v54, 0.0  ;;  %v1349_v59 = vadd.f32 %v2290_v11, %v1278_v55  ;;  %v1747_v60 = vpop.f32.mrb[20].mxu1 }
 0x102   :  { %v1410_v61 = vmax.f32 %v1346_v56, 0.0  ;;  %v1347_v62 = vadd.f32 %v2290_v11, %v1276_v57  ;;  %v1813_v63 = vpop.f32.mrb[20].mxu0  ;;  %v529_v0 = vpop.f32.mrb[21].mxu1 }
 0x103   :  { %1477 = vst.msk [vmem:[%s2682_s6 + $0x90] sm:$0xff] %vm1458_vm2, %v1412_v58  ;;  %v1413_v1 = vmax.f32 %v1349_v59, 0.0  ;;  %v1086_v2 = vadd.f32 %v1813_v63, %v1747_v60  ;;  %v1077_v3 = vpop.f32.mrb[21].mxu0  ;;  %v1748_v4 = vpop.f32.mrb[22].mxu1 }
 0x104   :  { %1475 = vst.msk [vmem:[%s2682_s6 + $0x80] sm:$0xff] %vm1458_vm2, %v1410_v61  ;;  %v1411_v5 = vmax.f32 %v1347_v62, 0.0  ;;  %v1078_v7 = vadd.f32 %v1077_v3, %v529_v0  ;;  %v1814_v8 = vpop.f32.mrb[22].mxu0  ;;  %v532_v9 = vpop.f32.mrb[23].mxu1 }
 0x105   :  { %1478 = vst.msk [vmem:[%s2682_s6 + $0x98] sm:$0xff] %vm1458_vm2, %v1413_v1  ;;  %v1281_v10 = vadd.f32 %v2285_v6, %v1086_v2  ;;  %v1089_v12 = vadd.f32 %v1814_v8, %v1748_v4  ;;  %v1080_v13 = vpop.f32.mrb[23].mxu0 }
 0x106   :  { %1476 = vst.msk [vmem:[%s2682_s6 + $0x88] sm:$0xff] %vm1458_vm2, %v1411_v5  ;;  %v1279_v14 = vadd.f32 %v2285_v6, %v1078_v7  ;;  %v1081_v15 = vadd.f32 %v1080_v13, %v532_v9 }
 0x107   :  { %v1352_v16 = vadd.f32 %v2290_v11, %v1281_v10  ;;  %v1282_v17 = vadd.f32 %v2285_v6, %v1089_v12 }
 0x108   :  { %v1350_v18 = vadd.f32 %v2290_v11, %v1279_v14  ;;  %v1280_v19 = vadd.f32 %v2285_v6, %v1081_v15 }
 0x109   :  { %v1416_v20 = vmax.f32 %v1352_v16, 0.0  ;;  %v1353_v21 = vadd.f32 %v2290_v11, %v1282_v17  ;;  %v1751_v22 = vpop.f32.mrb[24].mxu1 }
 0x10a   :  { %v1414_v23 = vmax.f32 %v1350_v18, 0.0  ;;  %v1351_v24 = vadd.f32 %v2290_v11, %v1280_v19  ;;  %v1817_v25 = vpop.f32.mrb[24].mxu0  ;;  %v545_v26 = vpop.f32.mrb[25].mxu1 }
 0x10b   :  { %1481 = vst.msk [vmem:[%s2682_s6 + $0xb0] sm:$0xff] %vm1458_vm2, %v1416_v20  ;;  %v1417_v27 = vmax.f32 %v1353_v21, 0.0  ;;  %v1102_v28 = vadd.f32 %v1817_v25, %v1751_v22  ;;  %v1093_v29 = vpop.f32.mrb[25].mxu0  ;;  %v1752_v30 = vpop.f32.mrb[26].mxu1 }
 0x10c   :  { %1479 = vst.msk [vmem:[%s2682_s6 + $0xa0] sm:$0xff] %vm1458_vm2, %v1414_v23  ;;  %v1415_v31 = vmax.f32 %v1351_v24, 0.0  ;;  %v1094_v32 = vadd.f32 %v1093_v29, %v545_v26  ;;  %v1818_v33 = vpop.f32.mrb[26].mxu0  ;;  %v548_v34 = vpop.f32.mrb[27].mxu1 }
 0x10d   :  { %1482 = vst.msk [vmem:[%s2682_s6 + $0xb8] sm:$0xff] %vm1458_vm2, %v1417_v27  ;;  %v1285_v35 = vadd.f32 %v2285_v6, %v1102_v28  ;;  %v1105_v36 = vadd.f32 %v1818_v33, %v1752_v30  ;;  %v1096_v37 = vpop.f32.mrb[27].mxu0 }
 0x10e   :  { %1480 = vst.msk [vmem:[%s2682_s6 + $0xa8] sm:$0xff] %vm1458_vm2, %v1415_v31  ;;  %v1283_v38 = vadd.f32 %v2285_v6, %v1094_v32  ;;  %v1097_v39 = vadd.f32 %v1096_v37, %v548_v34 }
 0x10f   :  { %v1356_v40 = vadd.f32 %v2290_v11, %v1285_v35  ;;  %v1286_v41 = vadd.f32 %v2285_v6, %v1105_v36 }
 0x110   :  { %v1354_v42 = vadd.f32 %v2290_v11, %v1283_v38  ;;  %v1284_v43 = vadd.f32 %v2285_v6, %v1097_v39 }
 0x111   :  { %v1420_v44 = vmax.f32 %v1356_v40, 0.0  ;;  %v1357_v45 = vadd.f32 %v2290_v11, %v1286_v41  ;;  %v1755_v46 = vpop.f32.mrb[28].mxu1 }
 0x112   :  { %v1418_v47 = vmax.f32 %v1354_v42, 0.0  ;;  %v1355_v48 = vadd.f32 %v2290_v11, %v1284_v43  ;;  %v1821_v49 = vpop.f32.mrb[28].mxu0  ;;  %v561_v50 = vpop.f32.mrb[29].mxu1 }
 0x113   :  { %1485 = vst.msk [vmem:[%s2682_s6 + $0xd0] sm:$0xff] %vm1458_vm2, %v1420_v44  ;;  %v1421_v51 = vmax.f32 %v1357_v45, 0.0  ;;  %v1118_v52 = vadd.f32 %v1821_v49, %v1755_v46  ;;  %v1109_v53 = vpop.f32.mrb[29].mxu0  ;;  %v1756_v54 = vpop.f32.mrb[30].mxu1 }
 0x114   :  { %1483 = vst.msk [vmem:[%s2682_s6 + $0xc0] sm:$0xff] %vm1458_vm2, %v1418_v47  ;;  %v1419_v55 = vmax.f32 %v1355_v48, 0.0  ;;  %v1110_v56 = vadd.f32 %v1109_v53, %v561_v50  ;;  %v1822_v57 = vpop.f32.mrb[30].mxu0  ;;  %v564_v58 = vpop.f32.mrb[31].mxu1 }
 0x115   :  { %1486 = vst.msk [vmem:[%s2682_s6 + $0xd8] sm:$0xff] %vm1458_vm2, %v1421_v51  ;;  %v1289_v59 = vadd.f32 %v2285_v6, %v1118_v52  ;;  %v1121_v60 = vadd.f32 %v1822_v57, %v1756_v54  ;;  %v1112_v61 = vpop.f32.mrb[31].mxu0 }
 0x116   :  { %1484 = vst.msk [vmem:[%s2682_s6 + $0xc8] sm:$0xff] %vm1458_vm2, %v1419_v55  ;;  %v1287_v62 = vadd.f32 %v2285_v6, %v1110_v56  ;;  %v1113_v63 = vadd.f32 %v1112_v61, %v564_v58 }
 0x117   :  { %v1360_v0 = vadd.f32 %v2290_v11, %v1289_v59  ;;  %v1290_v1 = vadd.f32 %v2285_v6, %v1121_v60 }
 0x118   :  { %v1358_v2 = vadd.f32 %v2290_v11, %v1287_v62  ;;  %v1288_v3 = vadd.f32 %v2285_v6, %v1113_v63 }
 0x119   :  { %v1424_v4 = vmax.f32 %v1360_v0, 0.0  ;;  %v1361_v5 = vadd.f32 %v2290_v11, %v1290_v1  ;;  %v1759_v7 = vpop.f32.mrb[32].mxu1 }
 0x11a   :  { %v1422_v8 = vmax.f32 %v1358_v2, 0.0  ;;  %v1359_v9 = vadd.f32 %v2290_v11, %v1288_v3  ;;  %v1825_v10 = vpop.f32.mrb[32].mxu0  ;;  %v577_v12 = vpop.f32.mrb[33].mxu1 }
 0x11b   :  { %1489 = vst.msk [vmem:[%s2682_s6 + $0xf0] sm:$0xff] %vm1458_vm2, %v1424_v4  ;;  %v1425_v13 = vmax.f32 %v1361_v5, 0.0  ;;  %v1134_v14 = vadd.f32 %v1825_v10, %v1759_v7  ;;  %v1125_v15 = vpop.f32.mrb[33].mxu0  ;;  %v1760_v16 = vpop.f32.mrb[34].mxu1 }
 0x11c   :  { %1487 = vst.msk [vmem:[%s2682_s6 + $0xe0] sm:$0xff] %vm1458_vm2, %v1422_v8  ;;  %v1423_v17 = vmax.f32 %v1359_v9, 0.0  ;;  %v1126_v18 = vadd.f32 %v1125_v15, %v577_v12  ;;  %v1826_v19 = vpop.f32.mrb[34].mxu0  ;;  %v580_v20 = vpop.f32.mrb[35].mxu1 }
 0x11d   :  { %1490 = vst.msk [vmem:[%s2682_s6 + $0xf8] sm:$0xff] %vm1458_vm2, %v1425_v13  ;;  %v1293_v21 = vadd.f32 %v2285_v6, %v1134_v14  ;;  %v1137_v22 = vadd.f32 %v1826_v19, %v1760_v16  ;;  %v1128_v23 = vpop.f32.mrb[35].mxu0 }
 0x11e   :  { %1488 = vst.msk [vmem:[%s2682_s6 + $0xe8] sm:$0xff] %vm1458_vm2, %v1423_v17  ;;  %v1291_v24 = vadd.f32 %v2285_v6, %v1126_v18  ;;  %v1129_v25 = vadd.f32 %v1128_v23, %v580_v20 }
 0x11f   :  { %v1364_v26 = vadd.f32 %v2290_v11, %v1293_v21  ;;  %v1294_v27 = vadd.f32 %v2285_v6, %v1137_v22 }
 0x120   :  { %v1362_v28 = vadd.f32 %v2290_v11, %v1291_v24  ;;  %v1292_v29 = vadd.f32 %v2285_v6, %v1129_v25 }
 0x121   :  { %v1428_v30 = vmax.f32 %v1364_v26, 0.0  ;;  %v1365_v31 = vadd.f32 %v2290_v11, %v1294_v27  ;;  %v1763_v32 = vpop.f32.mrb[36].mxu1 }
 0x122   :  { %v1426_v33 = vmax.f32 %v1362_v28, 0.0  ;;  %v1363_v34 = vadd.f32 %v2290_v11, %v1292_v29  ;;  %v1829_v35 = vpop.f32.mrb[36].mxu0  ;;  %v593_v36 = vpop.f32.mrb[37].mxu1 }
 0x123   :  { %1493 = vst.msk [vmem:[%s2682_s6 + $0x110] sm:$0xff] %vm1458_vm2, %v1428_v30  ;;  %v1429_v37 = vmax.f32 %v1365_v31, 0.0  ;;  %v1150_v38 = vadd.f32 %v1829_v35, %v1763_v32  ;;  %v1141_v39 = vpop.f32.mrb[37].mxu0  ;;  %v1764_v40 = vpop.f32.mrb[38].mxu1 }
 0x124   :  { %1491 = vst.msk [vmem:[%s2682_s6 + $0x100] sm:$0xff] %vm1458_vm2, %v1426_v33  ;;  %v1427_v41 = vmax.f32 %v1363_v34, 0.0  ;;  %v1142_v42 = vadd.f32 %v1141_v39, %v593_v36  ;;  %v1830_v43 = vpop.f32.mrb[38].mxu0  ;;  %v596_v44 = vpop.f32.mrb[39].mxu1 }
 0x125   :  { %1494 = vst.msk [vmem:[%s2682_s6 + $0x118] sm:$0xff] %vm1458_vm2, %v1429_v37  ;;  %v1297_v45 = vadd.f32 %v2285_v6, %v1150_v38  ;;  %v1153_v46 = vadd.f32 %v1830_v43, %v1764_v40  ;;  %v1144_v47 = vpop.f32.mrb[39].mxu0 }
 0x126   :  { %1492 = vst.msk [vmem:[%s2682_s6 + $0x108] sm:$0xff] %vm1458_vm2, %v1427_v41  ;;  %v1295_v48 = vadd.f32 %v2285_v6, %v1142_v42  ;;  %v1145_v49 = vadd.f32 %v1144_v47, %v596_v44 }
 0x127   :  { %v1368_v50 = vadd.f32 %v2290_v11, %v1297_v45  ;;  %v1298_v51 = vadd.f32 %v2285_v6, %v1153_v46 }
 0x128   :  { %v1366_v52 = vadd.f32 %v2290_v11, %v1295_v48  ;;  %v1296_v53 = vadd.f32 %v2285_v6, %v1145_v49 }
 0x129   :  { %v1432_v54 = vmax.f32 %v1368_v50, 0.0  ;;  %v1369_v55 = vadd.f32 %v2290_v11, %v1298_v51  ;;  %v1767_v56 = vpop.f32.mrb[40].mxu1 }
 0x12a   :  { %v1430_v57 = vmax.f32 %v1366_v52, 0.0  ;;  %v1367_v58 = vadd.f32 %v2290_v11, %v1296_v53  ;;  %v1833_v59 = vpop.f32.mrb[40].mxu0  ;;  %v609_v60 = vpop.f32.mrb[41].mxu1 }
 0x12b   :  { %1497 = vst.msk [vmem:[%s2682_s6 + $0x130] sm:$0xff] %vm1458_vm2, %v1432_v54  ;;  %v1433_v61 = vmax.f32 %v1369_v55, 0.0  ;;  %v1166_v62 = vadd.f32 %v1833_v59, %v1767_v56  ;;  %v1157_v63 = vpop.f32.mrb[41].mxu0  ;;  %v1768_v0 = vpop.f32.mrb[42].mxu1 }
 0x12c   :  { %1495 = vst.msk [vmem:[%s2682_s6 + $0x120] sm:$0xff] %vm1458_vm2, %v1430_v57  ;;  %v1431_v1 = vmax.f32 %v1367_v58, 0.0  ;;  %v1158_v2 = vadd.f32 %v1157_v63, %v609_v60  ;;  %v1834_v3 = vpop.f32.mrb[42].mxu0  ;;  %v612_v4 = vpop.f32.mrb[43].mxu1 }
 0x12d   :  { %1498 = vst.msk [vmem:[%s2682_s6 + $0x138] sm:$0xff] %vm1458_vm2, %v1433_v61  ;;  %v1301_v5 = vadd.f32 %v2285_v6, %v1166_v62  ;;  %v1169_v7 = vadd.f32 %v1834_v3, %v1768_v0  ;;  %v1160_v8 = vpop.f32.mrb[43].mxu0 }
 0x12e   :  { %1496 = vst.msk [vmem:[%s2682_s6 + $0x128] sm:$0xff] %vm1458_vm2, %v1431_v1  ;;  %v1299_v9 = vadd.f32 %v2285_v6, %v1158_v2  ;;  %v1161_v10 = vadd.f32 %v1160_v8, %v612_v4 }
 0x12f   :  { %v1372_v12 = vadd.f32 %v2290_v11, %v1301_v5  ;;  %v1302_v13 = vadd.f32 %v2285_v6, %v1169_v7 }
 0x130   :  { %v1370_v14 = vadd.f32 %v2290_v11, %v1299_v9  ;;  %v1300_v15 = vadd.f32 %v2285_v6, %v1161_v10 }
 0x131   :  { %v1436_v16 = vmax.f32 %v1372_v12, 0.0  ;;  %v1373_v17 = vadd.f32 %v2290_v11, %v1302_v13  ;;  %v1771_v18 = vpop.f32.mrb[44].mxu1 }
 0x132   :  { %v1434_v19 = vmax.f32 %v1370_v14, 0.0  ;;  %v1371_v20 = vadd.f32 %v2290_v11, %v1300_v15  ;;  %v1837_v21 = vpop.f32.mrb[44].mxu0  ;;  %v625_v22 = vpop.f32.mrb[45].mxu1 }
 0x133   :  { %1501 = vst.msk [vmem:[%s2682_s6 + $0x150] sm:$0xff] %vm1458_vm2, %v1436_v16  ;;  %v1437_v23 = vmax.f32 %v1373_v17, 0.0  ;;  %v1182_v24 = vadd.f32 %v1837_v21, %v1771_v18  ;;  %v1173_v25 = vpop.f32.mrb[45].mxu0  ;;  %v1772_v26 = vpop.f32.mrb[46].mxu1 }
 0x134   :  { %1499 = vst.msk [vmem:[%s2682_s6 + $0x140] sm:$0xff] %vm1458_vm2, %v1434_v19  ;;  %v1435_v27 = vmax.f32 %v1371_v20, 0.0  ;;  %v1174_v28 = vadd.f32 %v1173_v25, %v625_v22  ;;  %v1838_v29 = vpop.f32.mrb[46].mxu0  ;;  %v628_v30 = vpop.f32.mrb[47].mxu1 }
 0x135   :  { %1502 = vst.msk [vmem:[%s2682_s6 + $0x158] sm:$0xff] %vm1458_vm2, %v1437_v23  ;;  %v1305_v31 = vadd.f32 %v2285_v6, %v1182_v24  ;;  %v1185_v32 = vadd.f32 %v1838_v29, %v1772_v26  ;;  %v1176_v33 = vpop.f32.mrb[47].mxu0 }
 0x136   :  { %1500 = vst.msk [vmem:[%s2682_s6 + $0x148] sm:$0xff] %vm1458_vm2, %v1435_v27  ;;  %v1303_v34 = vadd.f32 %v2285_v6, %v1174_v28  ;;  %v1177_v35 = vadd.f32 %v1176_v33, %v628_v30 }
 0x137   :  { %v1376_v36 = vadd.f32 %v2290_v11, %v1305_v31  ;;  %v1306_v37 = vadd.f32 %v2285_v6, %v1185_v32 }
 0x138   :  { %v1374_v38 = vadd.f32 %v2290_v11, %v1303_v34  ;;  %v1304_v39 = vadd.f32 %v2285_v6, %v1177_v35 }
 0x139   :  { %v1440_v40 = vmax.f32 %v1376_v36, 0.0  ;;  %v1377_v41 = vadd.f32 %v2290_v11, %v1306_v37  ;;  %v1775_v42 = vpop.f32.mrb[48].mxu1 }
 0x13a   :  { %v1438_v43 = vmax.f32 %v1374_v38, 0.0  ;;  %v1375_v44 = vadd.f32 %v2290_v11, %v1304_v39  ;;  %v1841_v45 = vpop.f32.mrb[48].mxu0  ;;  %v641_v46 = vpop.f32.mrb[49].mxu1 }
 0x13b   :  { %1505 = vst.msk [vmem:[%s2682_s6 + $0x170] sm:$0xff] %vm1458_vm2, %v1440_v40  ;;  %v1441_v47 = vmax.f32 %v1377_v41, 0.0  ;;  %v1198_v48 = vadd.f32 %v1841_v45, %v1775_v42  ;;  %v1189_v49 = vpop.f32.mrb[49].mxu0  ;;  %v1776_v50 = vpop.f32.mrb[50].mxu1 }
 0x13c   :  { %1503 = vst.msk [vmem:[%s2682_s6 + $0x160] sm:$0xff] %vm1458_vm2, %v1438_v43  ;;  %v1439_v51 = vmax.f32 %v1375_v44, 0.0  ;;  %v1190_v52 = vadd.f32 %v1189_v49, %v641_v46  ;;  %v1842_v53 = vpop.f32.mrb[50].mxu0  ;;  %v644_v54 = vpop.f32.mrb[51].mxu1 }
 0x13d   :  { %1506 = vst.msk [vmem:[%s2682_s6 + $0x178] sm:$0xff] %vm1458_vm2, %v1441_v47  ;;  %v1309_v55 = vadd.f32 %v2285_v6, %v1198_v48  ;;  %v1201_v56 = vadd.f32 %v1842_v53, %v1776_v50  ;;  %v1192_v57 = vpop.f32.mrb[51].mxu0 }
 0x13e   :  { %1504 = vst.msk [vmem:[%s2682_s6 + $0x168] sm:$0xff] %vm1458_vm2, %v1439_v51  ;;  %v1307_v58 = vadd.f32 %v2285_v6, %v1190_v52  ;;  %v1193_v59 = vadd.f32 %v1192_v57, %v644_v54 }
 0x13f   :  { %v1380_v60 = vadd.f32 %v2290_v11, %v1309_v55  ;;  %v1310_v61 = vadd.f32 %v2285_v6, %v1201_v56 }
 0x140   :  { %v1378_v62 = vadd.f32 %v2290_v11, %v1307_v58  ;;  %v1308_v63 = vadd.f32 %v2285_v6, %v1193_v59 }
 0x141   :  { %v1444_v0 = vmax.f32 %v1380_v60, 0.0  ;;  %v1381_v1 = vadd.f32 %v2290_v11, %v1310_v61  ;;  %v1779_v2 = vpop.f32.mrb[52].mxu1 }
 0x142   :  { %v1442_v3 = vmax.f32 %v1378_v62, 0.0  ;;  %v1379_v4 = vadd.f32 %v2290_v11, %v1308_v63  ;;  %v1845_v5 = vpop.f32.mrb[52].mxu0  ;;  %v657_v7 = vpop.f32.mrb[53].mxu1 }
 0x143   :  { %1509 = vst.msk [vmem:[%s2682_s6 + $0x190] sm:$0xff] %vm1458_vm2, %v1444_v0  ;;  %v1445_v8 = vmax.f32 %v1381_v1, 0.0  ;;  %v1214_v9 = vadd.f32 %v1845_v5, %v1779_v2  ;;  %v1205_v10 = vpop.f32.mrb[53].mxu0  ;;  %v1780_v12 = vpop.f32.mrb[54].mxu1 }
 0x144   :  { %1507 = vst.msk [vmem:[%s2682_s6 + $0x180] sm:$0xff] %vm1458_vm2, %v1442_v3  ;;  %v1443_v13 = vmax.f32 %v1379_v4, 0.0  ;;  %v1206_v14 = vadd.f32 %v1205_v10, %v657_v7  ;;  %v1846_v15 = vpop.f32.mrb[54].mxu0  ;;  %v660_v16 = vpop.f32.mrb[55].mxu1 }
 0x145   :  { %1510 = vst.msk [vmem:[%s2682_s6 + $0x198] sm:$0xff] %vm1458_vm2, %v1445_v8  ;;  %v1313_v17 = vadd.f32 %v2285_v6, %v1214_v9  ;;  %v1217_v18 = vadd.f32 %v1846_v15, %v1780_v12  ;;  %v1208_v19 = vpop.f32.mrb[55].mxu0 }
 0x146   :  { %1508 = vst.msk [vmem:[%s2682_s6 + $0x188] sm:$0xff] %vm1458_vm2, %v1443_v13  ;;  %v1311_v20 = vadd.f32 %v2285_v6, %v1206_v14  ;;  %v1209_v21 = vadd.f32 %v1208_v19, %v660_v16 }
 0x147   :  { %v1384_v22 = vadd.f32 %v2290_v11, %v1313_v17  ;;  %v1314_v23 = vadd.f32 %v2285_v6, %v1217_v18 }
 0x148   :  { %v1382_v24 = vadd.f32 %v2290_v11, %v1311_v20  ;;  %v1312_v25 = vadd.f32 %v2285_v6, %v1209_v21 }
 0x149   :  { %v1448_v26 = vmax.f32 %v1384_v22, 0.0  ;;  %v1385_v27 = vadd.f32 %v2290_v11, %v1314_v23  ;;  %v1783_v28 = vpop.f32.mrb[56].mxu1 }
 0x14a   :  { %v1446_v29 = vmax.f32 %v1382_v24, 0.0  ;;  %v1383_v30 = vadd.f32 %v2290_v11, %v1312_v25  ;;  %v1849_v31 = vpop.f32.mrb[56].mxu0  ;;  %v673_v32 = vpop.f32.mrb[57].mxu1 }
 0x14b   :  { %1513 = vst.msk [vmem:[%s2682_s6 + $0x1b0] sm:$0xff] %vm1458_vm2, %v1448_v26  ;;  %v1449_v33 = vmax.f32 %v1385_v27, 0.0  ;;  %v1230_v34 = vadd.f32 %v1849_v31, %v1783_v28  ;;  %v1221_v35 = vpop.f32.mrb[57].mxu0  ;;  %v1784_v36 = vpop.f32.mrb[58].mxu1 }
 0x14c   :  { %1511 = vst.msk [vmem:[%s2682_s6 + $0x1a0] sm:$0xff] %vm1458_vm2, %v1446_v29  ;;  %v1447_v37 = vmax.f32 %v1383_v30, 0.0  ;;  %v1222_v38 = vadd.f32 %v1221_v35, %v673_v32  ;;  %v1850_v39 = vpop.f32.mrb[58].mxu0  ;;  %v676_v40 = vpop.f32.mrb[59].mxu1 }
 0x14d   :  { %1514 = vst.msk [vmem:[%s2682_s6 + $0x1b8] sm:$0xff] %vm1458_vm2, %v1449_v33  ;;  %v1317_v41 = vadd.f32 %v2285_v6, %v1230_v34  ;;  %v1233_v42 = vadd.f32 %v1850_v39, %v1784_v36  ;;  %v1224_v43 = vpop.f32.mrb[59].mxu0 }
 0x14e   :  { %1512 = vst.msk [vmem:[%s2682_s6 + $0x1a8] sm:$0xff] %vm1458_vm2, %v1447_v37  ;;  %v1315_v44 = vadd.f32 %v2285_v6, %v1222_v38  ;;  %v1225_v45 = vadd.f32 %v1224_v43, %v676_v40 }
 0x14f   :  { %v1388_v46 = vadd.f32 %v2290_v11, %v1317_v41  ;;  %v1318_v47 = vadd.f32 %v2285_v6, %v1233_v42 }
 0x150   :  { %v1386_v48 = vadd.f32 %v2290_v11, %v1315_v44  ;;  %v1316_v49 = vadd.f32 %v2285_v6, %v1225_v45 }
 0x151   :  { %v1452_v50 = vmax.f32 %v1388_v46, 0.0  ;;  %v1389_v51 = vadd.f32 %v2290_v11, %v1318_v47  ;;  %v1787_v52 = vpop.f32.mrb[60].mxu1 }
 0x152   :  { %v1450_v53 = vmax.f32 %v1386_v48, 0.0  ;;  %v1387_v54 = vadd.f32 %v2290_v11, %v1316_v49  ;;  %v1853_v55 = vpop.f32.mrb[60].mxu0  ;;  %v689_v56 = vpop.f32.mrb[61].mxu1 }
 0x153   :  { %1517 = vst.msk [vmem:[%s2682_s6 + $0x1d0] sm:$0xff] %vm1458_vm2, %v1452_v50  ;;  %v1453_v57 = vmax.f32 %v1389_v51, 0.0  ;;  %v1246_v58 = vadd.f32 %v1853_v55, %v1787_v52  ;;  %v1237_v59 = vpop.f32.mrb[61].mxu0  ;;  %v1788_v60 = vpop.f32.mrb[62].mxu1 }
 0x154   :  { %1515 = vst.msk [vmem:[%s2682_s6 + $0x1c0] sm:$0xff] %vm1458_vm2, %v1450_v53  ;;  %v1451_v61 = vmax.f32 %v1387_v54, 0.0  ;;  %v1238_v62 = vadd.f32 %v1237_v59, %v689_v56  ;;  %v1854_v63 = vpop.f32.mrb[62].mxu0  ;;  %v692_v0 = vpop.f32.mrb[63].mxu1 }
 0x155   :  { %1518 = vst.msk [vmem:[%s2682_s6 + $0x1d8] sm:$0xff] %vm1458_vm2, %v1453_v57  ;;  %v1321_v1 = vadd.f32 %v2285_v6, %v1246_v58  ;;  %v1249_v2 = vadd.f32 %v1854_v63, %v1788_v60  ;;  %v1240_v3 = vpop.f32.mrb[63].mxu0 }
 0x156   :  { %1516 = vst.msk [vmem:[%s2682_s6 + $0x1c8] sm:$0xff] %vm1458_vm2, %v1451_v61  ;;  %v1319_v4 = vadd.f32 %v2285_v6, %v1238_v62  ;;  %v1241_v5 = vadd.f32 %v1240_v3, %v692_v0 }
 0x157   :  { %v1392_v7 = vadd.f32 %v2290_v11, %v1321_v1  ;;  %v1322_v8 = vadd.f32 %v2285_v6, %v1249_v2 }
 0x158   :  { %v1390_v9 = vadd.f32 %v2290_v11, %v1319_v4  ;;  %v1320_v10 = vadd.f32 %v2285_v6, %v1241_v5 }
 0x159   :  { %v1456_v12 = vmax.f32 %v1392_v7, 0.0  ;;  %v1393_v13 = vadd.f32 %v2290_v11, %v1322_v8 }
 0x15a   :  { %v1454_v14 = vmax.f32 %v1390_v9, 0.0  ;;  %v1391_v15 = vadd.f32 %v2290_v11, %v1320_v10 }
 0x15b   :  { %1521 = vst.msk [vmem:[%s2682_s6 + $0x1f0] sm:$0xff] %vm1458_vm2, %v1456_v12  ;;  %v1457_v16 = vmax.f32 %v1393_v13, 0.0 }
 0x15c   :  { %1519 = vst.msk [vmem:[%s2682_s6 + $0x1e0] sm:$0xff] %vm1458_vm2, %v1454_v14  ;;  %v1455_v17 = vmax.f32 %v1391_v15, 0.0 }
 0x15d   :  { %1522 = vst.msk [vmem:[%s2682_s6 + $0x1f8] sm:$0xff] %vm1458_vm2, %v1457_v16 }
 0x15e   :  { %1520 = vst.msk [vmem:[%s2682_s6 + $0x1e8] sm:$0xff] %vm1458_vm2, %v1455_v17 }

// kernel: _lambda_.4
= control target key start
LH: loop header
LB: loop body
LE: loop exit
PB: predicated region body
PF: predicated region fallthrough
CT: control target
= control target key end

     0   :  { %s3996_s12 = smov 0   ;;  %s3998_s13 = smov 0   ;;  %s5049_s0 = inlined_call_operand.vmem [shape: bf16[2,16,16,4], index: 0, kind: input, shape index: {}]   ;;  %s5050_s1 = inlined_call_operand.vmem [shape: bf16[3,12,4], index: 1, kind: input, shape index: {}]   ;;  %s5051_s2 = inlined_call_operand.vmem [shape: f32[1,4], index: 2, kind: input, shape index: {}]   ;;  %s5052_s3 = inlined_call_operand.vmem [shape: bf16[2,256,4], index: 3, kind: output, shape index: {}]  }
   0x1   :  { %s4000_s14 = smov 0  }
   0x2 LB: > { %s25_s15 = sadd.s32 1, %s3963_s13  ;;  %p3127_p0 = scmp.ge.s32.totalorder %s3967_s14, 1  ;;  %s3967_s14 = sphi %s4000_s14, %s13_s14   ;;  %s3963_s13 = sphi %s3998_s13, %s5078_s13   ;;  %s3959_s12 = sphi %s3996_s12, %s5077_s12  }
   0x3   : > { %p27_p1 = scmp.ge.s32.totalorder %s25_s15, 2  ;;  %p151_p2 = scmp.lt.s32.totalorder %s3967_s14, 3 }
   0x5   : > { %s5080_s15 = smov (%p27_p1, %s25_s15), 0  ;;  %p152_p3 = pnand %p3127_p0, %p151_p2 }
   0x7   : > { %155 = sbr.rel (%p152_p3) target bundleno = 599 (0x257), region = 32 }
   0xe   : > { %p179_p4 = scmp.lt.s32.totalorder %s3959_s12, 1  ;;  %vm199_vm0 = vcmask 27648   ;;  %vm202_vm1 = vcmask 24576   ;;  %v3973_v0 = vmov 0   ;;  %s4084_s23 = smov 0  }
   0xf   : > { %200 = vst.msk [vmem:[#allocation2] sm:$0xf] %vm199_vm0, %v3973_v0  ;;  %201 = vst.msk [vmem:[#allocation2 + $0x4] sm:$0xf] %vm199_vm0, %v3973_v0 }
  0x10   : > { %204 = vst.msk [vmem:[#allocation2 + $0xc] sm:$0xf] %vm199_vm0, %v3973_v0  ;;  %205 = vst.msk [vmem:[#allocation2 + $0x10] sm:$0xf] %vm199_vm0, %v3973_v0  ;;  %s5082_s12 = smov (!%p179_p4, %s3959_s12), 1 }
  0x11   : > { %207 = vst.msk [vmem:[#allocation2 + $0x18] sm:$0xf] %vm199_vm0, %v3973_v0  ;;  %208 = vst.msk [vmem:[#allocation2 + $0x1c] sm:$0xf] %vm199_vm0, %v3973_v0  ;;  %s3501_s16 = sshll.u32 %s5082_s12, 7 }
  0x12   : > { %210 = vst.msk [vmem:[#allocation2 + $0x24] sm:$0xf] %vm199_vm0, %v3973_v0  ;;  %211 = vst.msk [vmem:[#allocation2 + $0x28] sm:$0xf] %vm199_vm0, %v3973_v0  ;;  %s4077_s19 = scalar_lea.vmem %s5049_s0, %s3501_s16  ;;  %s4082_s22 = scalar_lea.vmem %s5052_s3, %s3501_s16 }
  0x13   : > { %213 = vst.msk [vmem:[#allocation2 + $0x30] sm:$0xf] %vm199_vm0, %v3973_v0  ;;  %214 = vst.msk [vmem:[#allocation2 + $0x34] sm:$0xf] %vm199_vm0, %v3973_v0 }
  0x14   : > { %216 = vst.msk [vmem:[#allocation2 + $0x3c] sm:$0xf] %vm199_vm0, %v3973_v0  ;;  %217 = vst.msk [vmem:[#allocation2 + $0x40] sm:$0xf] %vm199_vm0, %v3973_v0 }
  0x15   : > { %219 = vst.msk [vmem:[#allocation2 + $0x48] sm:$0xf] %vm199_vm0, %v3973_v0  ;;  %220 = vst.msk [vmem:[#allocation2 + $0x4c] sm:$0xf] %vm199_vm0, %v3973_v0 }
  0x16   : > { %222 = vst.msk [vmem:[#allocation2 + $0x54] sm:$0xf] %vm199_vm0, %v3973_v0  ;;  %223 = vst.msk [vmem:[#allocation2 + $0x58] sm:$0xf] %vm199_vm0, %v3973_v0 }
  0x17   : > { %225 = vst.msk [vmem:[#allocation2 + $0x60] sm:$0xf] %vm199_vm0, %v3973_v0  ;;  %226 = vst.msk [vmem:[#allocation2 + $0x64] sm:$0xf] %vm199_vm0, %v3973_v0 }
  0x18   : > { %228 = vst.msk [vmem:[#allocation2 + $0x6c] sm:$0xf] %vm199_vm0, %v3973_v0  ;;  %229 = vst.msk [vmem:[#allocation2 + $0x70] sm:$0xf] %vm199_vm0, %v3973_v0 }
  0x19   : > { %231 = vst.msk [vmem:[#allocation2 + $0x78] sm:$0xf] %vm199_vm0, %v3973_v0  ;;  %232 = vst.msk [vmem:[#allocation2 + $0x7c] sm:$0xf] %vm199_vm0, %v3973_v0 }
  0x1a   : > { %234 = vst.msk [vmem:[#allocation2 + $0x84] sm:$0xf] %vm199_vm0, %v3973_v0  ;;  %235 = vst.msk [vmem:[#allocation2 + $0x88] sm:$0xf] %vm199_vm0, %v3973_v0 }
  0x1b   : > { %237 = vst.msk [vmem:[#allocation2 + $0x90] sm:$0xf] %vm199_vm0, %v3973_v0  ;;  %238 = vst.msk [vmem:[#allocation2 + $0x94] sm:$0xf] %vm199_vm0, %v3973_v0 }
  0x1c   : > { %240 = vst.msk [vmem:[#allocation2 + $0x9c] sm:$0xf] %vm199_vm0, %v3973_v0  ;;  %241 = vst.msk [vmem:[#allocation2 + $0xa0] sm:$0xf] %vm199_vm0, %v3973_v0 }
  0x1d   : > { %243 = vst.msk [vmem:[#allocation2 + $0xa8] sm:$0xf] %vm199_vm0, %v3973_v0  ;;  %244 = vst.msk [vmem:[#allocation2 + $0xac] sm:$0xf] %vm199_vm0, %v3973_v0 }
  0x1e   : > { %246 = vst.msk [vmem:[#allocation2 + $0xb4] sm:$0xf] %vm199_vm0, %v3973_v0  ;;  %247 = vst.msk [vmem:[#allocation2 + $0xb8] sm:$0xf] %vm199_vm0, %v3973_v0 }
  0x1f   : > { %249 = vst.msk [vmem:[#allocation2 + $0xc0] sm:$0xf] %vm199_vm0, %v3973_v0  ;;  %250 = vst.msk [vmem:[#allocation2 + $0xc4] sm:$0xf] %vm199_vm0, %v3973_v0 }
  0x20   : > { %252 = vst.msk [vmem:[#allocation2 + $0xcc] sm:$0xf] %vm199_vm0, %v3973_v0  ;;  %253 = vst.msk [vmem:[#allocation2 + $0xd0] sm:$0xf] %vm199_vm0, %v3973_v0 }
  0x21   : > { %203 = vst.msk [vmem:[#allocation2 + $0x8] sm:$0x1] %vm202_vm1, %v3973_v0  ;;  %206 = vst.msk [vmem:[#allocation2 + $0x14] sm:$0x1] %vm202_vm1, %v3973_v0 }
  0x22   : > { %209 = vst.msk [vmem:[#allocation2 + $0x20] sm:$0x1] %vm202_vm1, %v3973_v0  ;;  %212 = vst.msk [vmem:[#allocation2 + $0x2c] sm:$0x1] %vm202_vm1, %v3973_v0 }
  0x23   : > { %215 = vst.msk [vmem:[#allocation2 + $0x38] sm:$0x1] %vm202_vm1, %v3973_v0  ;;  %218 = vst.msk [vmem:[#allocation2 + $0x44] sm:$0x1] %vm202_vm1, %v3973_v0 }
  0x24   : > { %221 = vst.msk [vmem:[#allocation2 + $0x50] sm:$0x1] %vm202_vm1, %v3973_v0  ;;  %224 = vst.msk [vmem:[#allocation2 + $0x5c] sm:$0x1] %vm202_vm1, %v3973_v0 }
  0x25   : > { %227 = vst.msk [vmem:[#allocation2 + $0x68] sm:$0x1] %vm202_vm1, %v3973_v0  ;;  %230 = vst.msk [vmem:[#allocation2 + $0x74] sm:$0x1] %vm202_vm1, %v3973_v0 }
  0x26   : > { %233 = vst.msk [vmem:[#allocation2 + $0x80] sm:$0x1] %vm202_vm1, %v3973_v0  ;;  %236 = vst.msk [vmem:[#allocation2 + $0x8c] sm:$0x1] %vm202_vm1, %v3973_v0 }
  0x27   : > { %239 = vst.msk [vmem:[#allocation2 + $0x98] sm:$0x1] %vm202_vm1, %v3973_v0  ;;  %242 = vst.msk [vmem:[#allocation2 + $0xa4] sm:$0x1] %vm202_vm1, %v3973_v0 }
  0x28   : > { %245 = vst.msk [vmem:[#allocation2 + $0xb0] sm:$0x1] %vm202_vm1, %v3973_v0  ;;  %248 = vst.msk [vmem:[#allocation2 + $0xbc] sm:$0x1] %vm202_vm1, %v3973_v0 }
  0x29   : > { %251 = vst.msk [vmem:[#allocation2 + $0xc8] sm:$0x1] %vm202_vm1, %v3973_v0  ;;  %254 = vst.msk [vmem:[#allocation2 + $0xd4] sm:$0x1] %vm202_vm1, %v3973_v0 }
  0x2a LB: >> { %s3503_s24 = sshll.u32 %s3971_s23, 3  ;;  %s3068_s25 = smul.u32 12, %s3971_s23  ;;  %vm294_vm2 = vsmask.f32 7938  ;;  %vm267_vm3 = vsmask.f32 256  ;;  %s3971_s23 = sphi %s4084_s23, %s260_s23  }
  0x2b   : >> { %s263_s26 = scalar_lea.vmem %s4077_s19, %s3503_s24  ;;  %vm268_vm4 = vsmask.f32 4368  ;;  %vm295_vm5 = vmand %vm199_vm0, %vm294_vm2  ;;  %s260_s23 = sadd.s32 1, %s3971_s23  }
  0x2c   : >> { %v264_v1 = vld [vmem:[%s263_s26] sm:$0xf]  ;;  %v265_v2 = vld [vmem:[%s263_s26 + $0x4] sm:$0xf]  ;;  %vm269_vm6 = vmor %vm267_vm3, %vm268_vm4  ;;  %s3069_s27 = scalar_lea.vmem [#allocation2], %s3068_s25  ;;  %p257_p5 = scmp.ge.s32.totalorder %s260_s23, 16  }
  0x2d   : >> { %v271_v3 = vshrl.u32 %v264_v1, 16  ;;  %v274_v4 = vshll.u32 %v264_v1, 16  ;;  %v279_v5 = vshrl.u32 %v265_v2, 16  ;;  %v282_v6 = vshll.u32 %v265_v2, 16  ;;  %vm301_vm7 = vmand %vm202_vm1, %vm267_vm3  ;;  %s3974_s28 = smov (%p257_p5), 8   ;;  %s3975_s29 = smov (%p257_p5), 4  }
  0x2e   : > { %vm774_vm8 = vcmask (%p257_p5), 1046528   ;;  %vm501_vm9 = vsmask.f32 (%p257_p5), 7424  ;;  %vm1576_vm10 = vcmask (%p257_p5), 1045504   ;;  %vm855_vm11 = vcmask (%p257_p5), 31744  }
  0x2f   : >> { %v273_v7 = vrot.slane %v271_v3, 7  ;;  %v281_v8 = vrot.slane %v279_v5, 7  ;;  %259 = sbr.rel (!%p257_p5) target bundleno = 42 (0x2a), region = 80  ;;  %vm888_vm12 = vcmask (%p257_p5), 64512   ;;  %vm1543_vm13 = vcmask (%p257_p5), 97280  }
  0x30   : >> { %v3134_v9 = vld [vmem:[%s3069_s27 + $0xc] sm:$0xf]  ;;  %v3137_v10 = vld [vmem:[%s3069_s27 + $0x14] sm:$0x1] }
  0x31   : >> { %v276_v11 = vor.u32 %v274_v4, %v273_v7  ;;  %v277_v12 = vrot.slane %v273_v7, 4  ;;  %v284_v13 = vor.u32 %v282_v6, %v281_v8  ;;  %v286_v14 = vrot.slane %v281_v8, 4 }
  0x33   : >> { %v297_v15 = vsel %vm295_vm5, %v276_v11, %v3134_v9  ;;  %v285_v16 = vsel %vm269_vm6, %v277_v12, %v284_v13  ;;  %v303_v17 = vsel %vm301_vm7, %v286_v14, %v3137_v10 }
  0x34   : >> { %3135 = vst [vmem:[%s3069_s27 + $0xc] sm:$0xf] %v297_v15  ;;  %3136 = vst.msk [vmem:[%s3069_s27 + $0x10] sm:$0xf] %vm199_vm0, %v285_v16 }
  0x35   : >> { %3138 = vst [vmem:[%s3069_s27 + $0x14] sm:$0x1] %v303_v17 }
  0x3c   : > { %v310_v18 = vld [vmem:[#allocation2 + $0x4] sm:$0xf]  ;;  %v357_v19 = vld [vmem:[#allocation2] sm:$0xe]  ;;  %v3187_v23 = vld [vmem:[#allocation2 + $0xc] sm:$0xf] }
  0x3d   : > { %v3794_v20 = vld [vmem:[#allocation2 + $0x8] ss:$0 sps:$4 sm:$0x11]   ;;  %v3171_v21 = vcombine.low %v357_v19, %v310_v18  ;;  %v309_v22 = vld [vmem:[#allocation2] sm:$0xf] }
  0x3e   : > { %v3188_v24 = vld [vmem:[#allocation2 + $0x10] sm:$0xf]  ;;  %v776_v26 = vrot.slane %v3794_v20, 1  ;;  %v4098_v27 = vcombine.low %v309_v22, %v310_v18  ;;  %v3235_v28 = vld [vmem:[#allocation2 + $0xc] sm:$0xe]  ;;  %v510_v32 = vshll.u32 %v3794_v20, 16 }
  0x3f   : > { %v775_v25 = vrot.slane %v3171_v21, 1  ;;  %v4100_v29 = vcombine.low %v3187_v23, %v3188_v24  ;;  %v3798_v30 = vld [vmem:[#allocation2 + $0x14] ss:$0 sps:$4 sm:$0x11]   ;;  %v3283_v31 = vcombine.low %v3235_v28, %v3188_v24  ;;  %v311_v36 = vld [vmem:[#allocation2 + $0xc] sm:$0xf] }
  0x40   : > { %v503_v34 = vshrl.u32 %v4098_v27, 16  ;;  %v505_v35 = vshll.u32 %v4098_v27, 16  ;;  %v4105_v37 = vld [vmem:[#allocation2 + $0x10] sm:$0xf]  ;;  %v1392_v39 = vrot.slane %v3798_v30, 1  ;;  %v512_v40 = vrot.slane %v510_v32, 1 }
  0x41   : > { %v777_v33 = vsel %vm774_vm8, %v775_v25, %v776_v26  ;;  %v1391_v38 = vrot.slane %v3283_v31, 1  ;;  %v4109_v41 = vcombine.low %v311_v36, %v4105_v37  ;;  %v4111_v43 = vld [vmem:[#allocation2 + $0x14] ss:$0 sps:$4 sm:$0x11]   ;;  %v1120_v44 = vshrl.u32 %v4100_v29, 16 }
  0x42   : > { %823 = vrot.lane.b32.xlu1 %v777_v33, %s3974_s28  ;;  %v507_v42 = vrot.slane %v505_v35, 1  ;;  %v1122_v45 = vshll.u32 %v4100_v29, 16  ;;  %v1127_v49 = vshll.u32 %v3798_v30, 16  ;;  %v3189_v50 = vld [vmem:[#allocation2 + $0x18] sm:$0xf]  ;;  %v522_v52 = vshll.u32 %v4111_v43, 16 }
  0x43   : > { %v1393_v46 = vsel %vm774_vm8, %v1391_v38, %v1392_v39  ;;  %v515_v47 = vshrl.u32 %v4109_v41, 16  ;;  %v517_v48 = vshll.u32 %v4109_v41, 16  ;;  %v3190_v54 = vld [vmem:[#allocation2 + $0x1c] sm:$0xf]  ;;  %v3236_v57 = vld [vmem:[#allocation2 + $0x18] sm:$0xe] }
  0x44   : > { %v508_v51 = vor.u32 %v507_v42, %v503_v34  ;;  %v1124_v53 = vrot.slane %v1122_v45, 1  ;;  %v1129_v56 = vrot.slane %v1127_v49, 1  ;;  %v4120_v58 = vcombine.low %v3189_v50, %v3190_v54  ;;  %v3191_v59 = vld [vmem:[#allocation2 + $0x24] sm:$0xf]  ;;  %v3192_v1 = vld [vmem:[#allocation2 + $0x28] sm:$0xf] }
  0x45   : > { %v519_v55 = vrot.slane %v517_v48, 1  ;;  %v524_v61 = vrot.slane %v522_v52, 1  ;;  %v3803_v63 = vld [vmem:[#allocation2 + $0x20] ss:$0 sps:$4 sm:$0x11]   ;;  %v3284_v0 = vcombine.low %v3236_v57, %v3190_v54  ;;  %v4126_v5 = vcombine.low %v3191_v59, %v3192_v1 }
  0x46   : > { %1439 = vrot.lane.b32.xlu1 %v1393_v46, %s3974_s28  ;;  %v513_v60 = vsel %vm501_vm9, %v508_v51, %v512_v40  ;;  %v1125_v62 = vor.u32 %v1124_v53, %v1120_v44  ;;  %v1132_v3 = vshrl.u32 %v4120_v58, 16  ;;  %v1134_v4 = vshll.u32 %v4120_v58, 16  ;;  %v358_v6 = vld [vmem:[#allocation2 + $0xc] sm:$0xe]  ;;  %v313_v16 = vld [vmem:[#allocation2 + $0x18] sm:$0xf] }
  0x47   : > { %694 = vrot.lane.b32.xlu0 %v513_v60, %s3975_s29  ;;  %v520_v2 = vor.u32 %v519_v55, %v515_v47  ;;  %v1394_v8 = vrot.slane %v3284_v0, 1  ;;  %v1395_v9 = vrot.slane %v3803_v63, 1  ;;  %v1139_v10 = vshll.u32 %v3803_v63, 16  ;;  %v4129_v11 = vld [vmem:[#allocation2 + $0x2c] ss:$0 sps:$4 sm:$0x11]  }
  0x48   : > { %v1130_v7 = vsel %vm501_vm9, %v1125_v62, %v1129_v56  ;;  %v1136_v13 = vrot.slane %v1134_v4, 1  ;;  %v1144_v14 = vshrl.u32 %v4126_v5, 16  ;;  %v1146_v15 = vshll.u32 %v4126_v5, 16  ;;  %v314_v21 = vld [vmem:[#allocation2 + $0x1c] sm:$0xf] }
  0x49   : > { %v525_v12 = vsel %vm501_vm9, %v520_v2, %v524_v61  ;;  %v1396_v17 = vsel %vm774_vm8, %v1394_v8, %v1395_v9  ;;  %v1141_v18 = vrot.slane %v1139_v10, 1  ;;  %v1151_v19 = vshll.u32 %v4129_v11, 16  ;;  %v359_v25 = vld [vmem:[#allocation2 + $0x18] sm:$0xe]  ;;  %v3237_v28 = vld [vmem:[#allocation2 + $0x24] sm:$0xe] }
  0x4a   : > { %696 = vrot.lane.b32.xlu1 %v525_v12, %s3975_s29  ;;  %v3172_v20 = vcombine.low %v358_v6, %v4105_v37  ;;  %v1137_v22 = vor.u32 %v1136_v13, %v1132_v3  ;;  %v1148_v23 = vrot.slane %v1146_v15, 1  ;;  %v779_v24 = vrot.slane %v4111_v43, 1  ;;  %v3809_v32 = vld [vmem:[#allocation2 + $0x20] ss:$0 sps:$4 sm:$0x11]  }
  0x4b   : > { %1311 = vrot.lane.b32.xlu0 %v1130_v7, %s3975_s29  ;;  %v4140_v26 = vcombine.low %v313_v16, %v314_v21  ;;  %v1153_v30 = vrot.slane %v1151_v19, 1  ;;  %v3173_v33 = vcombine.low %v359_v25, %v314_v21  ;;  %v3285_v34 = vcombine.low %v3237_v28, %v3192_v1  ;;  %v315_v39 = vld [vmem:[#allocation2 + $0x24] sm:$0xf]  ;;  %v4145_v40 = vld [vmem:[#allocation2 + $0x28] sm:$0xf] }
  0x4c   : > { %v778_v31 = vrot.slane %v3172_v20, 1  ;;  %v1142_v35 = vsel %vm501_vm9, %v1137_v22, %v1141_v18  ;;  %v1149_v36 = vor.u32 %v1148_v23, %v1144_v14  ;;  %v534_v42 = vshll.u32 %v3809_v32, 16  ;;  %v4150_v47 = vld [vmem:[#allocation2 + $0x2c] ss:$0 sps:$4 sm:$0x11]  }
  0x4d   : > { %v527_v37 = vshrl.u32 %v4140_v26, 16  ;;  %v529_v38 = vshll.u32 %v4140_v26, 16  ;;  %v781_v44 = vrot.slane %v3173_v33, 1  ;;  %v782_v45 = vrot.slane %v3809_v32, 1  ;;  %v3193_v51 = vld [vmem:[#allocation2 + $0x30] sm:$0xf] }
  0x4e   : > { %1441 = vrot.lane.b32.xlu1 %v1396_v17, %s3974_s28  ;;  %v1154_v43 = vsel %vm501_vm9, %v1149_v36, %v1153_v30  ;;  %v780_v48 = vsel %vm774_vm8, %v778_v31, %v779_v24  ;;  %v536_v49 = vrot.slane %v534_v42, 1  ;;  %v4154_v50 = vcombine.low %v315_v39, %v4145_v40  ;;  %v3194_v52 = vld [vmem:[#allocation2 + $0x34] sm:$0xf]  ;;  %v3238_v56 = vld [vmem:[#allocation2 + $0x30] sm:$0xe] }
  0x4f   : > { %1313 = vrot.lane.b32.xlu0 %v1142_v35, %s3975_s29  ;;  %v531_v46 = vrot.slane %v529_v38, 1  ;;  %v1397_v54 = vrot.slane %v3285_v34, 1  ;;  %v546_v55 = vshll.u32 %v4150_v47, 16  ;;  %v4157_v57 = vcombine.low %v3193_v51, %v3194_v52  ;;  %v3815_v62 = vld [vmem:[#allocation2 + $0x38] ss:$0 sps:$4 sm:$0x11]  }
  0x50   : > { %v1398_v59 = vrot.slane %v4129_v11, 1  ;;  %v539_v60 = vshrl.u32 %v4154_v50, 16  ;;  %v541_v61 = vshll.u32 %v4154_v50, 16  ;;  %v3286_v63 = vcombine.low %v3238_v56, %v3194_v52  ;;  %v3195_v4 = vld [vmem:[#allocation2 + $0x3c] sm:$0xf] }
  0x51   : > { %v532_v53 = vor.u32 %v531_v46, %v527_v37  ;;  %v783_v0 = vsel %vm774_vm8, %v781_v44, %v782_v45  ;;  %v1156_v2 = vshrl.u32 %v4157_v57, 16  ;;  %v1158_v3 = vshll.u32 %v4157_v57, 16  ;;  %v3196_v10 = vld [vmem:[#allocation2 + $0x40] sm:$0xf]  ;;  %v360_v18 = vld [vmem:[#allocation2 + $0x24] sm:$0xe] }
  0x52   : > { %1315 = vrot.lane.b32.xlu1 %v1154_v43, %s3975_s29  ;;  %v543_v6 = vrot.slane %v541_v61, 1  ;;  %v548_v7 = vrot.slane %v546_v55, 1  ;;  %v1400_v8 = vrot.slane %v3286_v63, 1  ;;  %v1163_v9 = vshll.u32 %v3815_v62, 16  ;;  %v317_v19 = vld [vmem:[#allocation2 + $0x30] sm:$0xf] }
  0x53   : > { %825 = vrot.lane.b32.xlu0 %v780_v48, %s3974_s28  ;;  %v537_v1 = vsel %vm501_vm9, %v532_v53, %v536_v49  ;;  %v1160_v11 = vrot.slane %v1158_v3, 1  ;;  %v4168_v12 = vcombine.low %v3195_v4, %v3196_v10  ;;  %v4170_v13 = vld [vmem:[#allocation2 + $0x44] ss:$0 sps:$4 sm:$0x11]   ;;  %v1399_v14 = vsel %vm774_vm8, %v1397_v54, %v1398_v59  ;;  %v318_v24 = vld [vmem:[#allocation2 + $0x34] sm:$0xf] }
  0x54   : > { %v544_v15 = vor.u32 %v543_v6, %v539_v60  ;;  %v1401_v16 = vrot.slane %v3815_v62, 1  ;;  %v1165_v17 = vrot.slane %v1163_v9, 1  ;;  %v1175_v23 = vshll.u32 %v4170_v13, 16  ;;  %v361_v30 = vld [vmem:[#allocation2 + $0x30] sm:$0xe] }
  0x55   : > { %v1161_v20 = vor.u32 %v1160_v11, %v1156_v2  ;;  %v1168_v21 = vshrl.u32 %v4168_v12, 16  ;;  %v1170_v22 = vshll.u32 %v4168_v12, 16  ;;  %v3174_v28 = vcombine.low %v360_v18, %v4145_v40  ;;  %v3821_v34 = vld [vmem:[#allocation2 + $0x38] ss:$0 sps:$4 sm:$0x11]  }
  0x56   : > { %827 = vrot.lane.b32.xlu1 %v783_v0, %s3974_s28  ;;  %v549_v25 = vsel %vm501_vm9, %v544_v15, %v548_v7  ;;  %v4180_v31 = vcombine.low %v317_v19, %v318_v24  ;;  %v785_v33 = vrot.slane %v4150_v47, 1  ;;  %v3175_v35 = vcombine.low %v361_v30, %v318_v24  ;;  %v3239_v39 = vld [vmem:[#allocation2 + $0x3c] sm:$0xe]  ;;  %v4188_v46 = vld [vmem:[#allocation2 + $0x40] sm:$0xf] }
  0x57   : > { %698 = vrot.lane.b32.xlu0 %v537_v1, %s3975_s29  ;;  %v1172_v32 = vrot.slane %v1170_v22, 1  ;;  %v1402_v36 = vsel %vm774_vm8, %v1400_v8, %v1401_v16  ;;  %v1177_v37 = vrot.slane %v1175_v23, 1  ;;  %v319_v42 = vld [vmem:[#allocation2 + $0x3c] sm:$0xf]  ;;  %v1166_v40 = vsel %vm501_vm9, %v1161_v20, %v1165_v17  ;;  %v3197_v56 = vld [vmem:[#allocation2 + $0x48] sm:$0xf] }
  0x58   : > { %v553_v38 = vshll.u32 %v4180_v31, 16  ;;  %v784_v44 = vrot.slane %v3174_v28, 1  ;;  %v558_v45 = vshll.u32 %v3821_v34, 16  ;;  %v787_v47 = vrot.slane %v3175_v35, 1  ;;  %v3198_v60 = vld [vmem:[#allocation2 + $0x4c] sm:$0xf] }
  0x59   : > { %v1173_v43 = vor.u32 %v1172_v32, %v1168_v21  ;;  %v788_v48 = vrot.slane %v3821_v34, 1  ;;  %v551_v49 = vshrl.u32 %v4180_v31, 16  ;;  %v3287_v53 = vcombine.low %v3239_v39, %v3196_v10  ;;  %v4194_v55 = vld [vmem:[#allocation2 + $0x44] ss:$0 sps:$4 sm:$0x11]  }
  0x5a   : > { %1443 = vrot.lane.b32.xlu1 %v1399_v14, %s3974_s28  ;;  %v555_v51 = vrot.slane %v553_v38, 1  ;;  %v560_v52 = vrot.slane %v558_v45, 1  ;;  %v4192_v54 = vcombine.low %v319_v42, %v4188_v46  ;;  %v3240_v61 = vld [vmem:[#allocation2 + $0x48] sm:$0xe]  ;;  %v570_v0 = vshll.u32 %v4194_v55, 16 }
  0x5b   : > { %700 = vrot.lane.b32.xlu0 %v549_v25, %s3975_s29  ;;  %v1178_v59 = vsel %vm501_vm9, %v1173_v43, %v1177_v37  ;;  %v4202_v1 = vcombine.low %v3197_v56, %v3198_v60  ;;  %v3827_v2 = vld [vmem:[#allocation2 + $0x50] ss:$0 sps:$4 sm:$0x11]   ;;  %v786_v3 = vsel %vm774_vm8, %v784_v44, %v785_v33  ;;  %v3199_v6 = vld [vmem:[#allocation2 + $0x54] sm:$0xf]  ;;  %v1403_v8 = vrot.slane %v3287_v53, 1 }
  0x5c   : > { %v563_v62 = vshrl.u32 %v4192_v54, 16  ;;  %v565_v63 = vshll.u32 %v4192_v54, 16  ;;  %v556_v4 = vor.u32 %v555_v51, %v551_v49  ;;  %v4205_v7 = vld [vmem:[#allocation2 + $0x58] sm:$0xf]  ;;  %v3288_v10 = vcombine.low %v3240_v61, %v3198_v60  ;;  %v321_v20 = vld [vmem:[#allocation2 + $0x48] sm:$0xf] }
  0x5d   : > { %v1404_v11 = vrot.slane %v4170_v13, 1  ;;  %v1182_v14 = vshll.u32 %v4202_v1, 16  ;;  %v1187_v15 = vshll.u32 %v3827_v2, 16  ;;  %v4211_v16 = vcombine.low %v3199_v6, %v4205_v7  ;;  %v4213_v17 = vld [vmem:[#allocation2 + $0x5c] ss:$0 sps:$4 sm:$0x11]  }
  0x5e   : > { %1445 = vrot.lane.b32.xlu1 %v1402_v36, %s3974_s28  ;;  %v567_v9 = vrot.slane %v565_v63, 1  ;;  %v789_v18 = vsel %vm774_vm8, %v787_v47, %v788_v48  ;;  %v1180_v19 = vshrl.u32 %v4202_v1, 16  ;;  %v322_v21 = vld [vmem:[#allocation2 + $0x4c] sm:$0xf]  ;;  %v561_v22 = vsel %vm501_vm9, %v556_v4, %v560_v52  ;;  %v362_v25 = vld [vmem:[#allocation2 + $0x3c] sm:$0xe] }
  0x5f   : > { %1317 = vrot.lane.b32.xlu0 %v1166_v40, %s3975_s29  ;;  %v572_v13 = vrot.slane %v570_v0, 1  ;;  %v1184_v24 = vrot.slane %v1182_v14, 1  ;;  %v1406_v28 = vrot.slane %v3288_v10, 1  ;;  %v1407_v30 = vrot.slane %v3827_v2, 1  ;;  %v363_v36 = vld [vmem:[#allocation2 + $0x48] sm:$0xe] }
  0x60   : > { %v568_v23 = vor.u32 %v567_v9, %v563_v62  ;;  %v1189_v32 = vrot.slane %v1187_v15, 1  ;;  %v1194_v33 = vshll.u32 %v4211_v16, 16  ;;  %v1405_v34 = vsel %vm774_vm8, %v1403_v8, %v1404_v11  ;;  %v3833_v38 = vld [vmem:[#allocation2 + $0x50] ss:$0 sps:$4 sm:$0x11]  }
  0x61   : > { %v1192_v35 = vshrl.u32 %v4211_v16, 16  ;;  %v4223_v37 = vcombine.low %v321_v20, %v322_v21  ;;  %v1185_v39 = vor.u32 %v1184_v24, %v1180_v19  ;;  %v1199_v40 = vshll.u32 %v4213_v17, 16  ;;  %v323_v44 = vld [vmem:[#allocation2 + $0x54] sm:$0xf]  ;;  %v4228_v45 = vld [vmem:[#allocation2 + $0x58] sm:$0xf] }
  0x62   : > { %1319 = vrot.lane.b32.xlu1 %v1178_v59, %s3975_s29  ;;  %v1196_v42 = vrot.slane %v1194_v33, 1  ;;  %v3176_v43 = vcombine.low %v362_v25, %v4188_v46  ;;  %v573_v47 = vsel %vm501_vm9, %v568_v23, %v572_v13  ;;  %v791_v48 = vrot.slane %v4194_v55, 1  ;;  %v3241_v52 = vld [vmem:[#allocation2 + $0x54] sm:$0xe]  ;;  %v3201_v46 = vld [vmem:[#allocation2 + $0x60] sm:$0xf] }
  0x63   : > { %829 = vrot.lane.b32.xlu0 %v786_v3, %s3974_s28  ;;  %v577_v49 = vshll.u32 %v4223_v37, 16  ;;  %v582_v51 = vshll.u32 %v3833_v38, 16  ;;  %v1408_v53 = vsel %vm774_vm8, %v1406_v28, %v1407_v30  ;;  %v3177_v56 = vcombine.low %v363_v36, %v322_v21  ;;  %v3202_v60 = vld [vmem:[#allocation2 + $0x64] sm:$0xf]  ;;  %v3335_v9 = vld [vmem:[#allocation2 + $0x18] sm:$0xf] }
  0x64   : > { %v4236_v59 = vcombine.low %v323_v44, %v4228_v45  ;;  %v1190_v61 = vsel %vm501_vm9, %v1185_v39, %v1189_v32  ;;  %v1197_v62 = vor.u32 %v1196_v42, %v1192_v35  ;;  %v1201_v55 = vrot.slane %v1199_v40, 1  ;;  %v4240_v0 = vld [vmem:[#allocation2 + $0x5c] ss:$0 sps:$4 sm:$0x11]   ;;  %v3242_v19 = vld [vmem:[#allocation2 + $0x60] sm:$0xe] }
  0x65   : > { %v790_v63 = vrot.slane %v3176_v43, 1  ;;  %v575_v2 = vshrl.u32 %v4223_v37, 16  ;;  %v579_v3 = vrot.slane %v577_v49, 1  ;;  %v4244_v6 = vcombine.low %v3201_v46, %v3202_v60  ;;  %v4247_v10 = vld [vmem:[#allocation2 + $0x1c] sm:$0xf] }
  0x66   : > { %831 = vrot.lane.b32.xlu1 %v789_v18, %s3974_s28  ;;  %v589_v4 = vshll.u32 %v4236_v59, 16  ;;  %v3289_v8 = vcombine.low %v3241_v52, %v4205_v7  ;;  %v793_v11 = vrot.slane %v3177_v56, 1  ;;  %v794_v14 = vrot.slane %v3833_v38, 1  ;;  %v3839_v7 = vld [vmem:[#allocation2 + $0x68] ss:$0 sps:$4 sm:$0x11]  }
  0x67   : > { %702 = vrot.lane.b32.xlu0 %v561_v22, %s3975_s29  ;;  %v584_v15 = vrot.slane %v582_v51, 1  ;;  %v587_v18 = vshrl.u32 %v4236_v59, 16  ;;  %v1202_v20 = vsel %vm501_vm9, %v1197_v62, %v1201_v55  ;;  %v792_v21 = vsel %vm774_vm8, %v790_v63, %v791_v48  ;;  %v3203_v23 = vld [vmem:[#allocation2 + $0x6c] sm:$0xf]  ;;  %v3204_v30 = vld [vmem:[#allocation2 + $0x70] sm:$0xf] }
  0x68   : > { %v594_v22 = vshll.u32 %v4240_v0, 16  ;;  %v580_v13 = vor.u32 %v579_v3, %v575_v2  ;;  %v591_v24 = vrot.slane %v589_v4, 1  ;;  %v1206_v25 = vshll.u32 %v4244_v6, 16  ;;  %v4259_v33 = vld [vmem:[#allocation2 + $0x20] ss:$0 sps:$4 sm:$0x11]  }
  0x69   : > { %v4257_v28 = vcombine.low %v3335_v9, %v4247_v10  ;;  %v3290_v32 = vcombine.low %v3242_v19, %v3202_v60  ;;  %v1409_v35 = vrot.slane %v3289_v8, 1  ;;  %v1410_v36 = vrot.slane %v4213_v17, 1  ;;  %v364_v38 = vld [vmem:[#allocation2 + $0x54] sm:$0xe]  ;;  %v3205_v51 = vld [vmem:[#allocation2 + $0x78] sm:$0xf] }
  0x6a   : > { %1447 = vrot.lane.b32.xlu1 %v1405_v34, %s3974_s28  ;;  %v795_v34 = vsel %vm774_vm8, %v793_v11, %v794_v14  ;;  %v596_v39 = vrot.slane %v594_v22, 1  ;;  %v1204_v42 = vshrl.u32 %v4244_v6, 16  ;;  %v4267_v43 = vcombine.low %v3203_v23, %v3204_v30  ;;  %v4270_v52 = vld [vmem:[#allocation2 + $0x7c] sm:$0xf]  ;;  %v3337_v4 = vld [vmem:[#allocation2 + $0x24] sm:$0xf] }
  0x6b   : > { %704 = vrot.lane.b32.xlu0 %v573_v47, %s3975_s29  ;;  %v2141_v40 = vshll.u32 %v4257_v28, 16  ;;  %v585_v44 = vsel %vm501_vm9, %v580_v13, %v584_v15  ;;  %v592_v47 = vor.u32 %v591_v24, %v587_v18  ;;  %v1208_v48 = vrot.slane %v1206_v25, 1  ;;  %v3845_v62 = vld [vmem:[#allocation2 + $0x74] ss:$0 sps:$4 sm:$0x11]  }
  0x6c   : > { %v1211_v49 = vshll.u32 %v3839_v7, 16  ;;  %v1413_v17 = vrot.slane %v3839_v7, 1  ;;  %v2146_v56 = vshll.u32 %v4259_v33, 16  ;;  %v3178_v46 = vcombine.low %v364_v38, %v4228_v45  ;;  %v3338_v8 = vld [vmem:[#allocation2 + $0x28] sm:$0xf] }
  0x6d   : > { %v2139_v60 = vshrl.u32 %v4257_v28, 16  ;;  %v1411_v55 = vsel %vm774_vm8, %v1409_v35, %v1410_v36  ;;  %v2143_v63 = vrot.slane %v2141_v40, 1  ;;  %v1218_v2 = vshll.u32 %v4267_v43, 16  ;;  %v3383_v22 = vld [vmem:[#allocation2 + $0x18] sm:$0xe] }
  0x6e   : > { %1449 = vrot.lane.b32.xlu1 %v1408_v53, %s3974_s28  ;;  %v1412_v53 = vrot.slane %v3290_v32, 1  ;;  %v4280_v3 = vcombine.low %v3205_v51, %v4270_v52  ;;  %v597_v45 = vsel %vm501_vm9, %v592_v47, %v596_v39  ;;  %v1209_v9 = vor.u32 %v1208_v48, %v1204_v42  ;;  %v4286_v7 = vld [vmem:[#allocation2 + $0x80] ss:$0 sps:$4 sm:$0x11]   ;;  %v4294_v35 = vld [vmem:[#allocation2 + $0x34] sm:$0xf] }
  0x6f   : > { %1321 = vrot.lane.b32.xlu0 %v1190_v61, %s3975_s29  ;;  %v3243_v61 = vld [vmem:[#allocation2 + $0x6c] sm:$0xe]  ;;  %v1213_v11 = vrot.slane %v1211_v49, 1  ;;  %v2148_v14 = vrot.slane %v2146_v56, 1  ;;  %v796_v15 = vrot.slane %v3178_v46, 1  ;;  %v797_v18 = vrot.slane %v4240_v0, 1 }
  0x70   : > { %v1414_v19 = vsel %vm774_vm8, %v1412_v53, %v1413_v17  ;;  %v4288_v23 = vcombine.low %v3337_v4, %v3338_v8  ;;  %v2144_v13 = vor.u32 %v2143_v63, %v2139_v60  ;;  %v1216_v24 = vshrl.u32 %v4267_v43, 16  ;;  %v3384_v36 = vld [vmem:[#allocation2 + $0x24] sm:$0xe]  ;;  %v3851_v49 = vld [vmem:[#allocation2 + $0x2c] ss:$0 sps:$4 sm:$0x11]  }
  0x71   : > { %v1220_v25 = vrot.slane %v1218_v2, 1  ;;  %v1230_v32 = vshll.u32 %v4280_v3, 16  ;;  %v1214_v0 = vsel %vm501_vm9, %v1209_v9, %v1213_v11  ;;  %v1416_v39 = vrot.slane %v3845_v62, 1  ;;  %v4310_v4 = vld [vmem:[#allocation2 + $0x38] ss:$0 sps:$4 sm:$0x11]  }
  0x72   : > { %1323 = vrot.lane.b32.xlu1 %v1202_v20, %s3975_s29  ;;  %v3291_v20 = vcombine.low %v3243_v61, %v3204_v30  ;;  %v3431_v30 = vcombine.low %v3383_v22, %v4247_v10  ;;  %v1235_v42 = vshll.u32 %v4286_v7, 16  ;;  %v2153_v40 = vshll.u32 %v4288_v23, 16  ;;  %v3207_v61 = vld [vmem:[#allocation2 + $0x84] sm:$0xf] }
  0x73   : > { %833 = vrot.lane.b32.xlu0 %v792_v21, %s3974_s28  ;;  %v1223_v21 = vshll.u32 %v3845_v62, 16  ;;  %v1221_v47 = vor.u32 %v1220_v25, %v1216_v24  ;;  %v798_v10 = vsel %vm774_vm8, %v796_v15, %v797_v18  ;;  %v1228_v53 = vshrl.u32 %v4280_v3, 16  ;;  %v3208_v62 = vld [vmem:[#allocation2 + $0x88] sm:$0xf]  ;;  %v3245_v25 = vld [vmem:[#allocation2 + $0x84] sm:$0xe] }
  0x74   : > { %v1415_v38 = vrot.slane %v3291_v20, 1  ;;  %v1232_v17 = vrot.slane %v1230_v32, 1  ;;  %v3432_v56 = vcombine.low %v3384_v36, %v3338_v8  ;;  %v2410_v46 = vrot.slane %v3431_v30, 1  ;;  %v3209_v20 = vld [vmem:[#allocation2 + $0x90] sm:$0xf] }
  0x75   : > { %v1225_v48 = vrot.slane %v1223_v21, 1  ;;  %v2411_v60 = vrot.slane %v4259_v33, 1  ;;  %v2151_v63 = vshrl.u32 %v4288_v23, 16  ;;  %v2155_v2 = vrot.slane %v2153_v40, 1  ;;  %v3244_v33 = vld [vmem:[#allocation2 + $0x78] sm:$0xe] }
  0x76   : > { %835 = vrot.lane.b32.xlu1 %v795_v34, %s3974_s28  ;;  %v3339_v34 = vld [vmem:[#allocation2 + $0x30] sm:$0xf]  ;;  %v2158_v8 = vshll.u32 %v3851_v49, 16  ;;  %v2413_v15 = vrot.slane %v3432_v56, 1  ;;  %v2414_v18 = vrot.slane %v3851_v49, 1  ;;  %v3292_v24 = vcombine.low %v3244_v33, %v4270_v52 }
  0x77   : > { %706 = vrot.lane.b32.xlu0 %v585_v44, %s3975_s29  ;;  %v2149_v44 = vsel %vm501_vm9, %v2144_v13, %v2148_v14  ;;  %v4303_v51 = vcombine.low %v3339_v34, %v4294_v35  ;;  %v1226_v9 = vsel %vm501_vm9, %v1221_v47, %v1225_v48  ;;  %v1233_v14 = vor.u32 %v1232_v17, %v1228_v53  ;;  %v4318_v21 = vld [vmem:[#allocation2 + $0x94] sm:$0xf]  ;;  %v3857_v32 = vld [vmem:[#allocation2 + $0x8c] ss:$0 sps:$4 sm:$0x11]  }
  0x78   : > { %v2412_v22 = vsel %vm774_vm8, %v2410_v46, %v2411_v60  ;;  %v2170_v13 = vshll.u32 %v4310_v4, 16  ;;  %v2160_v34 = vrot.slane %v2158_v8, 1  ;;  %v1419_v40 = vrot.slane %v4286_v7, 1  ;;  %v3341_v52 = vld [vmem:[#allocation2 + $0x3c] sm:$0xf] }
  0x79   : > { %v2165_v11 = vshll.u32 %v4303_v51, 16  ;;  %v2163_v30 = vshrl.u32 %v4303_v51, 16  ;;  %v3342_v47 = vld [vmem:[#allocation2 + $0x40] sm:$0xf]  ;;  %v1418_v49 = vrot.slane %v3292_v24, 1  ;;  %v2415_v17 = vsel %vm774_vm8, %v2413_v15, %v2414_v18 }
  0x7a   : > { %1451 = vrot.lane.b32.xlu1 %v1411_v55, %s3974_s28  ;;  %v1237_v55 = vrot.slane %v1235_v42, 1  ;;  %v4329_v42 = vcombine.low %v3209_v20, %v4318_v21  ;;  %v2172_v48 = vrot.slane %v2170_v13, 1  ;;  %v4333_v53 = vld [vmem:[#allocation2 + $0x98] ss:$0 sps:$4 sm:$0x11]  }
  0x7b   : > { %708 = vrot.lane.b32.xlu0 %v597_v45, %s3975_s29  ;;  %v1417_v45 = vsel %vm774_vm8, %v1415_v38, %v1416_v39  ;;  %v2167_v36 = vrot.slane %v2165_v11, 1  ;;  %v3343_v60 = vld [vmem:[#allocation2 + $0x48] sm:$0xf]  ;;  %v3386_v33 = vld [vmem:[#allocation2 + $0x3c] sm:$0xe]  ;;  %v1259_v20 = vshll.u32 %v4333_v53, 16  ;;  %v1420_v13 = vsel %vm774_vm8, %v1418_v49, %v1419_v40 }
  0x7c   : > { %v1238_v38 = vsel %vm501_vm9, %v1233_v14, %v1237_v55  ;;  %v3385_v55 = vld [vmem:[#allocation2 + $0x30] sm:$0xe]  ;;  %v1252_v11 = vshrl.u32 %v4329_v42, 16 }
  0x7d   : > { %v2168_v46 = vor.u32 %v2167_v36, %v2163_v30  ;;  %v3433_v18 = vcombine.low %v3385_v55, %v4294_v35  ;;  %v3434_v30 = vcombine.low %v3386_v33, %v3342_v47  ;;  %v4357_v36 = vld [vmem:[#allocation2 + $0x50] ss:$0 sps:$4 sm:$0x11]   ;;  %v2417_v35 = vrot.slane %v4310_v4, 1 }
  0x7e   : > { %1453 = vrot.lane.b32.xlu1 %v1414_v19, %s3974_s28  ;;  %v4316_v19 = vcombine.low %v3207_v61, %v3208_v62  ;;  %v4338_v61 = vld [vmem:[#allocation2 + $0x4c] sm:$0xf]  ;;  %v2194_v55 = vshll.u32 %v4357_v36, 16 }
  0x7f   : > { %1325 = vrot.lane.b32.xlu0 %v1214_v0, %s3975_s29  ;;  %v2156_v0 = vor.u32 %v2155_v2, %v2151_v63  ;;  %v1254_v63 = vshll.u32 %v4329_v42, 16  ;;  %v4342_v2 = vcombine.low %v3341_v52, %v3342_v47  ;;  %v4347_v14 = vcombine.low %v3343_v60, %v4338_v61  ;;  %v4369_v60 = vld [vmem:[#allocation2 + $0xac] sm:$0xf] }
  0x80   : > { %v1242_v39 = vshll.u32 %v4316_v19, 16  ;;  %v1240_v7 = vshrl.u32 %v4316_v19, 16  ;;  %v2173_v15 = vsel %vm501_vm9, %v2168_v46, %v2172_v48  ;;  %v2416_v40 = vrot.slane %v3433_v18, 1  ;;  %v3246_v48 = vld [vmem:[#allocation2 + $0x90] sm:$0xe] }
  0x81   : > { %v2161_v56 = vsel %vm501_vm9, %v2156_v0, %v2160_v34  ;;  %5061 = vst [vmem:[#allocation3_spill] sm:$0xff] %v4347_v14  ;;  %v3211_v0 = vld [vmem:[#allocation2 + $0x9c] sm:$0xf]  ;;  %v4355_v34 = vld [vmem:[#allocation2 + $0xa0] sm:$0xf]  ;;  %v2419_v4 = vrot.slane %v3434_v30, 1 }
  0x82   : > { %2330 = vrot.lane.b32.xlu1 %v2149_v44, %s3975_s29  ;;  %v3293_v44 = vcombine.low %v3245_v25, %v3208_v62  ;;  %v1244_v62 = vrot.slane %v1242_v39, 1  ;;  %v1256_v25 = vrot.slane %v1254_v63, 1  ;;  %v2189_v39 = vshll.u32 %v4347_v14, 16  ;;  %v3213_v46 = vld [vmem:[#allocation2 + $0xa8] sm:$0xf] }
  0x83   : > { %837 = vrot.lane.b32.xlu0 %v798_v10, %s3974_s28  ;;  %v1247_v10 = vshll.u32 %v3857_v32, 16  ;;  %v4365_v49 = vcombine.low %v3211_v0, %v4355_v34  ;;  %v4379_v18 = vcombine.low %v3213_v46, %v4369_v60  ;;  %v2423_v0 = vrot.slane %v4357_v36, 1  ;;  %v4386_v30 = vld [vmem:[#allocation2 + $0xb0] ss:$0 sps:$4 sm:$0x11]  }
  0x84   : > { %v1245_v24 = vor.u32 %v1244_v62, %v1240_v7  ;;  %v2187_v62 = vshrl.u32 %v4347_v14, 16  ;;  %v2191_v63 = vrot.slane %v2189_v39, 1  ;;  %v1283_v46 = vshll.u32 %v4386_v30, 16 }
  0x85   : > { %v1249_v8 = vrot.slane %v1247_v10, 1  ;;  %v1257_v10 = vor.u32 %v1256_v25, %v1252_v11  ;;  %v2418_v11 = vsel %vm774_vm8, %v2416_v40, %v2417_v35  ;;  %5062 = vst [vmem:[#allocation4_spill] sm:$0xff] %v4379_v18  ;;  %v2196_v35 = vrot.slane %v2194_v55, 1 }
  0x86   : > { %1455 = vrot.lane.b32.xlu1 %v1417_v45, %s3974_s28  ;;  %v1421_v45 = vrot.slane %v3293_v44, 1  ;;  %v1261_v44 = vrot.slane %v1259_v20, 1 }
  0x87   : > { %1327 = vrot.lane.b32.xlu0 %v1226_v9, %s3975_s29  ;;  %v1422_v9 = vrot.slane %v3857_v32, 1  ;;  %v2177_v32 = vshll.u32 %v4342_v2, 16  ;;  %v1250_v47 = vsel %vm501_vm9, %v1245_v24, %v1249_v8  ;;  %v3869_v8 = vld [vmem:[#allocation2 + $0xa4] ss:$0 sps:$4 sm:$0x11]  }
  0x88   : > { %v1262_v20 = vsel %vm501_vm9, %v1257_v10, %v1261_v44  ;;  %v3346_v24 = vld [vmem:[#allocation2 + $0x58] sm:$0xf]  ;;  %v1271_v40 = vshll.u32 %v3869_v8, 16  ;;  %v3387_v44 = vld [vmem:[#allocation2 + $0x48] sm:$0xe] }
  0x89   : > { %v3347_v10 = vld [vmem:[#allocation2 + $0x60] sm:$0xf] }
  0x8a   : > { %2458 = vrot.lane.b32.xlu1 %v2412_v22, %s3974_s28  ;;  %v3863_v22 = vld [vmem:[#allocation2 + $0x44] ss:$0 sps:$4 sm:$0x11]  }
  0x8b   : > { %1329 = vrot.lane.b32.xlu0 %v1238_v38, %s3975_s29  ;;  %v1423_v38 = vsel %vm774_vm8, %v1421_v45, %v1422_v9  ;;  %v2182_v52 = vshll.u32 %v3863_v22, 16  ;;  %v2420_v7 = vrot.slane %v3863_v22, 1  ;;  %v3294_v45 = vcombine.low %v3246_v48, %v4318_v21  ;;  %v3247_v9 = vld [vmem:[#allocation2 + $0x9c] sm:$0xe] }
  0x8c   : > { %v1425_v21 = vrot.slane %v4333_v53, 1  ;;  %v1278_v53 = vshll.u32 %v4379_v18, 16 }
  0x8d   : > { %v2184_v33 = vrot.slane %v2182_v52, 1  ;;  %v2421_v25 = vsel %vm774_vm8, %v2419_v4, %v2420_v7  ;;  %v1424_v39 = vrot.slane %v3294_v45, 1  ;;  %v1264_v52 = vshrl.u32 %v4365_v49, 16  ;;  %v3388_v4 = vld [vmem:[#allocation2 + $0x54] sm:$0xe] }
  0x8e   : > { %2460 = vrot.lane.b32.xlu1 %v2415_v17, %s3974_s28  ;;  %v2175_v17 = vshrl.u32 %v4342_v2, 16  ;;  %v4399_v7 = vld [vmem:[#allocation2 + $0x5c] ss:$0 sps:$4 sm:$0x11]   ;;  %v1273_v45 = vrot.slane %v1271_v40, 1 }
  0x8f   : > { %2332 = vrot.lane.b32.xlu0 %v2161_v56, %s3975_s29  ;;  %v2179_v56 = vrot.slane %v2177_v32, 1  ;;  %v3295_v32 = vcombine.low %v3247_v9, %v4355_v34  ;;  %v1276_v9 = vshrl.u32 %v4379_v18, 16  ;;  %v3391_v18 = vld [vmem:[#allocation2 + $0x78] sm:$0xe] }
  0x91   : > { %v2180_v22 = vor.u32 %v2179_v56, %v2175_v17  ;;  %v4395_v17 = vld [vmem:[#allocation2 + $0x64] sm:$0xf]  ;;  %v3435_v56 = vcombine.low %v3387_v44, %v4338_v61  ;;  %v1427_v55 = vrot.slane %v3295_v32, 1  ;;  %v1285_v32 = vrot.slane %v1283_v46, 1 }
  0x92   : > { %2334 = vrot.lane.b32.xlu1 %v2173_v15, %s3975_s29  ;;  %v1266_v15 = vshll.u32 %v4365_v49, 16  ;;  %v4407_v61 = vcombine.low %v3347_v10, %v4395_v17  ;;  %v4414_v44 = vld [vmem:[#allocation2 + $0x68] ss:$0 sps:$4 sm:$0x11]  }
  0x93   : > { %1457 = vrot.lane.b32.xlu0 %v1420_v13, %s3974_s28  ;;  %v3345_v13 = vld [vmem:[#allocation2 + $0x54] sm:$0xf] }
  0x94   : > { %v1268_v48 = vrot.slane %v1266_v15, 1  ;;  %v4392_v34 = vcombine.low %v3345_v13, %v3346_v24  ;;  %5064 = vst [vmem:[#allocation6_spill] sm:$0xff] %v4407_v61  ;;  %v1426_v15 = vsel %vm774_vm8, %v1424_v39, %v1425_v21  ;;  %v3215_v13 = vld [vmem:[#allocation2 + $0xb4] sm:$0xf]  ;;  %v3889_v21 = vld [vmem:[%s5050_s1 + $0x8] sm:$0x3f]  }
  0x95   : > { %3755 = vmatprep.subr.msk.bf16.mxu1 %vm1576_vm10, %v3889_v21  ;;  %v1578_v46 = vsel %vm1576_vm10, %v3889_v21, 0  ;;  %v3350_v21 = vld [vmem:[#allocation2 + $0x70] sm:$0xf] }
  0x96   : > { %1459 = vrot.lane.b32.xlu1 %v1423_v38, %s3974_s28  ;;  %v2192_v38 = vor.u32 %v2191_v63, %v2187_v62  ;;  %5063 = vst [vmem:[#allocation5_spill] sm:$0xff] %v4392_v34  ;;  %v1428_v63 = vrot.slane %v3869_v8, 1  ;;  %v2426_v8 = vrot.slane %v4399_v7, 1  ;;  %v2199_v40 = vshrl.u32 %v4392_v34, 16  ;;  %3588 = vmatpush3.bf16.msra.mxu1 %v1578_v46 }
  0x97   : > { %1331 = vrot.lane.b32.xlu0 %v1250_v47, %s3975_s29  ;;  %v2185_v47 = vsel %vm501_vm9, %v2180_v22, %v2184_v33  ;;  %v2201_v33 = vshll.u32 %v4392_v34, 16  ;;  %v3436_v22 = vcombine.low %v3388_v4, %v3346_v24  ;;  %v3890_v4 = vld [vmem:[%s5050_s1] sm:$0x3f]  }
  0x98   : > { %v2197_v62 = vsel %vm501_vm9, %v2192_v38, %v2196_v35  ;;  %v2422_v38 = vrot.slane %v3435_v56, 1  ;;  %v2206_v35 = vshll.u32 %v4399_v7, 16  ;;  %v1429_v24 = vsel %vm774_vm8, %v1427_v55, %v1428_v63  ;;  %v3217_v55 = vld [vmem:[#allocation2 + $0xc0] sm:$0xf]  ;;  %v4431_v63 = vld [vmem:[#allocation2 + $0xc4] sm:$0xf]  ;;  %3756 = vmatprep.subr.msk.bf16.mxu0 %vm1576_vm10, %v3890_v4  ;;  %3757 = vmatprep.subr.msk.bf16.mxu1 %vm1576_vm10, %v3890_v4 }
  0x99   : > { %v2203_v39 = vrot.slane %v2201_v33, 1  ;;  %v2425_v56 = vrot.slane %v3436_v22, 1  ;;  %v4440_v33 = vsel %vm1576_vm10, %v3890_v4, 0  ;;  %v3351_v4 = vld [vmem:[#allocation2 + $0x78] sm:$0xf] }
  0x9a   : > { %2462 = vrot.lane.b32.xlu1 %v2418_v11, %s3974_s28  ;;  %v1280_v11 = vrot.slane %v1278_v53, 1  ;;  %v2208_v7 = vrot.slane %v2206_v35, 1  ;;  %3622 = vmatpush3.bf16.msra.mxu0 %v4440_v33 }
  0x9b   : > { %1333 = vrot.lane.b32.xlu0 %v1262_v20, %s3975_s29  ;;  %v1269_v20 = vor.u32 %v1268_v48, %v1264_v52  ;;  %v2213_v52 = vshll.u32 %v4407_v61, 16  ;;  %v3248_v48 = vld [vmem:[#allocation2 + $0xa8] sm:$0xe] }
  0x9c   : > { %v1281_v10 = vor.u32 %v1280_v11, %v1276_v9  ;;  %v2218_v9 = vshll.u32 %v4414_v44, 16  ;;  %v3249_v11 = vld [vmem:[#allocation2 + $0xb4] sm:$0xe]  ;;  %v3296_v22 = vcombine.low %v3248_v48, %v4369_v60  ;;  %v2427_v60 = vsel %vm774_vm8, %v2425_v56, %v2426_v8  ;;  %v4454_v48 = vld [vmem:[#allocation2 + $0xc8] ss:$0 sps:$4 sm:$0x11]  }
  0x9e   : > { %2464 = vrot.lane.b32.xlu1 %v2421_v25, %s3974_s28  ;;  %v3216_v25 = vld [vmem:[#allocation2 + $0xb8] sm:$0xf]  ;;  %v1286_v36 = vsel %vm501_vm9, %v1281_v10, %v1285_v32  ;;  %v1430_v10 = vrot.slane %v3296_v22, 1 }
  0x9f   : > { %2336 = vrot.lane.b32.xlu0 %v2185_v47, %s3975_s29  ;;  %v4422_v53 = vcombine.low %v3215_v13, %v3216_v25  ;;  %v1274_v47 = vsel %vm501_vm9, %v1269_v20, %v1273_v45  ;;  %v2424_v45 = vsel %vm774_vm8, %v2422_v38, %v2423_v0  ;;  %v2215_v20 = vrot.slane %v2213_v52, 1  ;;  %v3881_v13 = vld [vmem:[#allocation2 + $0xbc] ss:$0 sps:$4 sm:$0x11]   ;;  %v3349_v38 = vld [vmem:[#allocation2 + $0x6c] sm:$0xf] }
  0xa0   : > { %v4448_v0 = vcombine.low %v3217_v55, %v4431_v63  ;;  %v3389_v52 = vld [vmem:[#allocation2 + $0x60] sm:$0xe]  ;;  %v4458_v46 = vcombine.low %v3349_v38, %v3350_v21  ;;  %v4460_v55 = vld [vmem:[#allocation2 + $0x7c] sm:$0xf] }
  0xa1   : > { %5065 = vst [vmem:[#allocation7_spill] sm:$0xff] %v4422_v53  ;;  %v1290_v35 = vshll.u32 %v4422_v53, 16 }
  0xa2   : > { %2338 = vrot.lane.b32.xlu1 %v2197_v62, %s3975_s29  ;;  %v2211_v62 = vshrl.u32 %v4407_v61, 16  ;;  %5066 = vst [vmem:[#allocation8_spill] sm:$0xff] %v4448_v0  ;;  %5067 = vst [vmem:[#allocation9_spill] sm:$0xff] %v4458_v46  ;;  %v1302_v8 = vshll.u32 %v4448_v0, 16  ;;  %v2225_v38 = vshll.u32 %v4458_v46, 16 }
  0xa3   : > { %1461 = vrot.lane.b32.xlu0 %v1426_v15, %s3974_s28  ;;  %v2204_v15 = vor.u32 %v2203_v39, %v2199_v40  ;;  %v3297_v40 = vcombine.low %v3249_v11, %v3216_v25  ;;  %v2220_v39 = vrot.slane %v2218_v9, 1  ;;  %v1292_v25 = vrot.slane %v1290_v35, 1  ;;  %v3390_v11 = vld [vmem:[#allocation2 + $0x6c] sm:$0xe] }
  0xa4   : > { %v1434_v9 = vrot.slane %v3881_v13, 1 }
  0xa5   : > { %v2209_v32 = vsel %vm501_vm9, %v2204_v15, %v2208_v7  ;;  %v1433_v56 = vrot.slane %v3297_v40, 1  ;;  %v3437_v7 = vcombine.low %v3389_v52, %v4395_v17  ;;  %v325_v15 = vld [vmem:[#allocation2 + $0x60] sm:$0xf]  ;;  %v1300_v17 = vshrl.u32 %v4448_v0, 16 }
  0xa6   : > { %1463 = vrot.lane.b32.xlu1 %v1429_v24, %s3974_s28  ;;  %v1431_v24 = vrot.slane %v4386_v30, 1  ;;  %v1288_v30 = vshrl.u32 %v4422_v53, 16  ;;  %v1304_v52 = vrot.slane %v1302_v8, 1  ;;  %v365_v53 = vld [vmem:[#allocation2 + $0x60] sm:$0xe] }
  0xa7   : > { %1335 = vrot.lane.b32.xlu0 %v1274_v47, %s3975_s29  ;;  %v2216_v47 = vor.u32 %v2215_v20, %v2211_v62  ;;  %v4467_v62 = vcombine.low %v3351_v4, %v4460_v55  ;;  %v4469_v20 = vld [vmem:[#allocation2 + $0x64] sm:$0xf]  ;;  %v3438_v4 = vcombine.low %v3390_v11, %v3350_v21  ;;  %v2223_v21 = vshrl.u32 %v4458_v46, 16  ;;  %v3250_v11 = vld [vmem:[#allocation2 + $0xc0] sm:$0xe] }
  0xa8   : > { %v1432_v35 = vsel %vm774_vm8, %v1430_v10, %v1431_v24  ;;  %v1293_v40 = vor.u32 %v1292_v25, %v1288_v30  ;;  %v4478_v61 = vcombine.low %v325_v15, %v4469_v20  ;;  %v1435_v24 = vsel %vm774_vm8, %v1433_v56, %v1434_v9  ;;  %v327_v56 = vld [vmem:[#allocation2 + $0x6c] sm:$0xf]  ;;  %v4489_v9 = vld [vmem:[#allocation2 + $0x70] sm:$0xf] }
  0xa9   : > { %5068 = vst [vmem:[#allocation10_spill] sm:$0xff] %v4467_v62  ;;  %v2221_v22 = vsel %vm501_vm9, %v2216_v47, %v2220_v39  ;;  %v2428_v39 = vrot.slane %v3437_v7, 1  ;;  %v4483_v47 = vld [vmem:[#allocation2 + $0x80] ss:$0 sps:$4 sm:$0x11]   ;;  %v2237_v10 = vshll.u32 %v4467_v62, 16 }
  0xaa   : > { %2466 = vrot.lane.b32.xlu1 %v2424_v45, %s3974_s28  ;;  %v1295_v45 = vshll.u32 %v3881_v13, 16  ;;  %v3887_v13 = vld [vmem:[#allocation2 + $0x74] ss:$0 sps:$4 sm:$0x11]   ;;  %v601_v0 = vshll.u32 %v4478_v61, 16  ;;  %v2242_v46 = vshll.u32 %v4483_v47, 16 }
  0xab   : > { %1337 = vrot.lane.b32.xlu0 %v1286_v36, %s3975_s29  ;;  %v1307_v36 = vshll.u32 %v4454_v48, 16  ;;  %v2230_v8 = vshll.u32 %v3887_v13, 16  ;;  %v4491_v7 = vld [vmem:[#allocation2 + $0x68] ss:$0 sps:$4 sm:$0x11]  }
  0xac   : > { %v603_v14 = vrot.slane %v601_v0, 1 }
  0xad   : > { %v1309_v25 = vrot.slane %v1307_v36, 1  ;;  %v2235_v36 = vshrl.u32 %v4467_v62, 16  ;;  %v2232_v62 = vrot.slane %v2230_v8, 1  ;;  %v4512_v8 = vld [vmem:[#allocation2 + $0x74] ss:$0 sps:$4 sm:$0x11]  }
  0xae   : > { %2468 = vrot.lane.b32.xlu1 %v2427_v60, %s3974_s28  ;;  %v1297_v60 = vrot.slane %v1295_v45, 1  ;;  %v2227_v45 = vrot.slane %v2225_v38, 1  ;;  %v2239_v38 = vrot.slane %v2237_v10, 1  ;;  %v599_v10 = vshrl.u32 %v4478_v61, 16 }
  0xaf   : > { %2340 = vrot.lane.b32.xlu0 %v2209_v32, %s3975_s29  ;;  %v2429_v32 = vrot.slane %v4414_v44, 1  ;;  %v2431_v44 = vrot.slane %v3438_v4, 1  ;;  %v4502_v4 = vcombine.low %v327_v56, %v4489_v9 }
  0xb0   : > { %v1298_v15 = vsel %vm501_vm9, %v1293_v40, %v1297_v60 }
  0xb1   : > { %v2430_v60 = vsel %vm774_vm8, %v2428_v39, %v2429_v32  ;;  %v606_v39 = vshll.u32 %v4491_v7, 16  ;;  %v3353_v32 = vld [vmem:[#allocation2 + $0x84] sm:$0xf] }
  0xb2   : > { %2342 = vrot.lane.b32.xlu1 %v2221_v22, %s3975_s29  ;;  %v1305_v22 = vor.u32 %v1304_v52, %v1300_v17  ;;  %v3298_v17 = vcombine.low %v3250_v11, %v4431_v63  ;;  %v1437_v52 = vrot.slane %v4454_v48, 1  ;;  %v3354_v63 = vld [vmem:[#allocation2 + $0x88] sm:$0xf]  ;;  %v613_v11 = vshll.u32 %v4502_v4, 16 }
  0xb3   : > { %1465 = vrot.lane.b32.xlu0 %v1432_v35, %s3974_s28  ;;  %v2432_v35 = vrot.slane %v3887_v13, 1  ;;  %v4520_v56 = vcombine.low %v3353_v32, %v3354_v63 }
  0xb4   : > { %v824_v30 = vpop.permute.xlu1 %823  ;;  %v1310_v13 = vsel %vm501_vm9, %v1305_v22, %v1309_v25  ;;  %v1436_v0 = vrot.slane %v3298_v17, 1  ;;  %v3392_v22 = vld [vmem:[#allocation2 + $0x84] sm:$0xe] }
  0xb5   : > { %v2433_v25 = vsel %vm774_vm8, %v2431_v44, %v2432_v35  ;;  %v4522_v44 = vld [vmem:[#allocation2 + $0x94] sm:$0xf] }
  0xb6   : > { %1467 = vrot.lane.b32.xlu1 %v1435_v24, %s3974_s28  ;;  %v2228_v24 = vor.u32 %v2227_v45, %v2223_v21  ;;  %v2240_v21 = vor.u32 %v2239_v38, %v2235_v36  ;;  %v2244_v45 = vrot.slane %v2242_v46, 1  ;;  %v3355_v46 = vld [vmem:[#allocation2 + $0x90] sm:$0xf]  ;;  %v604_v38 = vor.u32 %v603_v14, %v599_v10 }
  0xb7   : > { %1339 = vrot.lane.b32.xlu0 %v1298_v15, %s3975_s29  ;;  %v3179_v15 = vcombine.low %v365_v53, %v4469_v20  ;;  %v800_v20 = vrot.slane %v4491_v7, 1  ;;  %v615_v10 = vrot.slane %v613_v11, 1  ;;  %v1438_v32 = vsel %vm774_vm8, %v1436_v0, %v1437_v52 }
  0xb8   : > { %v1440_v40 = vpop.permute.xlu1 %1439  ;;  %v2245_v17 = vsel %vm501_vm9, %v2240_v21, %v2244_v45 }
  0xb9   : > { %v695_v34 = vpop.permute.xlu0 %694  ;;  %v799_v36 = vrot.slane %v3179_v15, 1  ;;  %v3440_v15 = vcombine.low %v3392_v22, %v3354_v63 }
  0xba   : > { %v857_v48 = vsel %vm855_vm11, %v4098_v27, %v695_v34  ;;  %2470 = vrot.lane.b32.xlu1 %v2430_v60, %s3974_s28  ;;  %v2233_v34 = vsel %vm501_vm9, %v2228_v24, %v2232_v62  ;;  %v3439_v60 = vcombine.low %v3391_v18, %v4460_v55  ;;  %v611_v62 = vshrl.u32 %v4502_v4, 16  ;;  %v4531_v24 = vld [vmem:[#allocation2 + $0x8c] ss:$0 sps:$4 sm:$0x11]   ;;  %v4538_v55 = vld [vmem:[#allocation2 + $0x7c] sm:$0xf] }
  0xbb   : > { %1341 = vrot.lane.b32.xlu0 %v1310_v13, %s3975_s29  ;;  %v890_v53 = vsel %vm888_vm12, %v857_v48, %v824_v30  ;;  %v608_v30 = vrot.slane %v606_v39, 1  ;;  %v618_v13 = vshll.u32 %v4512_v8, 16  ;;  %v4536_v18 = vcombine.low %v3355_v46, %v4522_v44 }
  0xbc   : > { %3623 = vmatprep.mubr.msk.bf16.mxu0 %vm1543_vm13, %v890_v53  ;;  %v697_v27 = vpop.permute.xlu1 %696  ;;  %v2249_v48 = vshll.u32 %v4520_v56, 16  ;;  %v2434_v45 = vrot.slane %v3439_v60, 1  ;;  %v2435_v53 = vrot.slane %v4483_v47, 1  ;;  %v2438_v52 = vrot.slane %v4531_v24, 1 }
  0xbd   : > { %v1312_v35 = vpop.permute.xlu0 %1311  ;;  %v609_v63 = vsel %vm501_vm9, %v604_v38, %v608_v30  ;;  %v2437_v22 = vrot.slane %v3440_v15, 1  ;;  %v2254_v46 = vshll.u32 %v4531_v24, 16  ;;  %v2261_v47 = vshll.u32 %v4536_v18, 16  ;;  %v4564_v15 = vld [vmem:[#allocation2 + $0x88] sm:$0xf] }
  0xbe   : > { %v1472_v7 = vsel %vm855_vm11, %v4100_v29, %v1312_v35  ;;  %2472 = vrot.lane.b32.xlu1 %v2433_v25, %s3974_s28  ;;  %v329_v29 = vld [vmem:[#allocation2 + $0x78] sm:$0xf]  ;;  %v366_v35 = vld [vmem:[#allocation2 + $0x6c] sm:$0xe]  ;;  %v2247_v38 = vshrl.u32 %v4520_v56, 16  ;;  %v2251_v30 = vrot.slane %v2249_v48, 1 }
  0xbf   : > { %2344 = vrot.lane.b32.xlu0 %v2233_v34, %s3975_s29  ;;  %v1504_v14 = vsel %vm888_vm12, %v1472_v7, %v1440_v40  ;;  %v4543_v25 = vld [vmem:[#allocation2 + $0x98] ss:$0 sps:$4 sm:$0x11]   ;;  %v801_v40 = vsel %vm774_vm8, %v799_v36, %v800_v20  ;;  %v620_v34 = vrot.slane %v618_v13, 1  ;;  %v4553_v0 = vcombine.low %v329_v29, %v4538_v55  ;;  %v367_v13 = vld [vmem:[#allocation2 + $0x78] sm:$0xe] }
  0xc0   : > { %3589 = vmatprep.mubr.msk.bf16.mxu1 %vm1543_vm13, %v1504_v14  ;;  %v1442_v39 = vpop.permute.xlu1 %1441  ;;  %v616_v36 = vor.u32 %v615_v10, %v611_v62  ;;  %v2266_v60 = vshll.u32 %v4543_v25, 16  ;;  %v859_v7 = vsel %vm855_vm11, %v4109_v41, %v697_v27  ;;  %v331_v14 = vld [vmem:[#allocation2 + $0x84] sm:$0xf]  ;;  %v2436_v62 = vsel %vm774_vm8, %v2434_v45, %v2435_v53  ;;  %v4571_v29 = vld [vmem:[#allocation2 + $0x80] ss:$0 sps:$4 sm:$0x11]  }
  0xc1   : > { %v1314_v21 = vpop.permute.xlu0 %1313  ;;  %v3180_v10 = vcombine.low %v366_v35, %v4489_v9  ;;  %v2256_v41 = vrot.slane %v2254_v46, 1  ;;  %v2259_v27 = vshrl.u32 %v4536_v18, 16  ;;  %v3181_v9 = vcombine.low %v367_v13, %v4538_v55  ;;  %v3357_v53 = vld [vmem:[#allocation2 + $0x9c] sm:$0xf] }
  0xc2   : > { %v1474_v11 = vsel %vm855_vm11, %v4120_v58, %v1314_v21  ;;  %2346 = vrot.lane.b32.xlu1 %v2245_v17, %s3975_s29  ;;  %v621_v21 = vsel %vm501_vm9, %v616_v36, %v620_v34  ;;  %v4581_v45 = vcombine.low %v331_v14, %v4564_v15  ;;  %v2268_v46 = vrot.slane %v2266_v60, 1  ;;  %v4586_v35 = vld [vmem:[#allocation2 + $0x8c] ss:$0 sps:$4 sm:$0x11]   ;;  %v3393_v36 = vld [vmem:[#allocation2 + $0x90] sm:$0xe] }
  0xc3   : > { %1469 = vrot.lane.b32.xlu0 %v1438_v32, %s3974_s28  ;;  %v1506_v20 = vsel %vm888_vm12, %v1474_v11, %v1442_v39  ;;  %v625_v39 = vshll.u32 %v4553_v0, 16  ;;  %v803_v32 = vrot.slane %v4512_v8, 1  ;;  %v4583_v11 = vld [vmem:[#allocation2 + $0xa0] sm:$0xf]  ;;  %v623_v34 = vshrl.u32 %v4553_v0, 16 }
  0xc4   : > { %3590 = vmatmul.mubr.msk.bf16.vlgmr.msra.gmra.mrb[0].mxu1 %vm1543_vm13, %v1506_v20  ;;  %v1316_v58 = vpop.permute.xlu1 %1315  ;;  %v2439_v20 = vsel %vm774_vm8, %v2437_v22, %v2438_v52  ;;  %v802_v52 = vrot.slane %v3180_v10, 1  ;;  %v4596_v22 = vcombine.low %v3357_v53, %v4583_v11  ;;  %v637_v13 = vshll.u32 %v4581_v45, 16  ;;  %v3359_v14 = vld [vmem:[#allocation2 + $0xa8] sm:$0xf] }
  0xc5   : > { %v826_v17 = vpop.permute.xlu0 %825  ;;  %3690 = vmatpush3.bf16.msra.mxu1 %v4440_v33  ;;  %v2263_v33 = vrot.slane %v2261_v47, 1  ;;  %v627_v55 = vrot.slane %v625_v39, 1  ;;  %v630_v47 = vshll.u32 %v4571_v29, 16  ;;  %v806_v39 = vrot.slane %v4571_v29, 1 }
  0xc6   : > { %v892_v24 = vsel %vm888_vm12, %v859_v7, %v826_v17  ;;  %839 = vrot.lane.b32.xlu1 %v801_v40, %s3974_s28  ;;  %v2252_v40 = vor.u32 %v2251_v30, %v2247_v38  ;;  %v805_v17 = vrot.slane %v3181_v9, 1  ;;  %v635_v29 = vshrl.u32 %v4581_v45, 16 }
  0xc7   : > { %710 = vrot.lane.b32.xlu0 %v609_v63, %s3975_s29  ;;  %3624 = vmatmul.mubr.msk.bf16.vlgmr.msra.gmra.mrb[0].mxu0 %vm1543_vm13, %v892_v24  ;;  %v2264_v30 = vor.u32 %v2263_v33, %v2259_v27  ;;  %v4603_v24 = vld [vmem:[#allocation2 + $0xac] sm:$0xf]  ;;  %v3441_v27 = vcombine.low %v3393_v36, %v4522_v44  ;;  %v632_v33 = vrot.slane %v630_v47, 1  ;;  %v2273_v44 = vshll.u32 %v4596_v22, 16  ;;  %v333_v36 = vld [vmem:[#allocation2 + $0x90] sm:$0xf] }
  0xc8   : > { %v828_v48 = vpop.permute.xlu1 %827  ;;  %v2257_v7 = vsel %vm501_vm9, %v2252_v40, %v2256_v41  ;;  %v628_v41 = vor.u32 %v627_v55, %v623_v34  ;;  %v4617_v9 = vcombine.low %v3359_v14, %v4603_v24  ;;  %v4621_v34 = vld [vmem:[#allocation2 + $0xb0] ss:$0 sps:$4 sm:$0x11]   ;;  %v807_v55 = vsel %vm774_vm8, %v805_v17, %v806_v39 }
  0xc9   : > { %v699_v63 = vpop.permute.xlu0 %698  ;;  %v2269_v40 = vsel %vm501_vm9, %v2264_v30, %v2268_v46  ;;  %v2440_v47 = vrot.slane %v3441_v27, 1  ;;  %v2275_v17 = vrot.slane %v2273_v44, 1  ;;  %v2290_v39 = vshll.u32 %v4621_v34, 16 }
  0xca   : > { %v861_v8 = vsel %vm855_vm11, %v4140_v26, %v699_v63  ;;  %2474 = vrot.lane.b32.xlu1 %v2436_v62, %s3974_s28  ;;  %v1476_v26 = vsel %vm855_vm11, %v4126_v5, %v1316_v58  ;;  %v642_v5 = vshll.u32 %v4586_v35, 16  ;;  %v3394_v58 = vld [vmem:[#allocation2 + $0x9c] sm:$0xe]  ;;  %v804_v63 = vsel %vm774_vm8, %v802_v52, %v803_v32 }
  0xcb   : > { %712 = vrot.lane.b32.xlu0 %v621_v21, %s3975_s29  ;;  %v894_v38 = vsel %vm888_vm12, %v861_v8, %v828_v48  ;;  %v2441_v48 = vrot.slane %v4543_v25, 1  ;;  %v3913_v21 = vld [vmem:[#allocation2 + $0xa4] ss:$0 sps:$4 sm:$0x11]   ;;  %v3442_v8 = vcombine.low %v3394_v58, %v4583_v11  ;;  %v633_v32 = vsel %vm501_vm9, %v628_v41, %v632_v33  ;;  %v368_v11 = vld [vmem:[#allocation2 + $0x84] sm:$0xe] }
  0xcc   : > { %3627 = vmatprep.mubr.msk.bf16.mxu0 %vm1543_vm13, %v894_v38  ;;  %v1444_v60 = vpop.permute.xlu1 %1443  ;;  %v644_v46 = vrot.slane %v642_v5, 1  ;;  %v4624_v38 = vld [vmem:[#allocation2 + $0x94] sm:$0xf]  ;;  %v2444_v52 = vrot.slane %v3913_v21, 1  ;;  %v335_v5 = vld [vmem:[#allocation2 + $0x9c] sm:$0xf]  ;;  %v3182_v44 = vcombine.low %v368_v11, %v4564_v15 }
  0xcd   : > { %v1508_v62 = vsel %vm888_vm12, %v1476_v26, %v1444_v60  ;;  %v701_v10 = vpop.permute.xlu0 %700  ;;  %v2278_v26 = vshll.u32 %v3913_v21, 16  ;;  %v4637_v27 = vcombine.low %v333_v36, %v4624_v38  ;;  %v4641_v33 = vld [vmem:[#allocation2 + $0xa0] sm:$0xf]  ;;  %v3938_v21 = vld [vmem:[%s5050_s1 + $0x10] sm:$0x3f]   ;;  %v809_v11 = vrot.slane %v4586_v35, 1 }
  0xce   : > { %2476 = vrot.lane.b32.xlu1 %v2439_v20, %s3974_s28  ;;  %3593 = vmatprep.mubr.msk.bf16.mxu1 %vm1543_vm13, %v1508_v62  ;;  %v639_v20 = vrot.slane %v637_v13, 1  ;;  %v2285_v13 = vshll.u32 %v4617_v9, 16  ;;  %v2443_v62 = vrot.slane %v3442_v8, 1  ;;  %v863_v58 = vsel %vm855_vm11, %v4154_v50, %v701_v10  ;;  %v4655_v36 = vld [vmem:[#allocation2 + $0xb8] sm:$0xf] }
  0xcf   : > { %2348 = vrot.lane.b32.xlu0 %v2257_v7, %s3975_s29  ;;  %v2271_v7 = vshrl.u32 %v4596_v22, 16  ;;  %v2442_v50 = vsel %vm774_vm8, %v2440_v47, %v2441_v48  ;;  %v649_v15 = vshll.u32 %v4637_v27, 16  ;;  %3758 = vmatprep.subr.msk.bf16.mxu0 %vm1576_vm10, %v3938_v21  ;;  %v2292_v47 = vrot.slane %v2290_v39, 1  ;;  %v4677_v39 = vld [vmem:[#allocation2 + $0xa4] ss:$0 sps:$4 sm:$0x11]  }
  0xd0   : > { %v1446_v53 = vpop.permute.xlu1 %1445  ;;  %v2287_v8 = vrot.slane %v2285_v13, 1  ;;  %v2445_v48 = vsel %vm774_vm8, %v2443_v62, %v2444_v52  ;;  %v3395_v13 = vld [vmem:[#allocation2 + $0xa8] sm:$0xe] }
  0xd1   : > { %v1318_v25 = vpop.permute.xlu0 %1317  ;;  %v2276_v10 = vor.u32 %v2275_v17, %v2271_v7 }
  0xd2   : > { %v1478_v30 = vsel %vm855_vm11, %v4157_v57, %v1318_v25  ;;  %2350 = vrot.lane.b32.xlu1 %v2269_v40, %s3975_s29  ;;  %v640_v57 = vor.u32 %v639_v20, %v635_v29  ;;  %v2280_v29 = vrot.slane %v2278_v26, 1  ;;  %v2283_v20 = vshrl.u32 %v4617_v9, 16  ;;  %v3361_v25 = vld [vmem:[#allocation2 + $0xb4] sm:$0xf] }
  0xd3   : > { %841 = vrot.lane.b32.xlu0 %v804_v63, %s3974_s28  ;;  %v1510_v60 = vsel %vm888_vm12, %v1478_v30, %v1446_v53  ;;  %v369_v53 = vld [vmem:[#allocation2 + $0x90] sm:$0xe]  ;;  %v4649_v63 = vld [vmem:[#allocation2 + $0x98] ss:$0 sps:$4 sm:$0x11]   ;;  %v4660_v26 = vcombine.low %v335_v5, %v4641_v33 }
  0xd4   : > { %3594 = vmatmul.mubr.msk.bf16.gmra.mrb[4].mxu1 %vm1543_vm13, %v1510_v60  ;;  %v1320_v14 = vpop.permute.xlu1 %1319  ;;  %v645_v30 = vsel %vm501_vm9, %v640_v57, %v644_v46  ;;  %v3183_v60 = vcombine.low %v369_v53, %v4624_v38  ;;  %v808_v46 = vrot.slane %v3182_v44, 1  ;;  %v654_v17 = vshll.u32 %v4649_v63, 16  ;;  %v4683_v44 = vld [vmem:[#allocation2 + $0xc4] sm:$0xf] }
  0xd5   : > { %v830_v41 = vpop.permute.xlu0 %829  ;;  %v4671_v57 = vcombine.low %v3361_v25, %v4655_v36  ;;  %v2281_v35 = vsel %vm501_vm9, %v2276_v10, %v2280_v29  ;;  %v2288_v62 = vor.u32 %v2287_v8, %v2283_v20  ;;  %v647_v38 = vshrl.u32 %v4637_v27, 16  ;;  %v3925_v8 = vld [vmem:[#allocation2 + $0xbc] ss:$0 sps:$4 sm:$0x11]  }
  0xd6   : > { %v896_v40 = vsel %vm888_vm12, %v863_v58, %v830_v41  ;;  %843 = vrot.lane.b32.xlu1 %v807_v55, %s3974_s28  ;;  %v1480_v5 = vsel %vm855_vm11, %v4168_v12, %v1320_v14  ;;  %v651_v41 = vrot.slane %v649_v15, 1  ;;  %v2595_v53 = vsel %vm1576_vm10, %v3938_v21, 0  ;;  %v3396_v14 = vld [vmem:[#allocation2 + $0xb4] sm:$0xe] }
  0xd7   : > { %714 = vrot.lane.b32.xlu0 %v633_v32, %s3975_s29  ;;  %3628 = vmatmul.mubr.msk.bf16.gmra.mrb[4].mxu0 %vm1543_vm13, %v896_v40  ;;  %v661_v40 = vshll.u32 %v4660_v26, 16  ;;  %v811_v10 = vrot.slane %v3183_v60, 1  ;;  %v812_v20 = vrot.slane %v4649_v63, 1  ;;  %v810_v12 = vsel %vm774_vm8, %v808_v46, %v809_v11 }
  0xd8   : > { %v832_v55 = vpop.permute.xlu1 %831  ;;  %3656 = vmatpush3.bf16.msra.mxu0 %v2595_v53  ;;  %v2297_v25 = vshll.u32 %v4671_v57, 16  ;;  %v2293_v21 = vsel %vm501_vm9, %v2288_v62, %v2292_v47  ;;  %v659_v11 = vshrl.u32 %v4660_v26, 16  ;;  %v2447_v47 = vrot.slane %v4621_v34, 1 }
  0xd9   : > { %v703_v32 = vpop.permute.xlu0 %702  ;;  %v663_v60 = vrot.slane %v661_v40, 1 }
  0xda   : > { %v865_v7 = vsel %vm855_vm11, %v4180_v31, %v703_v32  ;;  %2478 = vrot.lane.b32.xlu1 %v2442_v50, %s3974_s28  ;;  %v3363_v31 = vld [vmem:[#allocation2 + $0xc0] sm:$0xf]  ;;  %v652_v32 = vor.u32 %v651_v41, %v647_v38  ;;  %v2299_v38 = vrot.slane %v2297_v25, 1 }
  0xdb   : > { %716 = vrot.lane.b32.xlu0 %v645_v30, %s3975_s29  ;;  %v898_v52 = vsel %vm888_vm12, %v865_v7, %v832_v55  ;;  %v3443_v55 = vcombine.low %v3395_v13, %v4603_v24  ;;  %v666_v30 = vshll.u32 %v4677_v39, 16  ;;  %v4697_v63 = vcombine.low %v3363_v31, %v4683_v44  ;;  %v4700_v7 = vld [vmem:[#allocation2 + $0xc8] ss:$0 sps:$4 sm:$0x11]  }
  0xdc   : > { %3631 = vmatprep.mubr.msk.bf16.mxu0 %vm1543_vm13, %v898_v52  ;;  %v1448_v58 = vpop.permute.xlu1 %1447  ;;  %v813_v52 = vsel %vm774_vm8, %v811_v10, %v812_v20  ;;  %v3444_v24 = vcombine.low %v3396_v14, %v4655_v36  ;;  %v337_v13 = vld [vmem:[#allocation2 + $0xa8] sm:$0xf]  ;;  %v2302_v31 = vshll.u32 %v3925_v8, 16  ;;  %v664_v53 = vor.u32 %v663_v60, %v659_v11 }
  0xdd   : > { %v1512_v29 = vsel %vm888_vm12, %v1480_v5, %v1448_v58  ;;  %v705_v50 = vpop.permute.xlu0 %704  ;;  %v370_v5 = vld [vmem:[#allocation2 + $0x9c] sm:$0xe]  ;;  %v2446_v34 = vrot.slane %v3443_v55, 1  ;;  %v668_v41 = vrot.slane %v666_v30, 1  ;;  %v2309_v36 = vshll.u32 %v4697_v63, 16 }
  0xde   : > { %2480 = vrot.lane.b32.xlu1 %v2445_v48, %s3974_s28  ;;  %3597 = vmatprep.mubr.msk.bf16.mxu1 %vm1543_vm13, %v1512_v29  ;;  %v656_v48 = vrot.slane %v654_v17, 1  ;;  %v2295_v17 = vshrl.u32 %v4671_v57, 16  ;;  %v2450_v29 = vrot.slane %v3925_v8, 1  ;;  %v867_v20 = vsel %vm855_vm11, %v4192_v54, %v705_v50  ;;  %v339_v55 = vld [vmem:[#allocation2 + $0xb4] sm:$0xf] }
  0xdf   : > { %2352 = vrot.lane.b32.xlu0 %v2281_v35, %s3975_s29  ;;  %v4705_v35 = vld [vmem:[#allocation2 + $0xac] sm:$0xf]  ;;  %v2449_v14 = vrot.slane %v3444_v24, 1  ;;  %v2314_v25 = vshll.u32 %v4700_v7, 16  ;;  %v4723_v30 = vld [vmem:[#allocation2 + $0xb8] sm:$0xf]  ;;  %v2448_v54 = vsel %vm774_vm8, %v2446_v34, %v2447_v47 }
  0xe0   : > { %v1450_v15 = vpop.permute.xlu1 %1449  ;;  %v4717_v10 = vcombine.low %v337_v13, %v4705_v35  ;;  %v2300_v8 = vor.u32 %v2299_v38, %v2295_v17  ;;  %v2307_v50 = vshrl.u32 %v4697_v63, 16  ;;  %v2311_v11 = vrot.slane %v2309_v36, 1  ;;  %v3397_v36 = vld [vmem:[#allocation2 + $0xc0] sm:$0xe] }
  0xe1   : > { %v1322_v46 = vpop.permute.xlu0 %1321  ;;  %v2316_v17 = vrot.slane %v2314_v25, 1  ;;  %v815_v34 = vrot.slane %v4677_v39, 1 }
  0xe2   : > { %v1482_v62 = vsel %vm855_vm11, %v4202_v1, %v1322_v46  ;;  %2354 = vrot.lane.b32.xlu1 %v2293_v21, %s3975_s29  ;;  %v657_v1 = vsel %vm501_vm9, %v652_v32, %v656_v48  ;;  %v3184_v21 = vcombine.low %v370_v5, %v4641_v33  ;;  %v2304_v32 = vrot.slane %v2302_v31, 1  ;;  %v371_v48 = vld [vmem:[#allocation2 + $0xa8] sm:$0xe]  ;;  %v3931_v33 = vld [vmem:[#allocation2 + $0xb0] ss:$0 sps:$4 sm:$0x11]  }
  0xe3   : > { %845 = vrot.lane.b32.xlu0 %v810_v12, %s3974_s28  ;;  %v1514_v58 = vsel %vm888_vm12, %v1482_v62, %v1450_v15  ;;  %v669_v46 = vsel %vm501_vm9, %v664_v53, %v668_v41  ;;  %v673_v24 = vshll.u32 %v4717_v10, 16  ;;  %v2451_v62 = vsel %vm774_vm8, %v2449_v14, %v2450_v29  ;;  %v3365_v31 = vld [vmem:[#allocation2 + $0xcc] sm:$0xf]  ;;  %v4737_v5 = vld [vmem:[#allocation2 + $0xd0] sm:$0xf] }
  0xe4   : > { %3598 = vmatmul.mubr.msk.bf16.gmra.mrb[8].mxu1 %vm1543_vm13, %v1514_v58  ;;  %v1324_v40 = vpop.permute.xlu1 %1323  ;;  %v814_v38 = vrot.slane %v3184_v21, 1  ;;  %v2305_v58 = vsel %vm501_vm9, %v2300_v8, %v2304_v32  ;;  %v3185_v41 = vcombine.low %v371_v48, %v4705_v35  ;;  %v2312_v53 = vor.u32 %v2311_v11, %v2307_v50  ;;  %v3937_v50 = vld [vmem:[#allocation2 + $0xd4] ss:$0 sps:$4 sm:$0x11]  }
  0xe5   : > { %v834_v12 = vpop.permute.xlu0 %833  ;;  %v671_v29 = vshrl.u32 %v4717_v10, 16  ;;  %v675_v39 = vrot.slane %v673_v24, 1  ;;  %v4755_v25 = vcombine.low %v3365_v31, %v4737_v5  ;;  %v818_v8 = vrot.slane %v3931_v33, 1 }
  0xe6   : > { %v900_v15 = vsel %vm888_vm12, %v867_v20, %v834_v12  ;;  %847 = vrot.lane.b32.xlu1 %v813_v52, %s3974_s28  ;;  %v4734_v52 = vcombine.low %v339_v55, %v4723_v30  ;;  %v678_v20 = vshll.u32 %v3931_v33, 16  ;;  %v4748_v12 = vld [vmem:[#allocation2 + $0xbc] ss:$0 sps:$4 sm:$0x11]   ;;  %v816_v32 = vsel %vm774_vm8, %v814_v38, %v815_v34  ;;  %v3398_v33 = vld [vmem:[#allocation2 + $0xcc] sm:$0xe] }
  0xe7   : > { %718 = vrot.lane.b32.xlu0 %v657_v1, %s3975_s29  ;;  %3632 = vmatmul.mubr.msk.bf16.gmra.mrb[8].mxu0 %vm1543_vm13, %v900_v15  ;;  %v817_v15 = vrot.slane %v3185_v41, 1  ;;  %v2453_v31 = vrot.slane %v4700_v7, 1  ;;  %v2326_v34 = vshll.u32 %v3937_v50, 16  ;;  %v3446_v41 = vcombine.low %v3398_v33, %v4737_v5 }
  0xe8   : > { %v836_v60 = vpop.permute.xlu1 %835  ;;  %v685_v35 = vshll.u32 %v4734_v52, 16  ;;  %v680_v48 = vrot.slane %v678_v20, 1 }
  0xe9   : > { %v707_v13 = vpop.permute.xlu0 %706 }
  0xea   : > { %v869_v47 = vsel %vm855_vm11, %v4223_v37, %v707_v13  ;;  %2482 = vrot.lane.b32.xlu1 %v2448_v54, %s3974_s28  ;;  %v1484_v37 = vsel %vm855_vm11, %v4211_v16, %v1324_v40  ;;  %v3445_v16 = vcombine.low %v3397_v36, %v4683_v44  ;;  %v2317_v40 = vsel %vm501_vm9, %v2312_v53, %v2316_v17 }
  0xeb   : > { %720 = vrot.lane.b32.xlu0 %v669_v46, %s3975_s29  ;;  %v902_v1 = vsel %vm888_vm12, %v869_v47, %v836_v60  ;;  %v690_v54 = vshll.u32 %v4748_v12, 16  ;;  %v676_v60 = vor.u32 %v675_v39, %v671_v29  ;;  %v683_v46 = vshrl.u32 %v4734_v52, 16 }
  0xec   : > { %3635 = vmatprep.mubr.msk.bf16.mxu0 %vm1543_vm13, %v902_v1  ;;  %v1452_v14 = vpop.permute.xlu1 %1451  ;;  %v687_v24 = vrot.slane %v685_v35, 1  ;;  %v2321_v13 = vshll.u32 %v4755_v25, 16  ;;  %v819_v17 = vsel %vm774_vm8, %v817_v15, %v818_v8  ;;  %v2452_v38 = vrot.slane %v3445_v16, 1 }
  0xed   : > { %v1516_v21 = vsel %vm888_vm12, %v1484_v37, %v1452_v14  ;;  %v709_v55 = vpop.permute.xlu0 %708  ;;  %v2319_v53 = vshrl.u32 %v4755_v25, 16  ;;  %v372_v37 = vld [vmem:[#allocation2 + $0xb4] sm:$0xe]  ;;  %v2455_v39 = vrot.slane %v3446_v41, 1  ;;  %v2456_v35 = vrot.slane %v3937_v50, 1 }
  0xee   : > { %2484 = vrot.lane.b32.xlu1 %v2451_v62, %s3974_s28  ;;  %3601 = vmatprep.mubr.msk.bf16.mxu1 %vm1543_vm13, %v1516_v21  ;;  %v688_v1 = vor.u32 %v687_v24, %v683_v46  ;;  %v2323_v29 = vrot.slane %v2321_v13, 1  ;;  %v871_v7 = vsel %vm855_vm11, %v4236_v59, %v709_v55  ;;  %v2454_v5 = vsel %vm774_vm8, %v2452_v38, %v2453_v31 }
  0xef   : > { %2356 = vrot.lane.b32.xlu0 %v2305_v58, %s3975_s29  ;;  %v692_v58 = vrot.slane %v690_v54, 1  ;;  %v2328_v16 = vrot.slane %v2326_v34, 1  ;;  %v3186_v59 = vcombine.low %v372_v37, %v4723_v30 }
  0xf0   : > { %v1454_v11 = vpop.permute.xlu1 %1453  ;;  %v2324_v8 = vor.u32 %v2323_v29, %v2319_v53 }
  0xf1   : > { %v1326_v62 = vpop.permute.xlu0 %1325  ;;  %v693_v15 = vsel %vm501_vm9, %v688_v1, %v692_v58 }
  0xf2   : > { %v1486_v44 = vsel %vm855_vm11, %v4244_v6, %v1326_v62  ;;  %2358 = vrot.lane.b32.xlu1 %v2317_v40, %s3975_s29  ;;  %v681_v6 = vsel %vm501_vm9, %v676_v60, %v680_v48  ;;  %v2457_v48 = vsel %vm774_vm8, %v2455_v39, %v2456_v35  ;;  %v2329_v30 = vsel %vm501_vm9, %v2324_v8, %v2328_v16  ;;  %v5069_v39 = vld [vmem:[#allocation3_spill] sm:$0xff] }
  0xf3   : > { %849 = vrot.lane.b32.xlu0 %v816_v32, %s3974_s28  ;;  %v1518_v47 = vsel %vm888_vm12, %v1486_v44, %v1454_v11  ;;  %v820_v11 = vrot.slane %v3186_v59, 1  ;;  %v821_v60 = vrot.slane %v4748_v12, 1  ;;  %v5070_v59 = vld [vmem:[#allocation5_spill] sm:$0xff] }
  0xf4   : > { %3602 = vmatmul.mubr.msk.bf16.gmra.mrb[12].mxu1 %vm1543_vm13, %v1518_v47  ;;  %v2331_v36 = vpop.permute.xlu1 %2330 }
  0xf5   : > { %v838_v20 = vpop.permute.xlu0 %837  ;;  %v2491_v54 = vsel %vm855_vm11, %v4257_v28, %v2331_v36  ;;  %v822_v28 = vsel %vm774_vm8, %v820_v11, %v821_v60  ;;  %v5072_v60 = vld [vmem:[#allocation7_spill] sm:$0xff] }
  0xf6   : > { %v904_v14 = vsel %vm888_vm12, %v871_v7, %v838_v20  ;;  %851 = vrot.lane.b32.xlu1 %v819_v17, %s3974_s28 }
  0xf7   : > { %722 = vrot.lane.b32.xlu0 %v681_v6, %s3975_s29  ;;  %3636 = vmatmul.mubr.msk.bf16.gmra.mrb[12].mxu0 %vm1543_vm13, %v904_v14 }
  0xf8   : > { %v1456_v21 = vpop.permute.xlu1 %1455 }
  0xf9   : > { %v1328_v55 = vpop.permute.xlu0 %1327 }
  0xfa   : > { %v1488_v40 = vsel %vm855_vm11, %v4267_v43, %v1328_v55  ;;  %2486 = vrot.lane.b32.xlu1 %v2454_v5, %s3974_s28 }
  0xfb   : > { %724 = vrot.lane.b32.xlu0 %v693_v15, %s3975_s29  ;;  %v1520_v32 = vsel %vm888_vm12, %v1488_v40, %v1456_v21 }
  0xfc   : > { %3605 = vmatprep.mubr.msk.bf16.mxu1 %vm1543_vm13, %v1520_v32  ;;  %v2459_v50 = vpop.permute.xlu1 %2458  ;;  %v5071_v32 = vld [vmem:[#allocation4_spill] sm:$0xff] }
  0xfd   : > { %v2523_v43 = vsel %vm888_vm12, %v2491_v54, %v2459_v50  ;;  %v1330_v46 = vpop.permute.xlu0 %1329 }
  0xfe   : > { %3657 = vmatprep.mubr.msk.bf16.mxu0 %vm1543_vm13, %v2523_v43  ;;  %2488 = vrot.lane.b32.xlu1 %v2457_v48, %s3974_s28  ;;  %v1490_v44 = vsel %vm855_vm11, %v4280_v3, %v1330_v46 }
  0xff   : > { %2360 = vrot.lane.b32.xlu0 %v2329_v30, %s3975_s29 }
 0x100   : > { %v2461_v24 = vpop.permute.xlu1 %2460 }
 0x101   : > { %v2333_v13 = vpop.permute.xlu0 %2332 }
 0x102   : > { %v2493_v33 = vsel %vm855_vm11, %v4288_v23, %v2333_v13 }
 0x103   : > { %v2525_v62 = vsel %vm888_vm12, %v2493_v33, %v2461_v24  ;;  %853 = vrot.lane.b32.xlu0 %v822_v28, %s3974_s28  ;;  %v5073_v24 = vld [vmem:[#allocation6_spill] sm:$0xff] }
 0x104   : > { %3658 = vmatmul.mubr.msk.bf16.vlgmr.msra.gmra.mrb[0].mxu0 %vm1543_vm13, %v2525_v62  ;;  %v2335_v12 = vpop.permute.xlu1 %2334 }
 0x105   : > { %v1458_v17 = vpop.permute.xlu0 %1457  ;;  %v2495_v34 = vsel %vm855_vm11, %v4303_v51, %v2335_v12 }
 0x106   : > { %v1522_v38 = vsel %vm888_vm12, %v1490_v44, %v1458_v17  ;;  %v5074_v17 = vld [vmem:[#allocation9_spill] sm:$0xff] }
 0x107   : > { %3606 = vmatmul.mubr.msk.bf16.gmra.mrb[16].mxu1 %vm1543_vm13, %v1522_v38 }
 0x108   : > { %v1460_v31 = vpop.permute.xlu1 %1459 }
 0x109   : > { %v1332_v47 = vpop.permute.xlu0 %1331 }
 0x10a   : > { %v1492_v23 = vsel %vm855_vm11, %v4316_v19, %v1332_v47 }
 0x10b   : > { %v1524_v58 = vsel %vm888_vm12, %v1492_v23, %v1460_v31  ;;  %v5075_v23 = vld [vmem:[#allocation8_spill] sm:$0xff] }
 0x10c   : > { %3609 = vmatprep.mubr.msk.bf16.mxu1 %vm1543_vm13, %v1524_v58  ;;  %v2463_v41 = vpop.permute.xlu1 %2462 }
 0x10d   : > { %v2527_v3 = vsel %vm888_vm12, %v2495_v34, %v2463_v41  ;;  %v1334_v36 = vpop.permute.xlu0 %1333 }
 0x10e   : > { %3661 = vmatprep.mubr.msk.bf16.mxu0 %vm1543_vm13, %v2527_v3  ;;  %v1494_v51 = vsel %vm855_vm11, %v4329_v42, %v1334_v36 }
 0x110   : > { %v2465_v6 = vpop.permute.xlu1 %2464 }
 0x111   : > { %v2337_v1 = vpop.permute.xlu0 %2336 }
 0x112   : > { %v2497_v53 = vsel %vm855_vm11, %v4342_v2, %v2337_v1 }
 0x113   : > { %v2529_v19 = vsel %vm888_vm12, %v2497_v53, %v2465_v6  ;;  %v5076_v53 = vld [vmem:[#allocation10_spill] sm:$0xff] }
 0x114   : > { %3662 = vmatmul.mubr.msk.bf16.gmra.mrb[4].mxu0 %vm1543_vm13, %v2529_v19  ;;  %v2339_v29 = vpop.permute.xlu1 %2338 }
 0x115   : > { %v1462_v7 = vpop.permute.xlu0 %1461  ;;  %v2499_v35 = vsel %vm855_vm11, %v5069_v39, %v2339_v29 }
 0x116   : > { %v1526_v20 = vsel %vm888_vm12, %v1494_v51, %v1462_v7 }
 0x117   : > { %3610 = vmatmul.mubr.msk.bf16.gmra.mrb[20].mxu1 %vm1543_vm13, %v1526_v20 }
 0x118   : > { %v1464_v37 = vpop.permute.xlu1 %1463 }
 0x119   : > { %v1336_v14 = vpop.permute.xlu0 %1335 }
 0x11a   : > { %v1496_v5 = vsel %vm855_vm11, %v4365_v49, %v1336_v14 }
 0x11b   : > { %v1528_v2 = vsel %vm888_vm12, %v1496_v5, %v1464_v37 }
 0x11c   : > { %3613 = vmatprep.mubr.msk.bf16.mxu1 %vm1543_vm13, %v1528_v2  ;;  %v2467_v21 = vpop.permute.xlu1 %2466 }
 0x11d   : > { %v2531_v42 = vsel %vm888_vm12, %v2499_v35, %v2467_v21  ;;  %v1338_v15 = vpop.permute.xlu0 %1337 }
 0x11e   : > { %3665 = vmatprep.mubr.msk.bf16.mxu0 %vm1543_vm13, %v2531_v42  ;;  %v1498_v48 = vsel %vm855_vm11, %v5071_v32, %v1338_v15 }
 0x120   : > { %v2469_v8 = vpop.permute.xlu1 %2468 }
 0x121   : > { %v2341_v16 = vpop.permute.xlu0 %2340 }
 0x122   : > { %v2501_v55 = vsel %vm855_vm11, %v5070_v59, %v2341_v16 }
 0x123   : > { %v2533_v49 = vsel %vm888_vm12, %v2501_v55, %v2469_v8 }
 0x124   : > { %3666 = vmatmul.mubr.msk.bf16.gmra.mrb[8].mxu0 %vm1543_vm13, %v2533_v49  ;;  %v2343_v40 = vpop.permute.xlu1 %2342 }
 0x125   : > { %v1466_v54 = vpop.permute.xlu0 %1465  ;;  %v2503_v28 = vsel %vm855_vm11, %v5073_v24, %v2343_v40 }
 0x126   : > { %v1530_v50 = vsel %vm888_vm12, %v1498_v48, %v1466_v54 }
 0x127   : > { %3614 = vmatmul.mubr.msk.bf16.gmra.mrb[24].mxu1 %vm1543_vm13, %v1530_v50 }
 0x128   : > { %v1468_v30 = vpop.permute.xlu1 %1467 }
 0x129   : > { %v1340_v11 = vpop.permute.xlu0 %1339 }
 0x12a   : > { %v1500_v43 = vsel %vm855_vm11, %v5072_v60, %v1340_v11 }
 0x12b   : > { %v1532_v46 = vsel %vm888_vm12, %v1500_v43, %v1468_v30 }
 0x12c   : > { %3617 = vmatprep.mubr.msk.bf16.mxu1 %vm1543_vm13, %v1532_v46  ;;  %v2471_v13 = vpop.permute.xlu1 %2470 }
 0x12d   : > { %v2535_v33 = vsel %vm888_vm12, %v2503_v28, %v2471_v13  ;;  %v1342_v62 = vpop.permute.xlu0 %1341 }
 0x12e   : > { %3669 = vmatprep.mubr.msk.bf16.mxu0 %vm1543_vm13, %v2535_v33  ;;  %v1502_v58 = vsel %vm855_vm11, %v5075_v23, %v1342_v62 }
 0x130   : > { %v2473_v12 = vpop.permute.xlu1 %2472 }
 0x131   : > { %v2345_v44 = vpop.permute.xlu0 %2344 }
 0x132   : > { %v2505_v38 = vsel %vm855_vm11, %v5074_v17, %v2345_v44 }
 0x133   : > { %v2537_v31 = vsel %vm888_vm12, %v2505_v38, %v2473_v12 }
 0x134   : > { %3670 = vmatmul.mubr.msk.bf16.gmra.mrb[12].mxu0 %vm1543_vm13, %v2537_v31  ;;  %v2347_v47 = vpop.permute.xlu1 %2346 }
 0x135   : > { %v1470_v34 = vpop.permute.xlu0 %1469  ;;  %v2507_v19 = vsel %vm855_vm11, %v5076_v53, %v2347_v47 }
 0x136   : > { %v1534_v41 = vsel %vm888_vm12, %v1502_v58, %v1470_v34 }
 0x137   : > { %3618 = vmatmul.mubr.msk.bf16.gmra.mrb[28].mxu1 %vm1543_vm13, %v1534_v41 }
 0x138   : > { %v840_v3 = vpop.permute.xlu1 %839 }
 0x139   : > { %v711_v36 = vpop.permute.xlu0 %710 }
 0x13a   : > { %v873_v6 = vsel %vm855_vm11, %v4478_v61, %v711_v36 }
 0x13b   : > { %v906_v1 = vsel %vm888_vm12, %v873_v6, %v840_v3 }
 0x13c   : > { %3639 = vmatprep.mubr.msk.bf16.mxu1 %vm1543_vm13, %v906_v1  ;;  %v2475_v29 = vpop.permute.xlu1 %2474 }
 0x13d   : > { %v2539_v51 = vsel %vm888_vm12, %v2507_v19, %v2475_v29  ;;  %v713_v7 = vpop.permute.xlu0 %712 }
 0x13e   : > { %3673 = vmatprep.mubr.msk.bf16.mxu0 %vm1543_vm13, %v2539_v51  ;;  %v875_v2 = vsel %vm855_vm11, %v4502_v4, %v713_v7 }
 0x140   : > { %v2477_v20 = vpop.permute.xlu1 %2476 }
 0x141   : > { %v2349_v37 = vpop.permute.xlu0 %2348 }
 0x142   : > { %v2509_v14 = vsel %vm855_vm11, %v4520_v56, %v2349_v37 }
 0x143   : > { %v2541_v61 = vsel %vm888_vm12, %v2509_v14, %v2477_v20 }
 0x144   : > { %3674 = vmatmul.mubr.msk.bf16.gmra.mrb[16].mxu0 %vm1543_vm13, %v2541_v61  ;;  %v2351_v5 = vpop.permute.xlu1 %2350 }
 0x145   : > { %v842_v39 = vpop.permute.xlu0 %841  ;;  %v2511_v8 = vsel %vm855_vm11, %v4536_v18, %v2351_v5 }
 0x146   : > { %v908_v35 = vsel %vm888_vm12, %v875_v2, %v842_v39 }
 0x147   : > { %3640 = vmatmul.mubr.msk.bf16.vlgmr.msra.gmra.mrb[16].mxu1 %vm1543_vm13, %v908_v35 }
 0x148   : > { %v844_v21 = vpop.permute.xlu1 %843 }
 0x149   : > { %v715_v42 = vpop.permute.xlu0 %714 }
 0x14a   : > { %v877_v15 = vsel %vm855_vm11, %v4553_v0, %v715_v42 }
 0x14b   : > { %v910_v56 = vsel %vm888_vm12, %v877_v15, %v844_v21  ;;  %v4937_v21 = vld [vmem:[%s5051_s2] ss:$0 sm:$0xff] }
 0x14c   : > { %3643 = vmatprep.mubr.msk.bf16.mxu1 %vm1543_vm13, %v910_v56  ;;  %v2479_v16 = vpop.permute.xlu1 %2478 }
 0x14d   : > { %v2543_v4 = vsel %vm888_vm12, %v2511_v8, %v2479_v16  ;;  %v717_v59 = vpop.permute.xlu0 %716 }
 0x14e   : > { %3677 = vmatprep.mubr.msk.bf16.mxu0 %vm1543_vm13, %v2543_v4  ;;  %v879_v18 = vsel %vm855_vm11, %v4581_v45, %v717_v59 }
 0x150   : > { %v2481_v55 = vpop.permute.xlu1 %2480 }
 0x151   : > { %v2353_v49 = vpop.permute.xlu0 %2352 }
 0x152   : > { %v2513_v40 = vsel %vm855_vm11, %v4596_v22, %v2353_v49 }
 0x153   : > { %v2545_v0 = vsel %vm888_vm12, %v2513_v40, %v2481_v55 }
 0x154   : > { %3678 = vmatmul.mubr.msk.bf16.gmra.mrb[20].mxu0 %vm1543_vm13, %v2545_v0  ;;  %v2355_v32 = vpop.permute.xlu1 %2354 }
 0x155   : > { %v846_v48 = vpop.permute.xlu0 %845  ;;  %v2515_v60 = vsel %vm855_vm11, %v4617_v9, %v2355_v32 }
 0x156   : > { %v912_v54 = vsel %vm888_vm12, %v879_v18, %v846_v48 }
 0x157   : > { %3644 = vmatmul.mubr.msk.bf16.gmra.mrb[20].mxu1 %vm1543_vm13, %v912_v54 }
 0x158   : > { %v848_v50 = vpop.permute.xlu1 %847 }
 0x159   : > { %v719_v30 = vpop.permute.xlu0 %718 }
 0x15a   : > { %v881_v11 = vsel %vm855_vm11, %v4637_v27, %v719_v30 }
 0x15b   : > { %v914_v22 = vsel %vm888_vm12, %v881_v11, %v848_v50 }
 0x15c   : > { %3647 = vmatprep.mubr.msk.bf16.mxu1 %vm1543_vm13, %v914_v22  ;;  %v2483_v43 = vpop.permute.xlu1 %2482 }
 0x15d   : > { %v2547_v45 = vsel %vm888_vm12, %v2515_v60, %v2483_v43  ;;  %v721_v46 = vpop.permute.xlu0 %720 }
 0x15e   : > { %3681 = vmatprep.mubr.msk.bf16.mxu0 %vm1543_vm13, %v2547_v45  ;;  %v883_v9 = vsel %vm855_vm11, %v4660_v26, %v721_v46 }
 0x160   : > { %v2485_v24 = vpop.permute.xlu1 %2484 }
 0x161   : > { %v2357_v28 = vpop.permute.xlu0 %2356 }
 0x162   : > { %v2517_v13 = vsel %vm855_vm11, %v4671_v57, %v2357_v28 }
 0x163   : > { %v2549_v27 = vsel %vm888_vm12, %v2517_v13, %v2485_v24 }
 0x164   : > { %3682 = vmatmul.mubr.msk.bf16.gmra.mrb[24].mxu0 %vm1543_vm13, %v2549_v27  ;;  %v2359_v33 = vpop.permute.xlu1 %2358 }
 0x165   : > { %v850_v62 = vpop.permute.xlu0 %849  ;;  %v2519_v31 = vsel %vm855_vm11, %v4697_v63, %v2359_v33 }
 0x166   : > { %v916_v12 = vsel %vm888_vm12, %v883_v9, %v850_v62 }
 0x167   : > { %3648 = vmatmul.mubr.msk.bf16.gmra.mrb[24].mxu1 %vm1543_vm13, %v916_v12 }
 0x168   : > { %v852_v44 = vpop.permute.xlu1 %851 }
 0x169   : > { %v723_v17 = vpop.permute.xlu0 %722 }
 0x16a   : > { %v885_v38 = vsel %vm855_vm11, %v4717_v10, %v723_v17 }
 0x16b   : > { %v918_v57 = vsel %vm888_vm12, %v885_v38, %v852_v44 }
 0x16c   : > { %3651 = vmatprep.mubr.msk.bf16.mxu1 %vm1543_vm13, %v918_v57  ;;  %v2487_v47 = vpop.permute.xlu1 %2486 }
 0x16d   : > { %v2551_v26 = vsel %vm888_vm12, %v2519_v31, %v2487_v47  ;;  %v725_v23 = vpop.permute.xlu0 %724 }
 0x16e   : > { %3685 = vmatprep.mubr.msk.bf16.mxu0 %vm1543_vm13, %v2551_v26  ;;  %v887_v63 = vsel %vm855_vm11, %v4734_v52, %v725_v23 }
 0x170   : > { %v2489_v58 = vpop.permute.xlu1 %2488 }
 0x171   : > { %v2361_v34 = vpop.permute.xlu0 %2360 }
 0x172   : > { %v2521_v41 = vsel %vm855_vm11, %v4755_v25, %v2361_v34 }
 0x173   : > { %v2553_v10 = vsel %vm888_vm12, %v2521_v41, %v2489_v58 }
 0x174   : > { %3686 = vmatmul.mubr.msk.bf16.gmra.mrb[28].mxu0 %vm1543_vm13, %v2553_v10 }
 0x175   : > { %v854_v3 = vpop.permute.xlu0 %853 }
 0x176   : > { %v920_v36 = vsel %vm888_vm12, %v887_v63, %v854_v3 }
 0x177   : > { %3652 = vmatmul.mubr.msk.bf16.gmra.mrb[28].mxu1 %vm1543_vm13, %v920_v36 }
 0x197   : > { %v3591_v6 = vpop.f32.mrb[0].mxu1 }
 0x198   : > { %v1614_v1 = vpop.f32.mrb[1].mxu1 }
 0x199   : > { %v3592_v53 = vpop.f32.mrb[2].mxu1 }
 0x19a   : > { %v1617_v19 = vpop.f32.mrb[3].mxu1 }
 0x1a7   : > { %v3595_v29 = vpop.f32.mrb[4].mxu1 }
 0x1a8   : > { %v1630_v51 = vpop.f32.mrb[5].mxu1 }
 0x1a9   : > { %v3596_v7 = vpop.f32.mrb[6].mxu1 }
 0x1aa   : > { %v1633_v25 = vpop.f32.mrb[7].mxu1 }
 0x1b7   : > { %v3599_v20 = vpop.f32.mrb[8].mxu1 }
 0x1b8   : > { %v1646_v37 = vpop.f32.mrb[9].mxu1 }
 0x1b9   : > { %v3600_v14 = vpop.f32.mrb[10].mxu1 }
 0x1ba   : > { %v4924_v61 = vpop.f32.mrb[11].mxu1 }
 0x1c7   : > { %v4926_v5 = vpop.f32.mrb[12].mxu1 }
 0x1c8   : > { %v4928_v52 = vpop.f32.mrb[13].mxu1 }
 0x1c9   : > { %v4930_v2 = vpop.f32.mrb[14].mxu1 }
 0x1ca   : > { %v4932_v39 = vpop.f32.mrb[15].mxu1 }
 0x1d7   : > { %v3659_v35 = vpop.f32.mrb[0].mxu0 }
 0x1d8   : > { %v3691_v42 = vadd.f32 %v3659_v35, %v3591_v6  ;;  %v2631_v15 = vpop.f32.mrb[1].mxu0 }
 0x1d9   : > { %v3692_v56 = vadd.f32 %v2631_v15, %v1614_v1  ;;  %v3660_v8 = vpop.f32.mrb[2].mxu0 }
 0x1da   : > { %v2799_v16 = vadd.f32 %v3691_v42, %v4937_v21  ;;  %v3693_v4 = vadd.f32 %v3660_v8, %v3592_v53  ;;  %v2634_v59 = vpop.f32.mrb[3].mxu0 }
 0x1db   : > { %v2797_v55 = vadd.f32 %v3692_v56, %v4937_v21  ;;  %v3694_v49 = vadd.f32 %v2634_v59, %v1617_v19 }
 0x1dc   : > { %v2831_v40 = vmax.f32 %v2799_v16, 0.0  ;;  %v2800_v0 = vadd.f32 %v3693_v4, %v4937_v21 }
 0x1dd   : > { %v2829_v32 = vmax.f32 %v2797_v55, 0.0  ;;  %v2798_v18 = vadd.f32 %v3694_v49, %v4937_v21 }
 0x1de   : > { %v3506_v48 = vpack.c.bf16 %v2831_v40, %v2831_v40  ;;  %v2832_v54 = vmax.f32 %v2800_v0, 0.0 }
 0x1df   : > { %v3504_v50 = vpack.c.bf16 %v2829_v32, %v2829_v32  ;;  %v2830_v30 = vmax.f32 %v2798_v18, 0.0 }
 0x1e0   : > { %2992 = vst.msk [vmem:[%s4082_s22 + $0x8] sm:$0xf] %vm199_vm0, %v3506_v48  ;;  %v3507_v11 = vpack.c.bf16 %v2832_v54, %v2832_v54 }
 0x1e1   : > { %2990 = vst.msk [vmem:[%s4082_s22] sm:$0xf] %vm199_vm0, %v3504_v50  ;;  %v3505_v22 = vpack.c.bf16 %v2830_v30, %v2830_v30 }
 0x1e2   : > { %2993 = vst.msk [vmem:[%s4082_s22 + $0xc] sm:$0xf] %vm199_vm0, %v3507_v11 }
 0x1e3   : > { %2991 = vst.msk [vmem:[%s4082_s22 + $0x4] sm:$0xf] %vm199_vm0, %v3505_v22 }
 0x1e7   : > { %v3663_v60 = vpop.f32.mrb[4].mxu0 }
 0x1e8   : > { %v3695_v43 = vadd.f32 %v3663_v60, %v3595_v29  ;;  %v2647_v45 = vpop.f32.mrb[5].mxu0 }
 0x1e9   : > { %v3696_v46 = vadd.f32 %v2647_v45, %v1630_v51  ;;  %v3664_v24 = vpop.f32.mrb[6].mxu0 }
 0x1ea   : > { %v2803_v28 = vadd.f32 %v3695_v43, %v4937_v21  ;;  %v3697_v13 = vadd.f32 %v3664_v24, %v3596_v7  ;;  %v2650_v27 = vpop.f32.mrb[7].mxu0 }
 0x1eb   : > { %v2801_v33 = vadd.f32 %v3696_v46, %v4937_v21  ;;  %v3698_v9 = vadd.f32 %v2650_v27, %v1633_v25 }
 0x1ec   : > { %v2835_v62 = vmax.f32 %v2803_v28, 0.0  ;;  %v2804_v12 = vadd.f32 %v3697_v13, %v4937_v21 }
 0x1ed   : > { %v2833_v44 = vmax.f32 %v2801_v33, 0.0  ;;  %v2802_v17 = vadd.f32 %v3698_v9, %v4937_v21 }
 0x1ee   : > { %v3510_v38 = vpack.c.bf16 %v2835_v62, %v2835_v62  ;;  %v2836_v57 = vmax.f32 %v2804_v12, 0.0 }
 0x1ef   : > { %v3508_v31 = vpack.c.bf16 %v2833_v44, %v2833_v44  ;;  %v2834_v47 = vmax.f32 %v2802_v17, 0.0 }
 0x1f0   : > { %2996 = vst.msk [vmem:[%s4082_s22 + $0x18] sm:$0xf] %vm199_vm0, %v3510_v38  ;;  %v3511_v26 = vpack.c.bf16 %v2836_v57, %v2836_v57 }
 0x1f1   : > { %2994 = vst.msk [vmem:[%s4082_s22 + $0x10] sm:$0xf] %vm199_vm0, %v3508_v31  ;;  %v3509_v23 = vpack.c.bf16 %v2834_v47, %v2834_v47 }
 0x1f2   : > { %2997 = vst.msk [vmem:[%s4082_s22 + $0x1c] sm:$0xf] %vm199_vm0, %v3511_v26 }
 0x1f3   : > { %2995 = vst.msk [vmem:[%s4082_s22 + $0x14] sm:$0xf] %vm199_vm0, %v3509_v23 }
 0x1f7   : > { %v3667_v58 = vpop.f32.mrb[8].mxu0 }
 0x1f8   : > { %v3699_v34 = vadd.f32 %v3667_v58, %v3599_v20  ;;  %v2663_v41 = vpop.f32.mrb[9].mxu0 }
 0x1f9   : > { %v3700_v10 = vadd.f32 %v2663_v41, %v1646_v37  ;;  %v3668_v63 = vpop.f32.mrb[10].mxu0 }
 0x1fa   : > { %v2807_v3 = vadd.f32 %v3699_v34, %v4937_v21  ;;  %v3701_v36 = vadd.f32 %v3668_v63, %v3600_v14  ;;  %v2666_v6 = vpop.f32.mrb[11].mxu0 }
 0x1fb   : > { %v2805_v1 = vadd.f32 %v3700_v10, %v4937_v21  ;;  %v3702_v53 = vadd.f32 %v2666_v6, %v4924_v61 }
 0x1fc   : > { %v2839_v19 = vmax.f32 %v2807_v3, 0.0  ;;  %v2808_v29 = vadd.f32 %v3701_v36, %v4937_v21 }
 0x1fd   : > { %v2837_v51 = vmax.f32 %v2805_v1, 0.0  ;;  %v2806_v7 = vadd.f32 %v3702_v53, %v4937_v21 }
 0x1fe   : > { %v3514_v25 = vpack.c.bf16 %v2839_v19, %v2839_v19  ;;  %v2840_v20 = vmax.f32 %v2808_v29, 0.0 }
 0x1ff   : > { %v3512_v37 = vpack.c.bf16 %v2837_v51, %v2837_v51  ;;  %v2838_v35 = vmax.f32 %v2806_v7, 0.0 }
 0x200   : > { %3000 = vst.msk [vmem:[%s4082_s22 + $0x28] sm:$0xf] %vm199_vm0, %v3514_v25  ;;  %v3515_v14 = vpack.c.bf16 %v2840_v20, %v2840_v20 }
 0x201   : > { %2998 = vst.msk [vmem:[%s4082_s22 + $0x20] sm:$0xf] %vm199_vm0, %v3512_v37  ;;  %v3513_v42 = vpack.c.bf16 %v2838_v35, %v2838_v35 }
 0x202   : > { %3001 = vst.msk [vmem:[%s4082_s22 + $0x2c] sm:$0xf] %vm199_vm0, %v3515_v14 }
 0x203   : > { %2999 = vst.msk [vmem:[%s4082_s22 + $0x24] sm:$0xf] %vm199_vm0, %v3513_v42 }
 0x207   : > { %v3671_v61 = vpop.f32.mrb[12].mxu0 }
 0x208   : > { %v3703_v15 = vadd.f32 %v3671_v61, %v4926_v5  ;;  %v2679_v56 = vpop.f32.mrb[13].mxu0 }
 0x209   : > { %v3704_v8 = vadd.f32 %v2679_v56, %v4928_v52  ;;  %v3672_v16 = vpop.f32.mrb[14].mxu0 }
 0x20a   : > { %v2811_v4 = vadd.f32 %v3703_v15, %v4937_v21  ;;  %v3705_v59 = vadd.f32 %v3672_v16, %v4930_v2  ;;  %v2682_v55 = vpop.f32.mrb[15].mxu0 }
 0x20b   : > { %v2809_v49 = vadd.f32 %v3704_v8, %v4937_v21  ;;  %v3706_v40 = vadd.f32 %v2682_v55, %v4932_v39 }
 0x20c   : > { %v2843_v0 = vmax.f32 %v2811_v4, 0.0  ;;  %v2812_v5 = vadd.f32 %v3705_v59, %v4937_v21 }
 0x20d   : > { %v2841_v32 = vmax.f32 %v2809_v49, 0.0  ;;  %v2810_v18 = vadd.f32 %v3706_v40, %v4937_v21 }
 0x20e   : > { %v3518_v52 = vpack.c.bf16 %v2843_v0, %v2843_v0  ;;  %v2844_v48 = vmax.f32 %v2812_v5, 0.0 }
 0x20f   : > { %v3516_v54 = vpack.c.bf16 %v2841_v32, %v2841_v32  ;;  %v2842_v50 = vmax.f32 %v2810_v18, 0.0 }
 0x210   : > { %3004 = vst.msk [vmem:[%s4082_s22 + $0x38] sm:$0xf] %vm199_vm0, %v3518_v52  ;;  %v3519_v2 = vpack.c.bf16 %v2844_v48, %v2844_v48 }
 0x211   : > { %3002 = vst.msk [vmem:[%s4082_s22 + $0x30] sm:$0xf] %vm199_vm0, %v3516_v54  ;;  %v3517_v30 = vpack.c.bf16 %v2842_v50, %v2842_v50 }
 0x212   : > { %3005 = vst.msk [vmem:[%s4082_s22 + $0x3c] sm:$0xf] %vm199_vm0, %v3519_v2 }
 0x213   : > { %3003 = vst.msk [vmem:[%s4082_s22 + $0x34] sm:$0xf] %vm199_vm0, %v3517_v30 }
 0x217   : > { %v3675_v39 = vpop.f32.mrb[16].mxu0 }
 0x218   : > { %v2695_v11 = vpop.f32.mrb[17].mxu0 }
 0x219   : > { %v3676_v22 = vpop.f32.mrb[18].mxu0 }
 0x21a   : > { %v3641_v60 = vpop.f32.mrb[16].mxu1  ;;  %v2698_v43 = vpop.f32.mrb[19].mxu0 }
 0x21b   : > { %v3707_v45 = vadd.f32 %v3675_v39, %v3641_v60  ;;  %v1879_v46 = vpop.f32.mrb[17].mxu1 }
 0x21c   : > { %v3708_v24 = vadd.f32 %v2695_v11, %v1879_v46  ;;  %v3642_v28 = vpop.f32.mrb[18].mxu1 }
 0x21d   : > { %v2815_v13 = vadd.f32 %v3707_v45, %v4937_v21  ;;  %v3709_v27 = vadd.f32 %v3676_v22, %v3642_v28  ;;  %v1882_v33 = vpop.f32.mrb[19].mxu1 }
 0x21e   : > { %v2813_v9 = vadd.f32 %v3708_v24, %v4937_v21  ;;  %v3710_v62 = vadd.f32 %v2698_v43, %v1882_v33 }
 0x21f   : > { %v2847_v12 = vmax.f32 %v2815_v13, 0.0  ;;  %v2816_v44 = vadd.f32 %v3709_v27, %v4937_v21 }
 0x220   : > { %v2845_v17 = vmax.f32 %v2813_v9, 0.0  ;;  %v2814_v38 = vadd.f32 %v3710_v62, %v4937_v21 }
 0x221   : > { %v3522_v57 = vpack.c.bf16 %v2847_v12, %v2847_v12  ;;  %v2848_v31 = vmax.f32 %v2816_v44, 0.0 }
 0x222   : > { %v3520_v47 = vpack.c.bf16 %v2845_v17, %v2845_v17  ;;  %v2846_v26 = vmax.f32 %v2814_v38, 0.0 }
 0x223   : > { %3008 = vst.msk [vmem:[%s4082_s22 + $0x48] sm:$0xf] %vm199_vm0, %v3522_v57  ;;  %v3523_v23 = vpack.c.bf16 %v2848_v31, %v2848_v31 }
 0x224   : > { %3006 = vst.msk [vmem:[%s4082_s22 + $0x40] sm:$0xf] %vm199_vm0, %v3520_v47  ;;  %v3521_v58 = vpack.c.bf16 %v2846_v26, %v2846_v26 }
 0x225   : > { %3009 = vst.msk [vmem:[%s4082_s22 + $0x4c] sm:$0xf] %vm199_vm0, %v3523_v23 }
 0x226   : > { %3007 = vst.msk [vmem:[%s4082_s22 + $0x44] sm:$0xf] %vm199_vm0, %v3521_v58 }
 0x227   : > { %v3679_v34 = vpop.f32.mrb[20].mxu0 }
 0x228   : > { %v2711_v41 = vpop.f32.mrb[21].mxu0 }
 0x229   : > { %v3680_v10 = vpop.f32.mrb[22].mxu0 }
 0x22a   : > { %v3645_v63 = vpop.f32.mrb[20].mxu1  ;;  %v2714_v3 = vpop.f32.mrb[23].mxu0 }
 0x22b   : > { %v3711_v36 = vadd.f32 %v3679_v34, %v3645_v63  ;;  %v1895_v6 = vpop.f32.mrb[21].mxu1 }
 0x22c   : > { %v3712_v1 = vadd.f32 %v2711_v41, %v1895_v6  ;;  %v3646_v53 = vpop.f32.mrb[22].mxu1 }
 0x22d   : > { %v2819_v19 = vadd.f32 %v3711_v36, %v4937_v21  ;;  %v3713_v29 = vadd.f32 %v3680_v10, %v3646_v53  ;;  %v1898_v51 = vpop.f32.mrb[23].mxu1 }
 0x22e   : > { %v2817_v7 = vadd.f32 %v3712_v1, %v4937_v21  ;;  %v3714_v25 = vadd.f32 %v2714_v3, %v1898_v51 }
 0x22f   : > { %v2851_v20 = vmax.f32 %v2819_v19, 0.0  ;;  %v2820_v37 = vadd.f32 %v3713_v29, %v4937_v21 }
 0x230   : > { %v2849_v35 = vmax.f32 %v2817_v7, 0.0  ;;  %v2818_v14 = vadd.f32 %v3714_v25, %v4937_v21 }
 0x231   : > { %v3526_v42 = vpack.c.bf16 %v2851_v20, %v2851_v20  ;;  %v2852_v61 = vmax.f32 %v2820_v37, 0.0 }
 0x232   : > { %v3524_v15 = vpack.c.bf16 %v2849_v35, %v2849_v35  ;;  %v2850_v56 = vmax.f32 %v2818_v14, 0.0 }
 0x233   : > { %3012 = vst.msk [vmem:[%s4082_s22 + $0x58] sm:$0xf] %vm199_vm0, %v3526_v42  ;;  %v3527_v8 = vpack.c.bf16 %v2852_v61, %v2852_v61 }
 0x234   : > { %3010 = vst.msk [vmem:[%s4082_s22 + $0x50] sm:$0xf] %vm199_vm0, %v3524_v15  ;;  %v3525_v16 = vpack.c.bf16 %v2850_v56, %v2850_v56 }
 0x235   : > { %3013 = vst.msk [vmem:[%s4082_s22 + $0x5c] sm:$0xf] %vm199_vm0, %v3527_v8 }
 0x236   : > { %3011 = vst.msk [vmem:[%s4082_s22 + $0x54] sm:$0xf] %vm199_vm0, %v3525_v16 }
 0x237   : > { %v3683_v4 = vpop.f32.mrb[24].mxu0 }
 0x238   : > { %v2727_v59 = vpop.f32.mrb[25].mxu0 }
 0x239   : > { %v3684_v55 = vpop.f32.mrb[26].mxu0 }
 0x23a   : > { %v3649_v49 = vpop.f32.mrb[24].mxu1  ;;  %v2730_v40 = vpop.f32.mrb[27].mxu0 }
 0x23b   : > { %v3715_v0 = vadd.f32 %v3683_v4, %v3649_v49  ;;  %v1911_v5 = vpop.f32.mrb[25].mxu1 }
 0x23c   : > { %v3716_v32 = vadd.f32 %v2727_v59, %v1911_v5  ;;  %v3650_v18 = vpop.f32.mrb[26].mxu1 }
 0x23d   : > { %v2823_v52 = vadd.f32 %v3715_v0, %v4937_v21  ;;  %v3717_v48 = vadd.f32 %v3684_v55, %v3650_v18  ;;  %v1914_v54 = vpop.f32.mrb[27].mxu1 }
 0x23e   : > { %v2821_v50 = vadd.f32 %v3716_v32, %v4937_v21  ;;  %v3718_v2 = vadd.f32 %v2730_v40, %v1914_v54 }
 0x23f   : > { %v2855_v30 = vmax.f32 %v2823_v52, 0.0  ;;  %v2824_v39 = vadd.f32 %v3717_v48, %v4937_v21 }
 0x240   : > { %v2853_v11 = vmax.f32 %v2821_v50, 0.0  ;;  %v2822_v22 = vadd.f32 %v3718_v2, %v4937_v21 }
 0x241   : > { %v3530_v60 = vpack.c.bf16 %v2855_v30, %v2855_v30  ;;  %v2856_v43 = vmax.f32 %v2824_v39, 0.0 }
 0x242   : > { %v3528_v45 = vpack.c.bf16 %v2853_v11, %v2853_v11  ;;  %v2854_v46 = vmax.f32 %v2822_v22, 0.0 }
 0x243   : > { %3016 = vst.msk [vmem:[%s4082_s22 + $0x68] sm:$0xf] %vm199_vm0, %v3530_v60  ;;  %v3531_v24 = vpack.c.bf16 %v2856_v43, %v2856_v43 }
 0x244   : > { %3014 = vst.msk [vmem:[%s4082_s22 + $0x60] sm:$0xf] %vm199_vm0, %v3528_v45  ;;  %v3529_v28 = vpack.c.bf16 %v2854_v46, %v2854_v46 }
 0x245   : > { %3017 = vst.msk [vmem:[%s4082_s22 + $0x6c] sm:$0xf] %vm199_vm0, %v3531_v24 }
 0x246   : > { %3015 = vst.msk [vmem:[%s4082_s22 + $0x64] sm:$0xf] %vm199_vm0, %v3529_v28 }
 0x247   : > { %v3687_v13 = vpop.f32.mrb[28].mxu0 }
 0x248   : > { %v2743_v27 = vpop.f32.mrb[29].mxu0 }
 0x249   : > { %v3688_v33 = vpop.f32.mrb[30].mxu0 }
 0x24a   : > { %v3653_v9 = vpop.f32.mrb[28].mxu1  ;;  %v2746_v62 = vpop.f32.mrb[31].mxu0 }
 0x24b   : > { %v3719_v12 = vadd.f32 %v3687_v13, %v3653_v9  ;;  %v1927_v44 = vpop.f32.mrb[29].mxu1 }
 0x24c   : > { %v3720_v17 = vadd.f32 %v2743_v27, %v1927_v44  ;;  %v3654_v38 = vpop.f32.mrb[30].mxu1 }
 0x24d   : > { %v2827_v57 = vadd.f32 %v3719_v12, %v4937_v21  ;;  %v3721_v31 = vadd.f32 %v3688_v33, %v3654_v38  ;;  %v1930_v47 = vpop.f32.mrb[31].mxu1 }
 0x24e   : > { %v2825_v26 = vadd.f32 %v3720_v17, %v4937_v21  ;;  %v3722_v23 = vadd.f32 %v2746_v62, %v1930_v47 }
 0x24f   : > { %v2859_v58 = vmax.f32 %v2827_v57, 0.0  ;;  %v2828_v34 = vadd.f32 %v3721_v31, %v4937_v21 }
 0x250   : > { %v2857_v41 = vmax.f32 %v2825_v26, 0.0  ;;  %v2826_v10 = vadd.f32 %v3722_v23, %v4937_v21 }
 0x251   : > { %v3534_v63 = vpack.c.bf16 %v2859_v58, %v2859_v58  ;;  %v2860_v3 = vmax.f32 %v2828_v34, 0.0 }
 0x252   : > { %v3532_v36 = vpack.c.bf16 %v2857_v41, %v2857_v41  ;;  %v2858_v6 = vmax.f32 %v2826_v10, 0.0 }
 0x253   : > { %3020 = vst.msk [vmem:[%s4082_s22 + $0x78] sm:$0xf] %vm199_vm0, %v3534_v63  ;;  %v3535_v1 = vpack.c.bf16 %v2860_v3, %v2860_v3 }
 0x254   : > { %3018 = vst.msk [vmem:[%s4082_s22 + $0x70] sm:$0xf] %vm199_vm0, %v3532_v36  ;;  %v3533_v53 = vpack.c.bf16 %v2858_v6, %v2858_v6 }
 0x255   : > { %3021 = vst.msk [vmem:[%s4082_s22 + $0x7c] sm:$0xf] %vm199_vm0, %v3535_v1 }
 0x256   : > { %3019 = vst.msk [vmem:[%s4082_s22 + $0x74] sm:$0xf] %vm199_vm0, %v3533_v53 }
 0x257 PF: > { %s13_s14 = sadd.s32 1, %s3967_s14   ;;  %s5077_s12 = smov %s3963_s13 }
 0x258   : > { %p10_p6 = scmp.ge.s32.totalorder %s13_s14, 4   ;;  %s5078_s13 = smov %s5080_s15 }
 0x25a   :  { %12 = sbr.rel (!%p10_p6) target bundleno = 2 (0x2), region = 91 }

</bundles_post_ra>
